<compile_context>
chip_gen: v7x
topology: tpu7x:2x2x1
jax: 0.10.0
libtpu: 0.0.40
codegen_flags: <defaults>
</compile_context>

<pallas_src>
import jax
import jax.numpy as jnp
from jax import lax
from jax.experimental import pallas as pl
from jax.experimental.pallas import tpu as pltpu

# ----------------------------- model / tiling constants -----------------------------
# Small shapes consistent with FLAME (real model: V=5023, 100 shape, 50 expr, 5 joints).
V = 2048                       # vertices; chosen so V and V*3 are multiples of 128 (no padding)
N_JOINTS = 5                   # global, neck, jaw, eye_l, eye_r
PARENTS = (-1, 0, 1, 1, 1)     # FLAME kinematic tree
SHAPE_PARAMS = 32
EXPR_PARAMS = 16
L_BETAS = SHAPE_PARAMS + EXPR_PARAMS          # 48
L_POSE = (N_JOINTS - 1) * 9                   # 36 pose-corrective coefficients
L_TOTAL = L_BETAS + L_POSE                    # 84
BATCH = 2

LANES = 128
N_FLAT = V * 3                 # 6144 flattened (v, xyz) elements
R_ROWS = N_FLAT // LANES       # 48 lane-dense rows
TILE_R = 24                    # -> grid of 2 (even for v7x megacore); 24 % 8 == 0
RV_ROWS = V // LANES           # 16 lane-dense rows of per-coordinate (planar) vertex space
TILE_RV = 8                    # -> grid of 2

HIGH = lax.Precision.HIGHEST   # keep the plain-JAX einsums in true f32 for a fair comparison


# ----------------------------- Pallas kernel 1: blend shapes ------------------------
def _blend_kernel(coeffs_ref, basis_ref, tmpl_ref, vshaped_ref, vposed_ref):
    """Fused shape/expression/pose-corrective linear model.

    coeffs_ref : (BATCH, L_TOTAL)          f32 SMEM (scalar prefetch) [betas ++ pose_feature]
    basis_ref  : (L_TOTAL, TILE_R, LANES)  f32 VMEM coefficient-leading lane-dense basis
    tmpl_ref   : (TILE_R, LANES)           f32 VMEM v_template tile
    vshaped_ref: (BATCH, TILE_R, LANES)    f32 VMEM v_template + shapedirs . betas
    vposed_ref : (BATCH, TILE_R, LANES)    f32 VMEM v_shaped   + posedirs . pose_feature
    """
    tmpl = tmpl_ref[...]

    def mac(p, accs):
        # One scalar*vector VPU multiply-accumulate per batch element.  Each SMEM coefficient
        # is read exactly once per grid step (p-loop is the outermost loop over the tile).
        basis_p = basis_ref[p]                                    # (TILE_R, LANES)
        return tuple(accs[b] + coeffs_ref[b, p] * basis_p for b in range(BATCH))

    zero = jnp.zeros((TILE_R, LANES), dtype=jnp.float32)
    accs = tuple(zero for _ in range(BATCH))

    # Shape + expression blend shapes.
    accs = lax.fori_loop(0, L_BETAS, mac, accs, unroll=True)
    for b in range(BATCH):
        vshaped_ref[b] = tmpl + accs[b]

    # Pose correctives continue accumulating on the same register-resident accumulators.
    accs = lax.fori_loop(L_BETAS, L_TOTAL, mac, accs, unroll=True)
    for b in range(BATCH):
        vposed_ref[b] = tmpl + accs[b]


def _blend_shapes_pallas(coeffs, basis_prep, tmpl_prep):
    grid = (R_ROWS // TILE_R,)     # (2,) - even, megacore friendly
    out_shape = (
        jax.ShapeDtypeStruct((BATCH, R_ROWS, LANES), jnp.float32),
        jax.ShapeDtypeStruct((BATCH, R_ROWS, LANES), jnp.float32),
    )
    flops = 2 * BATCH * L_TOTAL * N_FLAT
    bytes_accessed = (L_TOTAL * N_FLAT + N_FLAT + 2 * BATCH * N_FLAT + BATCH * L_TOTAL) * 4
    return pl.pallas_call(
        _blend_kernel,
        out_shape=out_shape,
        grid_spec=pltpu.PrefetchScalarGridSpec(
            num_scalar_prefetch=1,                       # coefficients -> SMEM
            grid=grid,
            in_specs=[
                pl.BlockSpec((L_TOTAL, TILE_R, LANES), lambda i, c: (0, i, 0)),   # basis tile
                pl.BlockSpec((TILE_R, LANES), lambda i, c: (i, 0)),               # template tile
            ],
            out_specs=[
                pl.BlockSpec((BATCH, TILE_R, LANES), lambda i, c: (0, i, 0)),
                pl.BlockSpec((BATCH, TILE_R, LANES), lambda i, c: (0, i, 0)),
            ],
        ),
        compiler_params=pltpu.CompilerParams(dimension_semantics=("parallel",)),
        cost_estimate=pl.CostEstimate(
            flops=flops, bytes_accessed=bytes_accessed, transcendentals=0),
    )(coeffs, basis_prep, tmpl_prep)


# ----------------------------- Pallas kernel 2: LBS skinning ------------------------
def _skin_kernel(a_ref, w_ref, vposed_ref, out_ref):
    """Linear-blend skinning on planar x/y/z layouts (pure VPU MACs).

    a_ref      : (BATCH * N_JOINTS * 12,)    f32 SMEM (scalar prefetch) rows 0..2 of each A
    w_ref      : (N_JOINTS, TILE_RV, LANES)  f32 VMEM per-joint skinning weights (planar)
    vposed_ref : (BATCH, 3, TILE_RV, LANES)  f32 VMEM x/y/z planes of v_posed
    out_ref    : (BATCH, 3, TILE_RV, LANES)  f32 VMEM skinned vertices (planar)
    """
    for b in range(BATCH):
        x = vposed_ref[b, 0]
        y = vposed_ref[b, 1]
        z = vposed_ref[b, 2]
        ox = jnp.zeros((TILE_RV, LANES), dtype=jnp.float32)
        oy = jnp.zeros_like(ox)
        oz = jnp.zeros_like(ox)
        for j in range(N_JOINTS):                              # 5 joints, static unrolled
            w = w_ref[j]
            base = (b * N_JOINTS + j) * 12
            a = [a_ref[base + k] for k in range(12)]
            ox = ox + w * (a[0] * x + a[1] * y + a[2] * z + a[3])
            oy = oy + w * (a[4] * x + a[5] * y + a[6] * z + a[7])
            oz = oz + w * (a[8] * x + a[9] * y + a[10] * z + a[11])
        out_ref[b, 0] = ox
        out_ref[b, 1] = oy
        out_ref[b, 2] = oz


def _skinning_pallas(a_flat, w_planar, vposed_planar):
    grid = (RV_ROWS // TILE_RV,)   # (2,)
    return pl.pallas_call(
        _skin_kernel,
        out_shape=jax.ShapeDtypeStruct((BATCH, 3, RV_ROWS, LANES), jnp.float32),
        grid_spec=pltpu.PrefetchScalarGridSpec(
            num_scalar_prefetch=1,                       # per-joint 4x4 transforms -> SMEM
            grid=grid,
            in_specs=[
                pl.BlockSpec((N_JOINTS, TILE_RV, LANES), lambda i, a: (0, i, 0)),
                pl.BlockSpec((BATCH, 3, TILE_RV, LANES), lambda i, a: (0, 0, i, 0)),
            ],
            out_specs=pl.BlockSpec((BATCH, 3, TILE_RV, LANES), lambda i, a: (0, 0, i, 0)),
        ),
        compiler_params=pltpu.CompilerParams(dimension_semantics=("parallel",)),
    )(a_flat, w_planar, vposed_planar)


# ----------------------------- plain-JAX helpers (tiny scalar math) -----------------
def batch_rodrigues(rot_vecs):
    """(N, 3) axis-angle -> (N, 3, 3) rotation matrices."""
    angle = jnp.linalg.norm(rot_vecs + 1e-8, axis=1, keepdims=True)        # (N, 1)
    rot_dir = rot_vecs / angle
    cos = jnp.cos(angle)[:, :, None]
    sin = jnp.sin(angle)[:, :, None]
    rx, ry, rz = rot_dir[:, 0], rot_dir[:, 1], rot_dir[:, 2]
    zeros = jnp.zeros_like(rx)
    K = jnp.stack([zeros, -rz, ry,
                   rz, zeros, -rx,
                   -ry, rx, zeros], axis=1).reshape(-1, 3, 3)
    ident = jnp.eye(3, dtype=rot_vecs.dtype)[None]
    return ident + sin * K + (1.0 - cos) * jnp.matmul(K, K)


def _transform_mat(R, t):
    top = jnp.concatenate([R, t[..., None]], axis=-1)                      # (..., 3, 4)
    bottom = jnp.broadcast_to(jnp.array([0.0, 0.0, 0.0, 1.0], R.dtype),
                              R.shape[:-2] + (1, 4))
    return jnp.concatenate([top, bottom], axis=-2)                         # (..., 4, 4)


def batch_rigid_transform(rot_mats, joints):
    """rot_mats (B,J,3,3), rest joints (B,J,3) -> (posed_joints, rest-corrected A (B,J,4,4))."""
    rel = [joints[:, 0]]
    for j in range(1, N_JOINTS):
        rel.append(joints[:, j] - joints[:, PARENTS[j]])
    rel_joints = jnp.stack(rel, axis=1)
    local = _transform_mat(rot_mats, rel_joints)                           # (B, J, 4, 4)
    chain = [local[:, 0]]
    for j in range(1, N_JOINTS):
        chain.append(jnp.matmul(chain[PARENTS[j]], local[:, j]))
    transforms = jnp.stack(chain, axis=1)                                  # global transforms
    corr = jnp.einsum('bjrc,bjc->bjr', transforms[:, :, :3, :3], joints)
    A = transforms.at[:, :, :3, 3].add(-corr)                              # A = G - pad(G_R j)
    posed_joints = transforms[:, :, :3, 3]
    return posed_joints, A


# ----------------------------- model-load constant prep -----------------------------
def prepare_flame_constants(model):
    """One-time re-layout of the constant FLAME buffers for the kernels."""
    shape_basis = model['shapedirs'].reshape(N_FLAT, L_BETAS).T            # (L_BETAS, V*3)
    basis = jnp.concatenate([shape_basis, model['posedirs']], axis=0)      # (L_TOTAL, V*3)
    basis_prep = basis.reshape(L_TOTAL, R_ROWS, LANES).astype(jnp.float32)
    tmpl_prep = model['v_template'].reshape(R_ROWS, LANES).astype(jnp.float32)
    w_planar = model['lbs_weights'].T.reshape(N_JOINTS, RV_ROWS, LANES).astype(jnp.float32)
    return basis_prep, tmpl_prep, w_planar


# ----------------------------- FLAME forward (Pallas path) --------------------------
def flame_forward(model, consts, shape_params, expression_params, pose_params,
                  eye_pose_params=None):
    basis_prep, tmpl_prep, w_planar = consts
    B = shape_params.shape[0]
    if eye_pose_params is None:
        eye_pose_params = jnp.zeros((B, 6), jnp.float32)                   # self.eye_pose
    neck_pose = jnp.zeros((B, 3), jnp.float32)                             # self.neck_pose
    betas = jnp.concatenate([shape_params, expression_params], axis=1)
    full_pose = jnp.concatenate(
        [pose_params[:, :3], neck_pose, pose_params[:, 3:], eye_pose_params], axis=1)

    rot_mats = batch_rodrigues(full_pose.reshape(-1, 3)).reshape(B, N_JOINTS, 3, 3)
    ident = jnp.eye(3, dtype=jnp.float32)
    pose_feature = (rot_mats[:, 1:] - ident).reshape(B, L_POSE)
    coeffs = jnp.concatenate([betas, pose_feature], axis=1).astype(jnp.float32)

    # Pallas kernel 1: fused blend-shape / pose-corrective linear model (one basis stream).
    v_shaped_flat, v_posed_flat = _blend_shapes_pallas(coeffs, basis_prep, tmpl_prep)
    v_shaped = v_shaped_flat.reshape(B, V, 3)
    v_posed = v_posed_flat.reshape(B, V, 3)

    # Rest-pose joints + kinematic chain (tiny, plain JAX).
    joints = jnp.einsum('jv,bvc->bjc', model['J_regressor'], v_shaped, precision=HIGH)
    _, A = batch_rigid_transform(rot_mats, joints)

    # Pallas kernel 2: linear-blend skinning on planar x/y/z layouts.
    a_flat = A[:, :, :3, :].reshape(-1)                                    # (B * J * 12,)
    vposed_planar = v_posed.transpose(0, 2, 1).reshape(B, 3, RV_ROWS, LANES)
    verts_planar = _skinning_pallas(a_flat, w_planar, vposed_planar)
    vertices = verts_planar.reshape(B, 3, V).transpose(0, 2, 1)
    return vertices


# ----------------------------- pure-JAX reference (exact lbs semantics) -------------
def flame_forward_reference(model, shape_params, expression_params, pose_params,
                            eye_pose_params=None):
    B = shape_params.shape[0]
    if eye_pose_params is None:
        eye_pose_params = jnp.zeros((B, 6), jnp.float32)
    neck_pose = jnp.zeros((B, 3), jnp.float32)
    betas = jnp.concatenate([shape_params, expression_params], axis=1)
    full_pose = jnp.concatenate(
        [pose_params[:, :3], neck_pose, pose_params[:, 3:], eye_pose_params], axis=1)

    v_shaped = model['v_template'][None] + jnp.einsum(
        'bl,vcl->bvc', betas, model['shapedirs'], precision=HIGH)
    joints = jnp.einsum('jv,bvc->bjc', model['J_regressor'], v_shaped, precision=HIGH)
    rot_mats = batch_rodrigues(full_pose.reshape(-1, 3)).reshape(B, N_JOINTS, 3, 3)
    ident = jnp.eye(3, dtype=jnp.float32)
    pose_feature = (rot_mats[:, 1:] - ident).reshape(B, L_POSE)
    pose_offsets = jnp.matmul(pose_feature, model['posedirs'],
                              precision=HIGH).reshape(B, V, 3)
    v_posed = v_shaped + pose_offsets
    _, A = batch_rigid_transform(rot_mats, joints)
    T = jnp.einsum('vj,bjrc->bvrc', model['lbs_weights'], A, precision=HIGH)
    v_posed_h = jnp.concatenate([v_posed, jnp.ones((B, V, 1), jnp.float32)], axis=-1)
    verts = jnp.einsum('bvrc,bvc->bvr', T, v_posed_h, precision=HIGH)[..., :3]
    return verts


# ----------------------------- synthetic FLAME buffers ------------------------------
def make_synthetic_flame(key):
    ks = jax.random.split(key, 5)
    v_template = 0.1 * jax.random.normal(ks[0], (V, 3), jnp.float32)
    shapedirs = 0.01 * jax.random.normal(ks[1], (V, 3, L_BETAS), jnp.float32)
    # posedirs stored like the module: reshape((V*3, 36)).T -> (36, V*3)
    posedirs = 0.01 * jax.random.normal(ks[2], (L_POSE, N_FLAT), jnp.float32)
    jr = jax.random.uniform(ks[3], (N_JOINTS, V), jnp.float32)
    J_regressor = jr / jnp.sum(jr, axis=1, keepdims=True)
    lw = jax.random.uniform(ks[4], (V, N_JOINTS), jnp.float32)
    lbs_weights = lw / jnp.sum(lw, axis=1, keepdims=True)
    return {'v_template': v_template, 'shapedirs': shapedirs, 'posedirs': posedirs,
            'J_regressor': J_regressor, 'lbs_weights': lbs_weights}


if __name__ == "__main__":
    key = jax.random.PRNGKey(0)
    k_model, k_shape, k_expr, k_pose = jax.random.split(key, 4)

    model = make_synthetic_flame(k_model)
    consts = prepare_flame_constants(model)     # one-time "model load" re-layout

    shape_params = jax.random.normal(k_shape, (BATCH, SHAPE_PARAMS), jnp.float32)
    expression_params = jax.random.normal(k_expr, (BATCH, EXPR_PARAMS), jnp.float32)
    pose_params = 0.3 * jax.random.normal(k_pose, (BATCH, 6), jnp.float32)

    fwd = jax.jit(lambda sp, ep, pp: flame_forward(model, consts, sp, ep, pp))
    vertices = jax.block_until_ready(fwd(shape_params, expression_params, pose_params))

    ref = flame_forward_reference(model, shape_params, expression_params, pose_params)
    assert vertices.shape == (BATCH, V, 3)
    max_err = jnp.max(jnp.abs(vertices - ref))
    assert jnp.allclose(vertices, ref, atol=5e-4, rtol=5e-4), f"max abs err {max_err}"

    print("KERNEL_OK")
</pallas_src>

<mosaic_0001>
module attributes {stable_mosaic.version = 11 : i64} {
  func.func @_blend_kernel(%arg0: i32, %arg1: memref<2x84xf32, #tpu.memory_space<smem>>, %arg2: memref<84x24x128xf32, #tpu.memory_space<vmem>>, %arg3: memref<24x128xf32, #tpu.memory_space<vmem>>, %arg4: memref<2x24x128xf32, #tpu.memory_space<vmem>>, %arg5: memref<2x24x128xf32, #tpu.memory_space<vmem>>) attributes {dimension_semantics = [#tpu.dimension_semantics<parallel>], iteration_bounds = array<i64: 2>, scalar_prefetch = 1 : i64, scratch_operands = 0 : i64, tpu.core_type = #tpu.core_type<tc>, window_params = [{transform_indices = @transform_0, window_bounds = array<i64: 84, 24, 128>}, {transform_indices = @transform_1, window_bounds = array<i64: 24, 128>}, {transform_indices = @transform_2, window_bounds = array<i64: 2, 24, 128>}, {transform_indices = @transform_3, window_bounds = array<i64: 2, 24, 128>}]} {
    %c0 = arith.constant 0 : index
    %c0_0 = arith.constant 0 : index
    %0 = vector.load %arg3[%c0, %c0_0] : memref<24x128xf32, #tpu.memory_space<vmem>>, vector<24x128xf32>
    %cst = arith.constant 0.000000e+00 : f32
    %1 = vector.broadcast %cst : f32 to vector<24x128xf32>
    %c0_i32 = arith.constant 0 : i32
    %2 = arith.index_cast %c0_i32 : i32 to index
    %c0_1 = arith.constant 0 : index
    %c0_2 = arith.constant 0 : index
    %3 = vector.load %arg2[%2, %c0_1, %c0_2] : memref<84x24x128xf32, #tpu.memory_space<vmem>>, vector<1x24x128xf32>
    %4 = vector.shape_cast %3 : vector<1x24x128xf32> to vector<24x128xf32>
    %c0_3 = arith.constant 0 : index
    %5 = arith.index_cast %c0_i32 : i32 to index
    %6 = memref.load %arg1[%c0_3, %5] : memref<2x84xf32, #tpu.memory_space<smem>>
    %7 = vector.broadcast %6 : f32 to vector<24x128xf32>
    %8 = arith.mulf %7, %4 : vector<24x128xf32>
    %9 = arith.addf %1, %8 : vector<24x128xf32>
    %c1 = arith.constant 1 : index
    %10 = arith.index_cast %c0_i32 : i32 to index
    %11 = memref.load %arg1[%c1, %10] : memref<2x84xf32, #tpu.memory_space<smem>>
    %12 = vector.broadcast %11 : f32 to vector<24x128xf32>
    %13 = arith.mulf %12, %4 : vector<24x128xf32>
    %14 = arith.addf %1, %13 : vector<24x128xf32>
    %c1_i32 = arith.constant 1 : i32
    %15 = arith.index_cast %c1_i32 : i32 to index
    %c0_4 = arith.constant 0 : index
    %c0_5 = arith.constant 0 : index
    %16 = vector.load %arg2[%15, %c0_4, %c0_5] : memref<84x24x128xf32, #tpu.memory_space<vmem>>, vector<1x24x128xf32>
    %17 = vector.shape_cast %16 : vector<1x24x128xf32> to vector<24x128xf32>
    %c0_6 = arith.constant 0 : index
    %18 = arith.index_cast %c1_i32 : i32 to index
    %19 = memref.load %arg1[%c0_6, %18] : memref<2x84xf32, #tpu.memory_space<smem>>
    %20 = vector.broadcast %19 : f32 to vector<24x128xf32>
    %21 = arith.mulf %20, %17 : vector<24x128xf32>
    %22 = arith.addf %9, %21 : vector<24x128xf32>
    %c1_7 = arith.constant 1 : index
    %23 = arith.index_cast %c1_i32 : i32 to index
    %24 = memref.load %arg1[%c1_7, %23] : memref<2x84xf32, #tpu.memory_space<smem>>
    %25 = vector.broadcast %24 : f32 to vector<24x128xf32>
    %26 = arith.mulf %25, %17 : vector<24x128xf32>
    %27 = arith.addf %14, %26 : vector<24x128xf32>
    %c2_i32 = arith.constant 2 : i32
    %28 = arith.index_cast %c2_i32 : i32 to index
    %c0_8 = arith.constant 0 : index
    %c0_9 = arith.constant 0 : index
    %29 = vector.load %arg2[%28, %c0_8, %c0_9] : memref<84x24x128xf32, #tpu.memory_space<vmem>>, vector<1x24x128xf32>
    %30 = vector.shape_cast %29 : vector<1x24x128xf32> to vector<24x128xf32>
    %c0_10 = arith.constant 0 : index
    %31 = arith.index_cast %c2_i32 : i32 to index
    %32 = memref.load %arg1[%c0_10, %31] : memref<2x84xf32, #tpu.memory_space<smem>>
    %33 = vector.broadcast %32 : f32 to vector<24x128xf32>
    %34 = arith.mulf %33, %30 : vector<24x128xf32>
    %35 = arith.addf %22, %34 : vector<24x128xf32>
    %c1_11 = arith.constant 1 : index
    %36 = arith.index_cast %c2_i32 : i32 to index
    %37 = memref.load %arg1[%c1_11, %36] : memref<2x84xf32, #tpu.memory_space<smem>>
    %38 = vector.broadcast %37 : f32 to vector<24x128xf32>
    %39 = arith.mulf %38, %30 : vector<24x128xf32>
    %40 = arith.addf %27, %39 : vector<24x128xf32>
    %c3_i32 = arith.constant 3 : i32
    %41 = arith.index_cast %c3_i32 : i32 to index
    %c0_12 = arith.constant 0 : index
    %c0_13 = arith.constant 0 : index
    %42 = vector.load %arg2[%41, %c0_12, %c0_13] : memref<84x24x128xf32, #tpu.memory_space<vmem>>, vector<1x24x128xf32>
    %43 = vector.shape_cast %42 : vector<1x24x128xf32> to vector<24x128xf32>
    %c0_14 = arith.constant 0 : index
    %44 = arith.index_cast %c3_i32 : i32 to index
    %45 = memref.load %arg1[%c0_14, %44] : memref<2x84xf32, #tpu.memory_space<smem>>
    %46 = vector.broadcast %45 : f32 to vector<24x128xf32>
    %47 = arith.mulf %46, %43 : vector<24x128xf32>
    %48 = arith.addf %35, %47 : vector<24x128xf32>
    %c1_15 = arith.constant 1 : index
    %49 = arith.index_cast %c3_i32 : i32 to index
    %50 = memref.load %arg1[%c1_15, %49] : memref<2x84xf32, #tpu.memory_space<smem>>
    %51 = vector.broadcast %50 : f32 to vector<24x128xf32>
    %52 = arith.mulf %51, %43 : vector<24x128xf32>
    %53 = arith.addf %40, %52 : vector<24x128xf32>
    %c4_i32 = arith.constant 4 : i32
    %54 = arith.index_cast %c4_i32 : i32 to index
    %c0_16 = arith.constant 0 : index
    %c0_17 = arith.constant 0 : index
    %55 = vector.load %arg2[%54, %c0_16, %c0_17] : memref<84x24x128xf32, #tpu.memory_space<vmem>>, vector<1x24x128xf32>
    %56 = vector.shape_cast %55 : vector<1x24x128xf32> to vector<24x128xf32>
    %c0_18 = arith.constant 0 : index
    %57 = arith.index_cast %c4_i32 : i32 to index
    %58 = memref.load %arg1[%c0_18, %57] : memref<2x84xf32, #tpu.memory_space<smem>>
    %59 = vector.broadcast %58 : f32 to vector<24x128xf32>
    %60 = arith.mulf %59, %56 : vector<24x128xf32>
    %61 = arith.addf %48, %60 : vector<24x128xf32>
    %c1_19 = arith.constant 1 : index
    %62 = arith.index_cast %c4_i32 : i32 to index
    %63 = memref.load %arg1[%c1_19, %62] : memref<2x84xf32, #tpu.memory_space<smem>>
    %64 = vector.broadcast %63 : f32 to vector<24x128xf32>
    %65 = arith.mulf %64, %56 : vector<24x128xf32>
    %66 = arith.addf %53, %65 : vector<24x128xf32>
    %c5_i32 = arith.constant 5 : i32
    %67 = arith.index_cast %c5_i32 : i32 to index
    %c0_20 = arith.constant 0 : index
    %c0_21 = arith.constant 0 : index
    %68 = vector.load %arg2[%67, %c0_20, %c0_21] : memref<84x24x128xf32, #tpu.memory_space<vmem>>, vector<1x24x128xf32>
    %69 = vector.shape_cast %68 : vector<1x24x128xf32> to vector<24x128xf32>
    %c0_22 = arith.constant 0 : index
    %70 = arith.index_cast %c5_i32 : i32 to index
    %71 = memref.load %arg1[%c0_22, %70] : memref<2x84xf32, #tpu.memory_space<smem>>
    %72 = vector.broadcast %71 : f32 to vector<24x128xf32>
    %73 = arith.mulf %72, %69 : vector<24x128xf32>
    %74 = arith.addf %61, %73 : vector<24x128xf32>
    %c1_23 = arith.constant 1 : index
    %75 = arith.index_cast %c5_i32 : i32 to index
    %76 = memref.load %arg1[%c1_23, %75] : memref<2x84xf32, #tpu.memory_space<smem>>
    %77 = vector.broadcast %76 : f32 to vector<24x128xf32>
    %78 = arith.mulf %77, %69 : vector<24x128xf32>
    %79 = arith.addf %66, %78 : vector<24x128xf32>
    %c6_i32 = arith.constant 6 : i32
    %80 = arith.index_cast %c6_i32 : i32 to index
    %c0_24 = arith.constant 0 : index
    %c0_25 = arith.constant 0 : index
    %81 = vector.load %arg2[%80, %c0_24, %c0_25] : memref<84x24x128xf32, #tpu.memory_space<vmem>>, vector<1x24x128xf32>
    %82 = vector.shape_cast %81 : vector<1x24x128xf32> to vector<24x128xf32>
    %c0_26 = arith.constant 0 : index
    %83 = arith.index_cast %c6_i32 : i32 to index
    %84 = memref.load %arg1[%c0_26, %83] : memref<2x84xf32, #tpu.memory_space<smem>>
    %85 = vector.broadcast %84 : f32 to vector<24x128xf32>
    %86 = arith.mulf %85, %82 : vector<24x128xf32>
    %87 = arith.addf %74, %86 : vector<24x128xf32>
    %c1_27 = arith.constant 1 : index
    %88 = arith.index_cast %c6_i32 : i32 to index
    %89 = memref.load %arg1[%c1_27, %88] : memref<2x84xf32, #tpu.memory_space<smem>>
    %90 = vector.broadcast %89 : f32 to vector<24x128xf32>
    %91 = arith.mulf %90, %82 : vector<24x128xf32>
    %92 = arith.addf %79, %91 : vector<24x128xf32>
    %c7_i32 = arith.constant 7 : i32
    %93 = arith.index_cast %c7_i32 : i32 to index
    %c0_28 = arith.constant 0 : index
    %c0_29 = arith.constant 0 : index
    %94 = vector.load %arg2[%93, %c0_28, %c0_29] : memref<84x24x128xf32, #tpu.memory_space<vmem>>, vector<1x24x128xf32>
    %95 = vector.shape_cast %94 : vector<1x24x128xf32> to vector<24x128xf32>
    %c0_30 = arith.constant 0 : index
    %96 = arith.index_cast %c7_i32 : i32 to index
    %97 = memref.load %arg1[%c0_30, %96] : memref<2x84xf32, #tpu.memory_space<smem>>
    %98 = vector.broadcast %97 : f32 to vector<24x128xf32>
    %99 = arith.mulf %98, %95 : vector<24x128xf32>
    %100 = arith.addf %87, %99 : vector<24x128xf32>
    %c1_31 = arith.constant 1 : index
    %101 = arith.index_cast %c7_i32 : i32 to index
    %102 = memref.load %arg1[%c1_31, %101] : memref<2x84xf32, #tpu.memory_space<smem>>
    %103 = vector.broadcast %102 : f32 to vector<24x128xf32>
    %104 = arith.mulf %103, %95 : vector<24x128xf32>
    %105 = arith.addf %92, %104 : vector<24x128xf32>
    %c8_i32 = arith.constant 8 : i32
    %106 = arith.index_cast %c8_i32 : i32 to index
    %c0_32 = arith.constant 0 : index
    %c0_33 = arith.constant 0 : index
    %107 = vector.load %arg2[%106, %c0_32, %c0_33] : memref<84x24x128xf32, #tpu.memory_space<vmem>>, vector<1x24x128xf32>
    %108 = vector.shape_cast %107 : vector<1x24x128xf32> to vector<24x128xf32>
    %c0_34 = arith.constant 0 : index
    %109 = arith.index_cast %c8_i32 : i32 to index
    %110 = memref.load %arg1[%c0_34, %109] : memref<2x84xf32, #tpu.memory_space<smem>>
    %111 = vector.broadcast %110 : f32 to vector<24x128xf32>
    %112 = arith.mulf %111, %108 : vector<24x128xf32>
    %113 = arith.addf %100, %112 : vector<24x128xf32>
    %c1_35 = arith.constant 1 : index
    %114 = arith.index_cast %c8_i32 : i32 to index
    %115 = memref.load %arg1[%c1_35, %114] : memref<2x84xf32, #tpu.memory_space<smem>>
    %116 = vector.broadcast %115 : f32 to vector<24x128xf32>
    %117 = arith.mulf %116, %108 : vector<24x128xf32>
    %118 = arith.addf %105, %117 : vector<24x128xf32>
    %c9_i32 = arith.constant 9 : i32
    %119 = arith.index_cast %c9_i32 : i32 to index
    %c0_36 = arith.constant 0 : index
    %c0_37 = arith.constant 0 : index
    %120 = vector.load %arg2[%119, %c0_36, %c0_37] : memref<84x24x128xf32, #tpu.memory_space<vmem>>, vector<1x24x128xf32>
    %121 = vector.shape_cast %120 : vector<1x24x128xf32> to vector<24x128xf32>
    %c0_38 = arith.constant 0 : index
    %122 = arith.index_cast %c9_i32 : i32 to index
    %123 = memref.load %arg1[%c0_38, %122] : memref<2x84xf32, #tpu.memory_space<smem>>
    %124 = vector.broadcast %123 : f32 to vector<24x128xf32>
    %125 = arith.mulf %124, %121 : vector<24x128xf32>
    %126 = arith.addf %113, %125 : vector<24x128xf32>
    %c1_39 = arith.constant 1 : index
    %127 = arith.index_cast %c9_i32 : i32 to index
    %128 = memref.load %arg1[%c1_39, %127] : memref<2x84xf32, #tpu.memory_space<smem>>
    %129 = vector.broadcast %128 : f32 to vector<24x128xf32>
    %130 = arith.mulf %129, %121 : vector<24x128xf32>
    %131 = arith.addf %118, %130 : vector<24x128xf32>
    %c10_i32 = arith.constant 10 : i32
    %132 = arith.index_cast %c10_i32 : i32 to index
    %c0_40 = arith.constant 0 : index
    %c0_41 = arith.constant 0 : index
    %133 = vector.load %arg2[%132, %c0_40, %c0_41] : memref<84x24x128xf32, #tpu.memory_space<vmem>>, vector<1x24x128xf32>
    %134 = vector.shape_cast %133 : vector<1x24x128xf32> to vector<24x128xf32>
    %c0_42 = arith.constant 0 : index
    %135 = arith.index_cast %c10_i32 : i32 to index
    %136 = memref.load %arg1[%c0_42, %135] : memref<2x84xf32, #tpu.memory_space<smem>>
    %137 = vector.broadcast %136 : f32 to vector<24x128xf32>
    %138 = arith.mulf %137, %134 : vector<24x128xf32>
    %139 = arith.addf %126, %138 : vector<24x128xf32>
    %c1_43 = arith.constant 1 : index
    %140 = arith.index_cast %c10_i32 : i32 to index
    %141 = memref.load %arg1[%c1_43, %140] : memref<2x84xf32, #tpu.memory_space<smem>>
    %142 = vector.broadcast %141 : f32 to vector<24x128xf32>
    %143 = arith.mulf %142, %134 : vector<24x128xf32>
    %144 = arith.addf %131, %143 : vector<24x128xf32>
    %c11_i32 = arith.constant 11 : i32
    %145 = arith.index_cast %c11_i32 : i32 to index
    %c0_44 = arith.constant 0 : index
    %c0_45 = arith.constant 0 : index
    %146 = vector.load %arg2[%145, %c0_44, %c0_45] : memref<84x24x128xf32, #tpu.memory_space<vmem>>, vector<1x24x128xf32>
    %147 = vector.shape_cast %146 : vector<1x24x128xf32> to vector<24x128xf32>
    %c0_46 = arith.constant 0 : index
    %148 = arith.index_cast %c11_i32 : i32 to index
    %149 = memref.load %arg1[%c0_46, %148] : memref<2x84xf32, #tpu.memory_space<smem>>
    %150 = vector.broadcast %149 : f32 to vector<24x128xf32>
    %151 = arith.mulf %150, %147 : vector<24x128xf32>
    %152 = arith.addf %139, %151 : vector<24x128xf32>
    %c1_47 = arith.constant 1 : index
    %153 = arith.index_cast %c11_i32 : i32 to index
    %154 = memref.load %arg1[%c1_47, %153] : memref<2x84xf32, #tpu.memory_space<smem>>
    %155 = vector.broadcast %154 : f32 to vector<24x128xf32>
    %156 = arith.mulf %155, %147 : vector<24x128xf32>
    %157 = arith.addf %144, %156 : vector<24x128xf32>
    %c12_i32 = arith.constant 12 : i32
    %158 = arith.index_cast %c12_i32 : i32 to index
    %c0_48 = arith.constant 0 : index
    %c0_49 = arith.constant 0 : index
    %159 = vector.load %arg2[%158, %c0_48, %c0_49] : memref<84x24x128xf32, #tpu.memory_space<vmem>>, vector<1x24x128xf32>
    %160 = vector.shape_cast %159 : vector<1x24x128xf32> to vector<24x128xf32>
    %c0_50 = arith.constant 0 : index
    %161 = arith.index_cast %c12_i32 : i32 to index
    %162 = memref.load %arg1[%c0_50, %161] : memref<2x84xf32, #tpu.memory_space<smem>>
    %163 = vector.broadcast %162 : f32 to vector<24x128xf32>
    %164 = arith.mulf %163, %160 : vector<24x128xf32>
    %165 = arith.addf %152, %164 : vector<24x128xf32>
    %c1_51 = arith.constant 1 : index
    %166 = arith.index_cast %c12_i32 : i32 to index
    %167 = memref.load %arg1[%c1_51, %166] : memref<2x84xf32, #tpu.memory_space<smem>>
    %168 = vector.broadcast %167 : f32 to vector<24x128xf32>
    %169 = arith.mulf %168, %160 : vector<24x128xf32>
    %170 = arith.addf %157, %169 : vector<24x128xf32>
    %c13_i32 = arith.constant 13 : i32
    %171 = arith.index_cast %c13_i32 : i32 to index
    %c0_52 = arith.constant 0 : index
    %c0_53 = arith.constant 0 : index
    %172 = vector.load %arg2[%171, %c0_52, %c0_53] : memref<84x24x128xf32, #tpu.memory_space<vmem>>, vector<1x24x128xf32>
    %173 = vector.shape_cast %172 : vector<1x24x128xf32> to vector<24x128xf32>
    %c0_54 = arith.constant 0 : index
    %174 = arith.index_cast %c13_i32 : i32 to index
    %175 = memref.load %arg1[%c0_54, %174] : memref<2x84xf32, #tpu.memory_space<smem>>
    %176 = vector.broadcast %175 : f32 to vector<24x128xf32>
    %177 = arith.mulf %176, %173 : vector<24x128xf32>
    %178 = arith.addf %165, %177 : vector<24x128xf32>
    %c1_55 = arith.constant 1 : index
    %179 = arith.index_cast %c13_i32 : i32 to index
    %180 = memref.load %arg1[%c1_55, %179] : memref<2x84xf32, #tpu.memory_space<smem>>
    %181 = vector.broadcast %180 : f32 to vector<24x128xf32>
    %182 = arith.mulf %181, %173 : vector<24x128xf32>
    %183 = arith.addf %170, %182 : vector<24x128xf32>
    %c14_i32 = arith.constant 14 : i32
    %184 = arith.index_cast %c14_i32 : i32 to index
    %c0_56 = arith.constant 0 : index
    %c0_57 = arith.constant 0 : index
    %185 = vector.load %arg2[%184, %c0_56, %c0_57] : memref<84x24x128xf32, #tpu.memory_space<vmem>>, vector<1x24x128xf32>
    %186 = vector.shape_cast %185 : vector<1x24x128xf32> to vector<24x128xf32>
    %c0_58 = arith.constant 0 : index
    %187 = arith.index_cast %c14_i32 : i32 to index
    %188 = memref.load %arg1[%c0_58, %187] : memref<2x84xf32, #tpu.memory_space<smem>>
    %189 = vector.broadcast %188 : f32 to vector<24x128xf32>
    %190 = arith.mulf %189, %186 : vector<24x128xf32>
    %191 = arith.addf %178, %190 : vector<24x128xf32>
    %c1_59 = arith.constant 1 : index
    %192 = arith.index_cast %c14_i32 : i32 to index
    %193 = memref.load %arg1[%c1_59, %192] : memref<2x84xf32, #tpu.memory_space<smem>>
    %194 = vector.broadcast %193 : f32 to vector<24x128xf32>
    %195 = arith.mulf %194, %186 : vector<24x128xf32>
    %196 = arith.addf %183, %195 : vector<24x128xf32>
    %c15_i32 = arith.constant 15 : i32
    %197 = arith.index_cast %c15_i32 : i32 to index
    %c0_60 = arith.constant 0 : index
    %c0_61 = arith.constant 0 : index
    %198 = vector.load %arg2[%197, %c0_60, %c0_61] : memref<84x24x128xf32, #tpu.memory_space<vmem>>, vector<1x24x128xf32>
    %199 = vector.shape_cast %198 : vector<1x24x128xf32> to vector<24x128xf32>
    %c0_62 = arith.constant 0 : index
    %200 = arith.index_cast %c15_i32 : i32 to index
    %201 = memref.load %arg1[%c0_62, %200] : memref<2x84xf32, #tpu.memory_space<smem>>
    %202 = vector.broadcast %201 : f32 to vector<24x128xf32>
    %203 = arith.mulf %202, %199 : vector<24x128xf32>
    %204 = arith.addf %191, %203 : vector<24x128xf32>
    %c1_63 = arith.constant 1 : index
    %205 = arith.index_cast %c15_i32 : i32 to index
    %206 = memref.load %arg1[%c1_63, %205] : memref<2x84xf32, #tpu.memory_space<smem>>
    %207 = vector.broadcast %206 : f32 to vector<24x128xf32>
    %208 = arith.mulf %207, %199 : vector<24x128xf32>
    %209 = arith.addf %196, %208 : vector<24x128xf32>
    %c16_i32 = arith.constant 16 : i32
    %210 = arith.index_cast %c16_i32 : i32 to index
    %c0_64 = arith.constant 0 : index
    %c0_65 = arith.constant 0 : index
    %211 = vector.load %arg2[%210, %c0_64, %c0_65] : memref<84x24x128xf32, #tpu.memory_space<vmem>>, vector<1x24x128xf32>
    %212 = vector.shape_cast %211 : vector<1x24x128xf32> to vector<24x128xf32>
    %c0_66 = arith.constant 0 : index
    %213 = arith.index_cast %c16_i32 : i32 to index
    %214 = memref.load %arg1[%c0_66, %213] : memref<2x84xf32, #tpu.memory_space<smem>>
    %215 = vector.broadcast %214 : f32 to vector<24x128xf32>
    %216 = arith.mulf %215, %212 : vector<24x128xf32>
    %217 = arith.addf %204, %216 : vector<24x128xf32>
    %c1_67 = arith.constant 1 : index
    %218 = arith.index_cast %c16_i32 : i32 to index
    %219 = memref.load %arg1[%c1_67, %218] : memref<2x84xf32, #tpu.memory_space<smem>>
    %220 = vector.broadcast %219 : f32 to vector<24x128xf32>
    %221 = arith.mulf %220, %212 : vector<24x128xf32>
    %222 = arith.addf %209, %221 : vector<24x128xf32>
    %c17_i32 = arith.constant 17 : i32
    %223 = arith.index_cast %c17_i32 : i32 to index
    %c0_68 = arith.constant 0 : index
    %c0_69 = arith.constant 0 : index
    %224 = vector.load %arg2[%223, %c0_68, %c0_69] : memref<84x24x128xf32, #tpu.memory_space<vmem>>, vector<1x24x128xf32>
    %225 = vector.shape_cast %224 : vector<1x24x128xf32> to vector<24x128xf32>
    %c0_70 = arith.constant 0 : index
    %226 = arith.index_cast %c17_i32 : i32 to index
    %227 = memref.load %arg1[%c0_70, %226] : memref<2x84xf32, #tpu.memory_space<smem>>
    %228 = vector.broadcast %227 : f32 to vector<24x128xf32>
    %229 = arith.mulf %228, %225 : vector<24x128xf32>
    %230 = arith.addf %217, %229 : vector<24x128xf32>
    %c1_71 = arith.constant 1 : index
    %231 = arith.index_cast %c17_i32 : i32 to index
    %232 = memref.load %arg1[%c1_71, %231] : memref<2x84xf32, #tpu.memory_space<smem>>
    %233 = vector.broadcast %232 : f32 to vector<24x128xf32>
    %234 = arith.mulf %233, %225 : vector<24x128xf32>
    %235 = arith.addf %222, %234 : vector<24x128xf32>
    %c18_i32 = arith.constant 18 : i32
    %236 = arith.index_cast %c18_i32 : i32 to index
    %c0_72 = arith.constant 0 : index
    %c0_73 = arith.constant 0 : index
    %237 = vector.load %arg2[%236, %c0_72, %c0_73] : memref<84x24x128xf32, #tpu.memory_space<vmem>>, vector<1x24x128xf32>
    %238 = vector.shape_cast %237 : vector<1x24x128xf32> to vector<24x128xf32>
    %c0_74 = arith.constant 0 : index
    %239 = arith.index_cast %c18_i32 : i32 to index
    %240 = memref.load %arg1[%c0_74, %239] : memref<2x84xf32, #tpu.memory_space<smem>>
    %241 = vector.broadcast %240 : f32 to vector<24x128xf32>
    %242 = arith.mulf %241, %238 : vector<24x128xf32>
    %243 = arith.addf %230, %242 : vector<24x128xf32>
    %c1_75 = arith.constant 1 : index
    %244 = arith.index_cast %c18_i32 : i32 to index
    %245 = memref.load %arg1[%c1_75, %244] : memref<2x84xf32, #tpu.memory_space<smem>>
    %246 = vector.broadcast %245 : f32 to vector<24x128xf32>
    %247 = arith.mulf %246, %238 : vector<24x128xf32>
    %248 = arith.addf %235, %247 : vector<24x128xf32>
    %c19_i32 = arith.constant 19 : i32
    %249 = arith.index_cast %c19_i32 : i32 to index
    %c0_76 = arith.constant 0 : index
    %c0_77 = arith.constant 0 : index
    %250 = vector.load %arg2[%249, %c0_76, %c0_77] : memref<84x24x128xf32, #tpu.memory_space<vmem>>, vector<1x24x128xf32>
    %251 = vector.shape_cast %250 : vector<1x24x128xf32> to vector<24x128xf32>
    %c0_78 = arith.constant 0 : index
    %252 = arith.index_cast %c19_i32 : i32 to index
    %253 = memref.load %arg1[%c0_78, %252] : memref<2x84xf32, #tpu.memory_space<smem>>
    %254 = vector.broadcast %253 : f32 to vector<24x128xf32>
    %255 = arith.mulf %254, %251 : vector<24x128xf32>
    %256 = arith.addf %243, %255 : vector<24x128xf32>
    %c1_79 = arith.constant 1 : index
    %257 = arith.index_cast %c19_i32 : i32 to index
    %258 = memref.load %arg1[%c1_79, %257] : memref<2x84xf32, #tpu.memory_space<smem>>
    %259 = vector.broadcast %258 : f32 to vector<24x128xf32>
    %260 = arith.mulf %259, %251 : vector<24x128xf32>
    %261 = arith.addf %248, %260 : vector<24x128xf32>
    %c20_i32 = arith.constant 20 : i32
    %262 = arith.index_cast %c20_i32 : i32 to index
    %c0_80 = arith.constant 0 : index
    %c0_81 = arith.constant 0 : index
    %263 = vector.load %arg2[%262, %c0_80, %c0_81] : memref<84x24x128xf32, #tpu.memory_space<vmem>>, vector<1x24x128xf32>
    %264 = vector.shape_cast %263 : vector<1x24x128xf32> to vector<24x128xf32>
    %c0_82 = arith.constant 0 : index
    %265 = arith.index_cast %c20_i32 : i32 to index
    %266 = memref.load %arg1[%c0_82, %265] : memref<2x84xf32, #tpu.memory_space<smem>>
    %267 = vector.broadcast %266 : f32 to vector<24x128xf32>
    %268 = arith.mulf %267, %264 : vector<24x128xf32>
    %269 = arith.addf %256, %268 : vector<24x128xf32>
    %c1_83 = arith.constant 1 : index
    %270 = arith.index_cast %c20_i32 : i32 to index
    %271 = memref.load %arg1[%c1_83, %270] : memref<2x84xf32, #tpu.memory_space<smem>>
    %272 = vector.broadcast %271 : f32 to vector<24x128xf32>
    %273 = arith.mulf %272, %264 : vector<24x128xf32>
    %274 = arith.addf %261, %273 : vector<24x128xf32>
    %c21_i32 = arith.constant 21 : i32
    %275 = arith.index_cast %c21_i32 : i32 to index
    %c0_84 = arith.constant 0 : index
    %c0_85 = arith.constant 0 : index
    %276 = vector.load %arg2[%275, %c0_84, %c0_85] : memref<84x24x128xf32, #tpu.memory_space<vmem>>, vector<1x24x128xf32>
    %277 = vector.shape_cast %276 : vector<1x24x128xf32> to vector<24x128xf32>
    %c0_86 = arith.constant 0 : index
    %278 = arith.index_cast %c21_i32 : i32 to index
    %279 = memref.load %arg1[%c0_86, %278] : memref<2x84xf32, #tpu.memory_space<smem>>
    %280 = vector.broadcast %279 : f32 to vector<24x128xf32>
    %281 = arith.mulf %280, %277 : vector<24x128xf32>
    %282 = arith.addf %269, %281 : vector<24x128xf32>
    %c1_87 = arith.constant 1 : index
    %283 = arith.index_cast %c21_i32 : i32 to index
    %284 = memref.load %arg1[%c1_87, %283] : memref<2x84xf32, #tpu.memory_space<smem>>
    %285 = vector.broadcast %284 : f32 to vector<24x128xf32>
    %286 = arith.mulf %285, %277 : vector<24x128xf32>
    %287 = arith.addf %274, %286 : vector<24x128xf32>
    %c22_i32 = arith.constant 22 : i32
    %288 = arith.index_cast %c22_i32 : i32 to index
    %c0_88 = arith.constant 0 : index
    %c0_89 = arith.constant 0 : index
    %289 = vector.load %arg2[%288, %c0_88, %c0_89] : memref<84x24x128xf32, #tpu.memory_space<vmem>>, vector<1x24x128xf32>
    %290 = vector.shape_cast %289 : vector<1x24x128xf32> to vector<24x128xf32>
    %c0_90 = arith.constant 0 : index
    %291 = arith.index_cast %c22_i32 : i32 to index
    %292 = memref.load %arg1[%c0_90, %291] : memref<2x84xf32, #tpu.memory_space<smem>>
    %293 = vector.broadcast %292 : f32 to vector<24x128xf32>
    %294 = arith.mulf %293, %290 : vector<24x128xf32>
    %295 = arith.addf %282, %294 : vector<24x128xf32>
    %c1_91 = arith.constant 1 : index
    %296 = arith.index_cast %c22_i32 : i32 to index
    %297 = memref.load %arg1[%c1_91, %296] : memref<2x84xf32, #tpu.memory_space<smem>>
    %298 = vector.broadcast %297 : f32 to vector<24x128xf32>
    %299 = arith.mulf %298, %290 : vector<24x128xf32>
    %300 = arith.addf %287, %299 : vector<24x128xf32>
    %c23_i32 = arith.constant 23 : i32
    %301 = arith.index_cast %c23_i32 : i32 to index
    %c0_92 = arith.constant 0 : index
    %c0_93 = arith.constant 0 : index
    %302 = vector.load %arg2[%301, %c0_92, %c0_93] : memref<84x24x128xf32, #tpu.memory_space<vmem>>, vector<1x24x128xf32>
    %303 = vector.shape_cast %302 : vector<1x24x128xf32> to vector<24x128xf32>
    %c0_94 = arith.constant 0 : index
    %304 = arith.index_cast %c23_i32 : i32 to index
    %305 = memref.load %arg1[%c0_94, %304] : memref<2x84xf32, #tpu.memory_space<smem>>
    %306 = vector.broadcast %305 : f32 to vector<24x128xf32>
    %307 = arith.mulf %306, %303 : vector<24x128xf32>
    %308 = arith.addf %295, %307 : vector<24x128xf32>
    %c1_95 = arith.constant 1 : index
    %309 = arith.index_cast %c23_i32 : i32 to index
    %310 = memref.load %arg1[%c1_95, %309] : memref<2x84xf32, #tpu.memory_space<smem>>
    %311 = vector.broadcast %310 : f32 to vector<24x128xf32>
    %312 = arith.mulf %311, %303 : vector<24x128xf32>
    %313 = arith.addf %300, %312 : vector<24x128xf32>
    %c24_i32 = arith.constant 24 : i32
    %314 = arith.index_cast %c24_i32 : i32 to index
    %c0_96 = arith.constant 0 : index
    %c0_97 = arith.constant 0 : index
    %315 = vector.load %arg2[%314, %c0_96, %c0_97] : memref<84x24x128xf32, #tpu.memory_space<vmem>>, vector<1x24x128xf32>
    %316 = vector.shape_cast %315 : vector<1x24x128xf32> to vector<24x128xf32>
    %c0_98 = arith.constant 0 : index
    %317 = arith.index_cast %c24_i32 : i32 to index
    %318 = memref.load %arg1[%c0_98, %317] : memref<2x84xf32, #tpu.memory_space<smem>>
    %319 = vector.broadcast %318 : f32 to vector<24x128xf32>
    %320 = arith.mulf %319, %316 : vector<24x128xf32>
    %321 = arith.addf %308, %320 : vector<24x128xf32>
    %c1_99 = arith.constant 1 : index
    %322 = arith.index_cast %c24_i32 : i32 to index
    %323 = memref.load %arg1[%c1_99, %322] : memref<2x84xf32, #tpu.memory_space<smem>>
    %324 = vector.broadcast %323 : f32 to vector<24x128xf32>
    %325 = arith.mulf %324, %316 : vector<24x128xf32>
    %326 = arith.addf %313, %325 : vector<24x128xf32>
    %c25_i32 = arith.constant 25 : i32
    %327 = arith.index_cast %c25_i32 : i32 to index
    %c0_100 = arith.constant 0 : index
    %c0_101 = arith.constant 0 : index
    %328 = vector.load %arg2[%327, %c0_100, %c0_101] : memref<84x24x128xf32, #tpu.memory_space<vmem>>, vector<1x24x128xf32>
    %329 = vector.shape_cast %328 : vector<1x24x128xf32> to vector<24x128xf32>
    %c0_102 = arith.constant 0 : index
    %330 = arith.index_cast %c25_i32 : i32 to index
    %331 = memref.load %arg1[%c0_102, %330] : memref<2x84xf32, #tpu.memory_space<smem>>
    %332 = vector.broadcast %331 : f32 to vector<24x128xf32>
    %333 = arith.mulf %332, %329 : vector<24x128xf32>
    %334 = arith.addf %321, %333 : vector<24x128xf32>
    %c1_103 = arith.constant 1 : index
    %335 = arith.index_cast %c25_i32 : i32 to index
    %336 = memref.load %arg1[%c1_103, %335] : memref<2x84xf32, #tpu.memory_space<smem>>
    %337 = vector.broadcast %336 : f32 to vector<24x128xf32>
    %338 = arith.mulf %337, %329 : vector<24x128xf32>
    %339 = arith.addf %326, %338 : vector<24x128xf32>
    %c26_i32 = arith.constant 26 : i32
    %340 = arith.index_cast %c26_i32 : i32 to index
    %c0_104 = arith.constant 0 : index
    %c0_105 = arith.constant 0 : index
    %341 = vector.load %arg2[%340, %c0_104, %c0_105] : memref<84x24x128xf32, #tpu.memory_space<vmem>>, vector<1x24x128xf32>
    %342 = vector.shape_cast %341 : vector<1x24x128xf32> to vector<24x128xf32>
    %c0_106 = arith.constant 0 : index
    %343 = arith.index_cast %c26_i32 : i32 to index
    %344 = memref.load %arg1[%c0_106, %343] : memref<2x84xf32, #tpu.memory_space<smem>>
    %345 = vector.broadcast %344 : f32 to vector<24x128xf32>
    %346 = arith.mulf %345, %342 : vector<24x128xf32>
    %347 = arith.addf %334, %346 : vector<24x128xf32>
    %c1_107 = arith.constant 1 : index
    %348 = arith.index_cast %c26_i32 : i32 to index
    %349 = memref.load %arg1[%c1_107, %348] : memref<2x84xf32, #tpu.memory_space<smem>>
    %350 = vector.broadcast %349 : f32 to vector<24x128xf32>
    %351 = arith.mulf %350, %342 : vector<24x128xf32>
    %352 = arith.addf %339, %351 : vector<24x128xf32>
    %c27_i32 = arith.constant 27 : i32
    %353 = arith.index_cast %c27_i32 : i32 to index
    %c0_108 = arith.constant 0 : index
    %c0_109 = arith.constant 0 : index
    %354 = vector.load %arg2[%353, %c0_108, %c0_109] : memref<84x24x128xf32, #tpu.memory_space<vmem>>, vector<1x24x128xf32>
    %355 = vector.shape_cast %354 : vector<1x24x128xf32> to vector<24x128xf32>
    %c0_110 = arith.constant 0 : index
    %356 = arith.index_cast %c27_i32 : i32 to index
    %357 = memref.load %arg1[%c0_110, %356] : memref<2x84xf32, #tpu.memory_space<smem>>
    %358 = vector.broadcast %357 : f32 to vector<24x128xf32>
    %359 = arith.mulf %358, %355 : vector<24x128xf32>
    %360 = arith.addf %347, %359 : vector<24x128xf32>
    %c1_111 = arith.constant 1 : index
    %361 = arith.index_cast %c27_i32 : i32 to index
    %362 = memref.load %arg1[%c1_111, %361] : memref<2x84xf32, #tpu.memory_space<smem>>
    %363 = vector.broadcast %362 : f32 to vector<24x128xf32>
    %364 = arith.mulf %363, %355 : vector<24x128xf32>
    %365 = arith.addf %352, %364 : vector<24x128xf32>
    %c28_i32 = arith.constant 28 : i32
    %366 = arith.index_cast %c28_i32 : i32 to index
    %c0_112 = arith.constant 0 : index
    %c0_113 = arith.constant 0 : index
    %367 = vector.load %arg2[%366, %c0_112, %c0_113] : memref<84x24x128xf32, #tpu.memory_space<vmem>>, vector<1x24x128xf32>
    %368 = vector.shape_cast %367 : vector<1x24x128xf32> to vector<24x128xf32>
    %c0_114 = arith.constant 0 : index
    %369 = arith.index_cast %c28_i32 : i32 to index
    %370 = memref.load %arg1[%c0_114, %369] : memref<2x84xf32, #tpu.memory_space<smem>>
    %371 = vector.broadcast %370 : f32 to vector<24x128xf32>
    %372 = arith.mulf %371, %368 : vector<24x128xf32>
    %373 = arith.addf %360, %372 : vector<24x128xf32>
    %c1_115 = arith.constant 1 : index
    %374 = arith.index_cast %c28_i32 : i32 to index
    %375 = memref.load %arg1[%c1_115, %374] : memref<2x84xf32, #tpu.memory_space<smem>>
    %376 = vector.broadcast %375 : f32 to vector<24x128xf32>
    %377 = arith.mulf %376, %368 : vector<24x128xf32>
    %378 = arith.addf %365, %377 : vector<24x128xf32>
    %c29_i32 = arith.constant 29 : i32
    %379 = arith.index_cast %c29_i32 : i32 to index
    %c0_116 = arith.constant 0 : index
    %c0_117 = arith.constant 0 : index
    %380 = vector.load %arg2[%379, %c0_116, %c0_117] : memref<84x24x128xf32, #tpu.memory_space<vmem>>, vector<1x24x128xf32>
    %381 = vector.shape_cast %380 : vector<1x24x128xf32> to vector<24x128xf32>
    %c0_118 = arith.constant 0 : index
    %382 = arith.index_cast %c29_i32 : i32 to index
    %383 = memref.load %arg1[%c0_118, %382] : memref<2x84xf32, #tpu.memory_space<smem>>
    %384 = vector.broadcast %383 : f32 to vector<24x128xf32>
    %385 = arith.mulf %384, %381 : vector<24x128xf32>
    %386 = arith.addf %373, %385 : vector<24x128xf32>
    %c1_119 = arith.constant 1 : index
    %387 = arith.index_cast %c29_i32 : i32 to index
    %388 = memref.load %arg1[%c1_119, %387] : memref<2x84xf32, #tpu.memory_space<smem>>
    %389 = vector.broadcast %388 : f32 to vector<24x128xf32>
    %390 = arith.mulf %389, %381 : vector<24x128xf32>
    %391 = arith.addf %378, %390 : vector<24x128xf32>
    %c30_i32 = arith.constant 30 : i32
    %392 = arith.index_cast %c30_i32 : i32 to index
    %c0_120 = arith.constant 0 : index
    %c0_121 = arith.constant 0 : index
    %393 = vector.load %arg2[%392, %c0_120, %c0_121] : memref<84x24x128xf32, #tpu.memory_space<vmem>>, vector<1x24x128xf32>
    %394 = vector.shape_cast %393 : vector<1x24x128xf32> to vector<24x128xf32>
    %c0_122 = arith.constant 0 : index
    %395 = arith.index_cast %c30_i32 : i32 to index
    %396 = memref.load %arg1[%c0_122, %395] : memref<2x84xf32, #tpu.memory_space<smem>>
    %397 = vector.broadcast %396 : f32 to vector<24x128xf32>
    %398 = arith.mulf %397, %394 : vector<24x128xf32>
    %399 = arith.addf %386, %398 : vector<24x128xf32>
    %c1_123 = arith.constant 1 : index
    %400 = arith.index_cast %c30_i32 : i32 to index
    %401 = memref.load %arg1[%c1_123, %400] : memref<2x84xf32, #tpu.memory_space<smem>>
    %402 = vector.broadcast %401 : f32 to vector<24x128xf32>
    %403 = arith.mulf %402, %394 : vector<24x128xf32>
    %404 = arith.addf %391, %403 : vector<24x128xf32>
    %c31_i32 = arith.constant 31 : i32
    %405 = arith.index_cast %c31_i32 : i32 to index
    %c0_124 = arith.constant 0 : index
    %c0_125 = arith.constant 0 : index
    %406 = vector.load %arg2[%405, %c0_124, %c0_125] : memref<84x24x128xf32, #tpu.memory_space<vmem>>, vector<1x24x128xf32>
    %407 = vector.shape_cast %406 : vector<1x24x128xf32> to vector<24x128xf32>
    %c0_126 = arith.constant 0 : index
    %408 = arith.index_cast %c31_i32 : i32 to index
    %409 = memref.load %arg1[%c0_126, %408] : memref<2x84xf32, #tpu.memory_space<smem>>
    %410 = vector.broadcast %409 : f32 to vector<24x128xf32>
    %411 = arith.mulf %410, %407 : vector<24x128xf32>
    %412 = arith.addf %399, %411 : vector<24x128xf32>
    %c1_127 = arith.constant 1 : index
    %413 = arith.index_cast %c31_i32 : i32 to index
    %414 = memref.load %arg1[%c1_127, %413] : memref<2x84xf32, #tpu.memory_space<smem>>
    %415 = vector.broadcast %414 : f32 to vector<24x128xf32>
    %416 = arith.mulf %415, %407 : vector<24x128xf32>
    %417 = arith.addf %404, %416 : vector<24x128xf32>
    %c32_i32 = arith.constant 32 : i32
    %418 = arith.index_cast %c32_i32 : i32 to index
    %c0_128 = arith.constant 0 : index
    %c0_129 = arith.constant 0 : index
    %419 = vector.load %arg2[%418, %c0_128, %c0_129] : memref<84x24x128xf32, #tpu.memory_space<vmem>>, vector<1x24x128xf32>
    %420 = vector.shape_cast %419 : vector<1x24x128xf32> to vector<24x128xf32>
    %c0_130 = arith.constant 0 : index
    %421 = arith.index_cast %c32_i32 : i32 to index
    %422 = memref.load %arg1[%c0_130, %421] : memref<2x84xf32, #tpu.memory_space<smem>>
    %423 = vector.broadcast %422 : f32 to vector<24x128xf32>
    %424 = arith.mulf %423, %420 : vector<24x128xf32>
    %425 = arith.addf %412, %424 : vector<24x128xf32>
    %c1_131 = arith.constant 1 : index
    %426 = arith.index_cast %c32_i32 : i32 to index
    %427 = memref.load %arg1[%c1_131, %426] : memref<2x84xf32, #tpu.memory_space<smem>>
    %428 = vector.broadcast %427 : f32 to vector<24x128xf32>
    %429 = arith.mulf %428, %420 : vector<24x128xf32>
    %430 = arith.addf %417, %429 : vector<24x128xf32>
    %c33_i32 = arith.constant 33 : i32
    %431 = arith.index_cast %c33_i32 : i32 to index
    %c0_132 = arith.constant 0 : index
    %c0_133 = arith.constant 0 : index
    %432 = vector.load %arg2[%431, %c0_132, %c0_133] : memref<84x24x128xf32, #tpu.memory_space<vmem>>, vector<1x24x128xf32>
    %433 = vector.shape_cast %432 : vector<1x24x128xf32> to vector<24x128xf32>
    %c0_134 = arith.constant 0 : index
    %434 = arith.index_cast %c33_i32 : i32 to index
    %435 = memref.load %arg1[%c0_134, %434] : memref<2x84xf32, #tpu.memory_space<smem>>
    %436 = vector.broadcast %435 : f32 to vector<24x128xf32>
    %437 = arith.mulf %436, %433 : vector<24x128xf32>
    %438 = arith.addf %425, %437 : vector<24x128xf32>
    %c1_135 = arith.constant 1 : index
    %439 = arith.index_cast %c33_i32 : i32 to index
    %440 = memref.load %arg1[%c1_135, %439] : memref<2x84xf32, #tpu.memory_space<smem>>
    %441 = vector.broadcast %440 : f32 to vector<24x128xf32>
    %442 = arith.mulf %441, %433 : vector<24x128xf32>
    %443 = arith.addf %430, %442 : vector<24x128xf32>
    %c34_i32 = arith.constant 34 : i32
    %444 = arith.index_cast %c34_i32 : i32 to index
    %c0_136 = arith.constant 0 : index
    %c0_137 = arith.constant 0 : index
    %445 = vector.load %arg2[%444, %c0_136, %c0_137] : memref<84x24x128xf32, #tpu.memory_space<vmem>>, vector<1x24x128xf32>
    %446 = vector.shape_cast %445 : vector<1x24x128xf32> to vector<24x128xf32>
    %c0_138 = arith.constant 0 : index
    %447 = arith.index_cast %c34_i32 : i32 to index
    %448 = memref.load %arg1[%c0_138, %447] : memref<2x84xf32, #tpu.memory_space<smem>>
    %449 = vector.broadcast %448 : f32 to vector<24x128xf32>
    %450 = arith.mulf %449, %446 : vector<24x128xf32>
    %451 = arith.addf %438, %450 : vector<24x128xf32>
    %c1_139 = arith.constant 1 : index
    %452 = arith.index_cast %c34_i32 : i32 to index
    %453 = memref.load %arg1[%c1_139, %452] : memref<2x84xf32, #tpu.memory_space<smem>>
    %454 = vector.broadcast %453 : f32 to vector<24x128xf32>
    %455 = arith.mulf %454, %446 : vector<24x128xf32>
    %456 = arith.addf %443, %455 : vector<24x128xf32>
    %c35_i32 = arith.constant 35 : i32
    %457 = arith.index_cast %c35_i32 : i32 to index
    %c0_140 = arith.constant 0 : index
    %c0_141 = arith.constant 0 : index
    %458 = vector.load %arg2[%457, %c0_140, %c0_141] : memref<84x24x128xf32, #tpu.memory_space<vmem>>, vector<1x24x128xf32>
    %459 = vector.shape_cast %458 : vector<1x24x128xf32> to vector<24x128xf32>
    %c0_142 = arith.constant 0 : index
    %460 = arith.index_cast %c35_i32 : i32 to index
    %461 = memref.load %arg1[%c0_142, %460] : memref<2x84xf32, #tpu.memory_space<smem>>
    %462 = vector.broadcast %461 : f32 to vector<24x128xf32>
    %463 = arith.mulf %462, %459 : vector<24x128xf32>
    %464 = arith.addf %451, %463 : vector<24x128xf32>
    %c1_143 = arith.constant 1 : index
    %465 = arith.index_cast %c35_i32 : i32 to index
    %466 = memref.load %arg1[%c1_143, %465] : memref<2x84xf32, #tpu.memory_space<smem>>
    %467 = vector.broadcast %466 : f32 to vector<24x128xf32>
    %468 = arith.mulf %467, %459 : vector<24x128xf32>
    %469 = arith.addf %456, %468 : vector<24x128xf32>
    %c36_i32 = arith.constant 36 : i32
    %470 = arith.index_cast %c36_i32 : i32 to index
    %c0_144 = arith.constant 0 : index
    %c0_145 = arith.constant 0 : index
    %471 = vector.load %arg2[%470, %c0_144, %c0_145] : memref<84x24x128xf32, #tpu.memory_space<vmem>>, vector<1x24x128xf32>
    %472 = vector.shape_cast %471 : vector<1x24x128xf32> to vector<24x128xf32>
    %c0_146 = arith.constant 0 : index
    %473 = arith.index_cast %c36_i32 : i32 to index
    %474 = memref.load %arg1[%c0_146, %473] : memref<2x84xf32, #tpu.memory_space<smem>>
    %475 = vector.broadcast %474 : f32 to vector<24x128xf32>
    %476 = arith.mulf %475, %472 : vector<24x128xf32>
    %477 = arith.addf %464, %476 : vector<24x128xf32>
    %c1_147 = arith.constant 1 : index
    %478 = arith.index_cast %c36_i32 : i32 to index
    %479 = memref.load %arg1[%c1_147, %478] : memref<2x84xf32, #tpu.memory_space<smem>>
    %480 = vector.broadcast %479 : f32 to vector<24x128xf32>
    %481 = arith.mulf %480, %472 : vector<24x128xf32>
    %482 = arith.addf %469, %481 : vector<24x128xf32>
    %c37_i32 = arith.constant 37 : i32
    %483 = arith.index_cast %c37_i32 : i32 to index
    %c0_148 = arith.constant 0 : index
    %c0_149 = arith.constant 0 : index
    %484 = vector.load %arg2[%483, %c0_148, %c0_149] : memref<84x24x128xf32, #tpu.memory_space<vmem>>, vector<1x24x128xf32>
    %485 = vector.shape_cast %484 : vector<1x24x128xf32> to vector<24x128xf32>
    %c0_150 = arith.constant 0 : index
    %486 = arith.index_cast %c37_i32 : i32 to index
    %487 = memref.load %arg1[%c0_150, %486] : memref<2x84xf32, #tpu.memory_space<smem>>
    %488 = vector.broadcast %487 : f32 to vector<24x128xf32>
    %489 = arith.mulf %488, %485 : vector<24x128xf32>
    %490 = arith.addf %477, %489 : vector<24x128xf32>
    %c1_151 = arith.constant 1 : index
    %491 = arith.index_cast %c37_i32 : i32 to index
    %492 = memref.load %arg1[%c1_151, %491] : memref<2x84xf32, #tpu.memory_space<smem>>
    %493 = vector.broadcast %492 : f32 to vector<24x128xf32>
    %494 = arith.mulf %493, %485 : vector<24x128xf32>
    %495 = arith.addf %482, %494 : vector<24x128xf32>
    %c38_i32 = arith.constant 38 : i32
    %496 = arith.index_cast %c38_i32 : i32 to index
    %c0_152 = arith.constant 0 : index
    %c0_153 = arith.constant 0 : index
    %497 = vector.load %arg2[%496, %c0_152, %c0_153] : memref<84x24x128xf32, #tpu.memory_space<vmem>>, vector<1x24x128xf32>
    %498 = vector.shape_cast %497 : vector<1x24x128xf32> to vector<24x128xf32>
    %c0_154 = arith.constant 0 : index
    %499 = arith.index_cast %c38_i32 : i32 to index
    %500 = memref.load %arg1[%c0_154, %499] : memref<2x84xf32, #tpu.memory_space<smem>>
    %501 = vector.broadcast %500 : f32 to vector<24x128xf32>
    %502 = arith.mulf %501, %498 : vector<24x128xf32>
    %503 = arith.addf %490, %502 : vector<24x128xf32>
    %c1_155 = arith.constant 1 : index
    %504 = arith.index_cast %c38_i32 : i32 to index
    %505 = memref.load %arg1[%c1_155, %504] : memref<2x84xf32, #tpu.memory_space<smem>>
    %506 = vector.broadcast %505 : f32 to vector<24x128xf32>
    %507 = arith.mulf %506, %498 : vector<24x128xf32>
    %508 = arith.addf %495, %507 : vector<24x128xf32>
    %c39_i32 = arith.constant 39 : i32
    %509 = arith.index_cast %c39_i32 : i32 to index
    %c0_156 = arith.constant 0 : index
    %c0_157 = arith.constant 0 : index
    %510 = vector.load %arg2[%509, %c0_156, %c0_157] : memref<84x24x128xf32, #tpu.memory_space<vmem>>, vector<1x24x128xf32>
    %511 = vector.shape_cast %510 : vector<1x24x128xf32> to vector<24x128xf32>
    %c0_158 = arith.constant 0 : index
    %512 = arith.index_cast %c39_i32 : i32 to index
    %513 = memref.load %arg1[%c0_158, %512] : memref<2x84xf32, #tpu.memory_space<smem>>
    %514 = vector.broadcast %513 : f32 to vector<24x128xf32>
    %515 = arith.mulf %514, %511 : vector<24x128xf32>
    %516 = arith.addf %503, %515 : vector<24x128xf32>
    %c1_159 = arith.constant 1 : index
    %517 = arith.index_cast %c39_i32 : i32 to index
    %518 = memref.load %arg1[%c1_159, %517] : memref<2x84xf32, #tpu.memory_space<smem>>
    %519 = vector.broadcast %518 : f32 to vector<24x128xf32>
    %520 = arith.mulf %519, %511 : vector<24x128xf32>
    %521 = arith.addf %508, %520 : vector<24x128xf32>
    %c40_i32 = arith.constant 40 : i32
    %522 = arith.index_cast %c40_i32 : i32 to index
    %c0_160 = arith.constant 0 : index
    %c0_161 = arith.constant 0 : index
    %523 = vector.load %arg2[%522, %c0_160, %c0_161] : memref<84x24x128xf32, #tpu.memory_space<vmem>>, vector<1x24x128xf32>
    %524 = vector.shape_cast %523 : vector<1x24x128xf32> to vector<24x128xf32>
    %c0_162 = arith.constant 0 : index
    %525 = arith.index_cast %c40_i32 : i32 to index
    %526 = memref.load %arg1[%c0_162, %525] : memref<2x84xf32, #tpu.memory_space<smem>>
    %527 = vector.broadcast %526 : f32 to vector<24x128xf32>
    %528 = arith.mulf %527, %524 : vector<24x128xf32>
    %529 = arith.addf %516, %528 : vector<24x128xf32>
    %c1_163 = arith.constant 1 : index
    %530 = arith.index_cast %c40_i32 : i32 to index
    %531 = memref.load %arg1[%c1_163, %530] : memref<2x84xf32, #tpu.memory_space<smem>>
    %532 = vector.broadcast %531 : f32 to vector<24x128xf32>
    %533 = arith.mulf %532, %524 : vector<24x128xf32>
    %534 = arith.addf %521, %533 : vector<24x128xf32>
    %c41_i32 = arith.constant 41 : i32
    %535 = arith.index_cast %c41_i32 : i32 to index
    %c0_164 = arith.constant 0 : index
    %c0_165 = arith.constant 0 : index
    %536 = vector.load %arg2[%535, %c0_164, %c0_165] : memref<84x24x128xf32, #tpu.memory_space<vmem>>, vector<1x24x128xf32>
    %537 = vector.shape_cast %536 : vector<1x24x128xf32> to vector<24x128xf32>
    %c0_166 = arith.constant 0 : index
    %538 = arith.index_cast %c41_i32 : i32 to index
    %539 = memref.load %arg1[%c0_166, %538] : memref<2x84xf32, #tpu.memory_space<smem>>
    %540 = vector.broadcast %539 : f32 to vector<24x128xf32>
    %541 = arith.mulf %540, %537 : vector<24x128xf32>
    %542 = arith.addf %529, %541 : vector<24x128xf32>
    %c1_167 = arith.constant 1 : index
    %543 = arith.index_cast %c41_i32 : i32 to index
    %544 = memref.load %arg1[%c1_167, %543] : memref<2x84xf32, #tpu.memory_space<smem>>
    %545 = vector.broadcast %544 : f32 to vector<24x128xf32>
    %546 = arith.mulf %545, %537 : vector<24x128xf32>
    %547 = arith.addf %534, %546 : vector<24x128xf32>
    %c42_i32 = arith.constant 42 : i32
    %548 = arith.index_cast %c42_i32 : i32 to index
    %c0_168 = arith.constant 0 : index
    %c0_169 = arith.constant 0 : index
    %549 = vector.load %arg2[%548, %c0_168, %c0_169] : memref<84x24x128xf32, #tpu.memory_space<vmem>>, vector<1x24x128xf32>
    %550 = vector.shape_cast %549 : vector<1x24x128xf32> to vector<24x128xf32>
    %c0_170 = arith.constant 0 : index
    %551 = arith.index_cast %c42_i32 : i32 to index
    %552 = memref.load %arg1[%c0_170, %551] : memref<2x84xf32, #tpu.memory_space<smem>>
    %553 = vector.broadcast %552 : f32 to vector<24x128xf32>
    %554 = arith.mulf %553, %550 : vector<24x128xf32>
    %555 = arith.addf %542, %554 : vector<24x128xf32>
    %c1_171 = arith.constant 1 : index
    %556 = arith.index_cast %c42_i32 : i32 to index
    %557 = memref.load %arg1[%c1_171, %556] : memref<2x84xf32, #tpu.memory_space<smem>>
    %558 = vector.broadcast %557 : f32 to vector<24x128xf32>
    %559 = arith.mulf %558, %550 : vector<24x128xf32>
    %560 = arith.addf %547, %559 : vector<24x128xf32>
    %c43_i32 = arith.constant 43 : i32
    %561 = arith.index_cast %c43_i32 : i32 to index
    %c0_172 = arith.constant 0 : index
    %c0_173 = arith.constant 0 : index
    %562 = vector.load %arg2[%561, %c0_172, %c0_173] : memref<84x24x128xf32, #tpu.memory_space<vmem>>, vector<1x24x128xf32>
    %563 = vector.shape_cast %562 : vector<1x24x128xf32> to vector<24x128xf32>
    %c0_174 = arith.constant 0 : index
    %564 = arith.index_cast %c43_i32 : i32 to index
    %565 = memref.load %arg1[%c0_174, %564] : memref<2x84xf32, #tpu.memory_space<smem>>
    %566 = vector.broadcast %565 : f32 to vector<24x128xf32>
    %567 = arith.mulf %566, %563 : vector<24x128xf32>
    %568 = arith.addf %555, %567 : vector<24x128xf32>
    %c1_175 = arith.constant 1 : index
    %569 = arith.index_cast %c43_i32 : i32 to index
    %570 = memref.load %arg1[%c1_175, %569] : memref<2x84xf32, #tpu.memory_space<smem>>
    %571 = vector.broadcast %570 : f32 to vector<24x128xf32>
    %572 = arith.mulf %571, %563 : vector<24x128xf32>
    %573 = arith.addf %560, %572 : vector<24x128xf32>
    %c44_i32 = arith.constant 44 : i32
    %574 = arith.index_cast %c44_i32 : i32 to index
    %c0_176 = arith.constant 0 : index
    %c0_177 = arith.constant 0 : index
    %575 = vector.load %arg2[%574, %c0_176, %c0_177] : memref<84x24x128xf32, #tpu.memory_space<vmem>>, vector<1x24x128xf32>
    %576 = vector.shape_cast %575 : vector<1x24x128xf32> to vector<24x128xf32>
    %c0_178 = arith.constant 0 : index
    %577 = arith.index_cast %c44_i32 : i32 to index
    %578 = memref.load %arg1[%c0_178, %577] : memref<2x84xf32, #tpu.memory_space<smem>>
    %579 = vector.broadcast %578 : f32 to vector<24x128xf32>
    %580 = arith.mulf %579, %576 : vector<24x128xf32>
    %581 = arith.addf %568, %580 : vector<24x128xf32>
    %c1_179 = arith.constant 1 : index
    %582 = arith.index_cast %c44_i32 : i32 to index
    %583 = memref.load %arg1[%c1_179, %582] : memref<2x84xf32, #tpu.memory_space<smem>>
    %584 = vector.broadcast %583 : f32 to vector<24x128xf32>
    %585 = arith.mulf %584, %576 : vector<24x128xf32>
    %586 = arith.addf %573, %585 : vector<24x128xf32>
    %c45_i32 = arith.constant 45 : i32
    %587 = arith.index_cast %c45_i32 : i32 to index
    %c0_180 = arith.constant 0 : index
    %c0_181 = arith.constant 0 : index
    %588 = vector.load %arg2[%587, %c0_180, %c0_181] : memref<84x24x128xf32, #tpu.memory_space<vmem>>, vector<1x24x128xf32>
    %589 = vector.shape_cast %588 : vector<1x24x128xf32> to vector<24x128xf32>
    %c0_182 = arith.constant 0 : index
    %590 = arith.index_cast %c45_i32 : i32 to index
    %591 = memref.load %arg1[%c0_182, %590] : memref<2x84xf32, #tpu.memory_space<smem>>
    %592 = vector.broadcast %591 : f32 to vector<24x128xf32>
    %593 = arith.mulf %592, %589 : vector<24x128xf32>
    %594 = arith.addf %581, %593 : vector<24x128xf32>
    %c1_183 = arith.constant 1 : index
    %595 = arith.index_cast %c45_i32 : i32 to index
    %596 = memref.load %arg1[%c1_183, %595] : memref<2x84xf32, #tpu.memory_space<smem>>
    %597 = vector.broadcast %596 : f32 to vector<24x128xf32>
    %598 = arith.mulf %597, %589 : vector<24x128xf32>
    %599 = arith.addf %586, %598 : vector<24x128xf32>
    %c46_i32 = arith.constant 46 : i32
    %600 = arith.index_cast %c46_i32 : i32 to index
    %c0_184 = arith.constant 0 : index
    %c0_185 = arith.constant 0 : index
    %601 = vector.load %arg2[%600, %c0_184, %c0_185] : memref<84x24x128xf32, #tpu.memory_space<vmem>>, vector<1x24x128xf32>
    %602 = vector.shape_cast %601 : vector<1x24x128xf32> to vector<24x128xf32>
    %c0_186 = arith.constant 0 : index
    %603 = arith.index_cast %c46_i32 : i32 to index
    %604 = memref.load %arg1[%c0_186, %603] : memref<2x84xf32, #tpu.memory_space<smem>>
    %605 = vector.broadcast %604 : f32 to vector<24x128xf32>
    %606 = arith.mulf %605, %602 : vector<24x128xf32>
    %607 = arith.addf %594, %606 : vector<24x128xf32>
    %c1_187 = arith.constant 1 : index
    %608 = arith.index_cast %c46_i32 : i32 to index
    %609 = memref.load %arg1[%c1_187, %608] : memref<2x84xf32, #tpu.memory_space<smem>>
    %610 = vector.broadcast %609 : f32 to vector<24x128xf32>
    %611 = arith.mulf %610, %602 : vector<24x128xf32>
    %612 = arith.addf %599, %611 : vector<24x128xf32>
    %c47_i32 = arith.constant 47 : i32
    %613 = arith.index_cast %c47_i32 : i32 to index
    %c0_188 = arith.constant 0 : index
    %c0_189 = arith.constant 0 : index
    %614 = vector.load %arg2[%613, %c0_188, %c0_189] : memref<84x24x128xf32, #tpu.memory_space<vmem>>, vector<1x24x128xf32>
    %615 = vector.shape_cast %614 : vector<1x24x128xf32> to vector<24x128xf32>
    %c0_190 = arith.constant 0 : index
    %616 = arith.index_cast %c47_i32 : i32 to index
    %617 = memref.load %arg1[%c0_190, %616] : memref<2x84xf32, #tpu.memory_space<smem>>
    %618 = vector.broadcast %617 : f32 to vector<24x128xf32>
    %619 = arith.mulf %618, %615 : vector<24x128xf32>
    %620 = arith.addf %607, %619 : vector<24x128xf32>
    %c1_191 = arith.constant 1 : index
    %621 = arith.index_cast %c47_i32 : i32 to index
    %622 = memref.load %arg1[%c1_191, %621] : memref<2x84xf32, #tpu.memory_space<smem>>
    %623 = vector.broadcast %622 : f32 to vector<24x128xf32>
    %624 = arith.mulf %623, %615 : vector<24x128xf32>
    %625 = arith.addf %612, %624 : vector<24x128xf32>
    %c48_i32 = arith.constant 48 : i32
    %626 = arith.addf %0, %620 : vector<24x128xf32>
    %c0_192 = arith.constant 0 : index
    %c0_193 = arith.constant 0 : index
    %c0_194 = arith.constant 0 : index
    %627 = vector.load %arg4[%c0_192, %c0_193, %c0_194] : memref<2x24x128xf32, #tpu.memory_space<vmem>>, vector<1x24x128xf32>
    %628 = vector.shape_cast %627 : vector<1x24x128xf32> to vector<24x128xf32>
    %629 = vector.shape_cast %626 : vector<24x128xf32> to vector<1x24x128xf32>
    tpu.vector_store %arg4[%c0_192, %c0_193, %c0_194], %629 {strides = array<i32>} : memref<2x24x128xf32, #tpu.memory_space<vmem>>, vector<1x24x128xf32>,
    %630 = arith.addf %0, %625 : vector<24x128xf32>
    %c1_195 = arith.constant 1 : index
    %c0_196 = arith.constant 0 : index
    %c0_197 = arith.constant 0 : index
    %631 = vector.load %arg4[%c1_195, %c0_196, %c0_197] : memref<2x24x128xf32, #tpu.memory_space<vmem>>, vector<1x24x128xf32>
    %632 = vector.shape_cast %631 : vector<1x24x128xf32> to vector<24x128xf32>
    %633 = vector.shape_cast %630 : vector<24x128xf32> to vector<1x24x128xf32>
    tpu.vector_store %arg4[%c1_195, %c0_196, %c0_197], %633 {strides = array<i32>} : memref<2x24x128xf32, #tpu.memory_space<vmem>>, vector<1x24x128xf32>,
    %c48_i32_198 = arith.constant 48 : i32
    %634 = arith.index_cast %c48_i32_198 : i32 to index
    %c0_199 = arith.constant 0 : index
    %c0_200 = arith.constant 0 : index
    %635 = vector.load %arg2[%634, %c0_199, %c0_200] : memref<84x24x128xf32, #tpu.memory_space<vmem>>, vector<1x24x128xf32>
    %636 = vector.shape_cast %635 : vector<1x24x128xf32> to vector<24x128xf32>
    %c0_201 = arith.constant 0 : index
    %637 = arith.index_cast %c48_i32_198 : i32 to index
    %638 = memref.load %arg1[%c0_201, %637] : memref<2x84xf32, #tpu.memory_space<smem>>
    %639 = vector.broadcast %638 : f32 to vector<24x128xf32>
    %640 = arith.mulf %639, %636 : vector<24x128xf32>
    %641 = arith.addf %620, %640 : vector<24x128xf32>
    %c1_202 = arith.constant 1 : index
    %642 = arith.index_cast %c48_i32_198 : i32 to index
    %643 = memref.load %arg1[%c1_202, %642] : memref<2x84xf32, #tpu.memory_space<smem>>
    %644 = vector.broadcast %643 : f32 to vector<24x128xf32>
    %645 = arith.mulf %644, %636 : vector<24x128xf32>
    %646 = arith.addf %625, %645 : vector<24x128xf32>
    %c49_i32 = arith.constant 49 : i32
    %647 = arith.index_cast %c49_i32 : i32 to index
    %c0_203 = arith.constant 0 : index
    %c0_204 = arith.constant 0 : index
    %648 = vector.load %arg2[%647, %c0_203, %c0_204] : memref<84x24x128xf32, #tpu.memory_space<vmem>>, vector<1x24x128xf32>
    %649 = vector.shape_cast %648 : vector<1x24x128xf32> to vector<24x128xf32>
    %c0_205 = arith.constant 0 : index
    %650 = arith.index_cast %c49_i32 : i32 to index
    %651 = memref.load %arg1[%c0_205, %650] : memref<2x84xf32, #tpu.memory_space<smem>>
    %652 = vector.broadcast %651 : f32 to vector<24x128xf32>
    %653 = arith.mulf %652, %649 : vector<24x128xf32>
    %654 = arith.addf %641, %653 : vector<24x128xf32>
    %c1_206 = arith.constant 1 : index
    %655 = arith.index_cast %c49_i32 : i32 to index
    %656 = memref.load %arg1[%c1_206, %655] : memref<2x84xf32, #tpu.memory_space<smem>>
    %657 = vector.broadcast %656 : f32 to vector<24x128xf32>
    %658 = arith.mulf %657, %649 : vector<24x128xf32>
    %659 = arith.addf %646, %658 : vector<24x128xf32>
    %c50_i32 = arith.constant 50 : i32
    %660 = arith.index_cast %c50_i32 : i32 to index
    %c0_207 = arith.constant 0 : index
    %c0_208 = arith.constant 0 : index
    %661 = vector.load %arg2[%660, %c0_207, %c0_208] : memref<84x24x128xf32, #tpu.memory_space<vmem>>, vector<1x24x128xf32>
    %662 = vector.shape_cast %661 : vector<1x24x128xf32> to vector<24x128xf32>
    %c0_209 = arith.constant 0 : index
    %663 = arith.index_cast %c50_i32 : i32 to index
    %664 = memref.load %arg1[%c0_209, %663] : memref<2x84xf32, #tpu.memory_space<smem>>
    %665 = vector.broadcast %664 : f32 to vector<24x128xf32>
    %666 = arith.mulf %665, %662 : vector<24x128xf32>
    %667 = arith.addf %654, %666 : vector<24x128xf32>
    %c1_210 = arith.constant 1 : index
    %668 = arith.index_cast %c50_i32 : i32 to index
    %669 = memref.load %arg1[%c1_210, %668] : memref<2x84xf32, #tpu.memory_space<smem>>
    %670 = vector.broadcast %669 : f32 to vector<24x128xf32>
    %671 = arith.mulf %670, %662 : vector<24x128xf32>
    %672 = arith.addf %659, %671 : vector<24x128xf32>
    %c51_i32 = arith.constant 51 : i32
    %673 = arith.index_cast %c51_i32 : i32 to index
    %c0_211 = arith.constant 0 : index
    %c0_212 = arith.constant 0 : index
    %674 = vector.load %arg2[%673, %c0_211, %c0_212] : memref<84x24x128xf32, #tpu.memory_space<vmem>>, vector<1x24x128xf32>
    %675 = vector.shape_cast %674 : vector<1x24x128xf32> to vector<24x128xf32>
    %c0_213 = arith.constant 0 : index
    %676 = arith.index_cast %c51_i32 : i32 to index
    %677 = memref.load %arg1[%c0_213, %676] : memref<2x84xf32, #tpu.memory_space<smem>>
    %678 = vector.broadcast %677 : f32 to vector<24x128xf32>
    %679 = arith.mulf %678, %675 : vector<24x128xf32>
    %680 = arith.addf %667, %679 : vector<24x128xf32>
    %c1_214 = arith.constant 1 : index
    %681 = arith.index_cast %c51_i32 : i32 to index
    %682 = memref.load %arg1[%c1_214, %681] : memref<2x84xf32, #tpu.memory_space<smem>>
    %683 = vector.broadcast %682 : f32 to vector<24x128xf32>
    %684 = arith.mulf %683, %675 : vector<24x128xf32>
    %685 = arith.addf %672, %684 : vector<24x128xf32>
    %c52_i32 = arith.constant 52 : i32
    %686 = arith.index_cast %c52_i32 : i32 to index
    %c0_215 = arith.constant 0 : index
    %c0_216 = arith.constant 0 : index
    %687 = vector.load %arg2[%686, %c0_215, %c0_216] : memref<84x24x128xf32, #tpu.memory_space<vmem>>, vector<1x24x128xf32>
    %688 = vector.shape_cast %687 : vector<1x24x128xf32> to vector<24x128xf32>
    %c0_217 = arith.constant 0 : index
    %689 = arith.index_cast %c52_i32 : i32 to index
    %690 = memref.load %arg1[%c0_217, %689] : memref<2x84xf32, #tpu.memory_space<smem>>
    %691 = vector.broadcast %690 : f32 to vector<24x128xf32>
    %692 = arith.mulf %691, %688 : vector<24x128xf32>
    %693 = arith.addf %680, %692 : vector<24x128xf32>
    %c1_218 = arith.constant 1 : index
    %694 = arith.index_cast %c52_i32 : i32 to index
    %695 = memref.load %arg1[%c1_218, %694] : memref<2x84xf32, #tpu.memory_space<smem>>
    %696 = vector.broadcast %695 : f32 to vector<24x128xf32>
    %697 = arith.mulf %696, %688 : vector<24x128xf32>
    %698 = arith.addf %685, %697 : vector<24x128xf32>
    %c53_i32 = arith.constant 53 : i32
    %699 = arith.index_cast %c53_i32 : i32 to index
    %c0_219 = arith.constant 0 : index
    %c0_220 = arith.constant 0 : index
    %700 = vector.load %arg2[%699, %c0_219, %c0_220] : memref<84x24x128xf32, #tpu.memory_space<vmem>>, vector<1x24x128xf32>
    %701 = vector.shape_cast %700 : vector<1x24x128xf32> to vector<24x128xf32>
    %c0_221 = arith.constant 0 : index
    %702 = arith.index_cast %c53_i32 : i32 to index
    %703 = memref.load %arg1[%c0_221, %702] : memref<2x84xf32, #tpu.memory_space<smem>>
    %704 = vector.broadcast %703 : f32 to vector<24x128xf32>
    %705 = arith.mulf %704, %701 : vector<24x128xf32>
    %706 = arith.addf %693, %705 : vector<24x128xf32>
    %c1_222 = arith.constant 1 : index
    %707 = arith.index_cast %c53_i32 : i32 to index
    %708 = memref.load %arg1[%c1_222, %707] : memref<2x84xf32, #tpu.memory_space<smem>>
    %709 = vector.broadcast %708 : f32 to vector<24x128xf32>
    %710 = arith.mulf %709, %701 : vector<24x128xf32>
    %711 = arith.addf %698, %710 : vector<24x128xf32>
    %c54_i32 = arith.constant 54 : i32
    %712 = arith.index_cast %c54_i32 : i32 to index
    %c0_223 = arith.constant 0 : index
    %c0_224 = arith.constant 0 : index
    %713 = vector.load %arg2[%712, %c0_223, %c0_224] : memref<84x24x128xf32, #tpu.memory_space<vmem>>, vector<1x24x128xf32>
    %714 = vector.shape_cast %713 : vector<1x24x128xf32> to vector<24x128xf32>
    %c0_225 = arith.constant 0 : index
    %715 = arith.index_cast %c54_i32 : i32 to index
    %716 = memref.load %arg1[%c0_225, %715] : memref<2x84xf32, #tpu.memory_space<smem>>
    %717 = vector.broadcast %716 : f32 to vector<24x128xf32>
    %718 = arith.mulf %717, %714 : vector<24x128xf32>
    %719 = arith.addf %706, %718 : vector<24x128xf32>
    %c1_226 = arith.constant 1 : index
    %720 = arith.index_cast %c54_i32 : i32 to index
    %721 = memref.load %arg1[%c1_226, %720] : memref<2x84xf32, #tpu.memory_space<smem>>
    %722 = vector.broadcast %721 : f32 to vector<24x128xf32>
    %723 = arith.mulf %722, %714 : vector<24x128xf32>
    %724 = arith.addf %711, %723 : vector<24x128xf32>
    %c55_i32 = arith.constant 55 : i32
    %725 = arith.index_cast %c55_i32 : i32 to index
    %c0_227 = arith.constant 0 : index
    %c0_228 = arith.constant 0 : index
    %726 = vector.load %arg2[%725, %c0_227, %c0_228] : memref<84x24x128xf32, #tpu.memory_space<vmem>>, vector<1x24x128xf32>
    %727 = vector.shape_cast %726 : vector<1x24x128xf32> to vector<24x128xf32>
    %c0_229 = arith.constant 0 : index
    %728 = arith.index_cast %c55_i32 : i32 to index
    %729 = memref.load %arg1[%c0_229, %728] : memref<2x84xf32, #tpu.memory_space<smem>>
    %730 = vector.broadcast %729 : f32 to vector<24x128xf32>
    %731 = arith.mulf %730, %727 : vector<24x128xf32>
    %732 = arith.addf %719, %731 : vector<24x128xf32>
    %c1_230 = arith.constant 1 : index
    %733 = arith.index_cast %c55_i32 : i32 to index
    %734 = memref.load %arg1[%c1_230, %733] : memref<2x84xf32, #tpu.memory_space<smem>>
    %735 = vector.broadcast %734 : f32 to vector<24x128xf32>
    %736 = arith.mulf %735, %727 : vector<24x128xf32>
    %737 = arith.addf %724, %736 : vector<24x128xf32>
    %c56_i32 = arith.constant 56 : i32
    %738 = arith.index_cast %c56_i32 : i32 to index
    %c0_231 = arith.constant 0 : index
    %c0_232 = arith.constant 0 : index
    %739 = vector.load %arg2[%738, %c0_231, %c0_232] : memref<84x24x128xf32, #tpu.memory_space<vmem>>, vector<1x24x128xf32>
    %740 = vector.shape_cast %739 : vector<1x24x128xf32> to vector<24x128xf32>
    %c0_233 = arith.constant 0 : index
    %741 = arith.index_cast %c56_i32 : i32 to index
    %742 = memref.load %arg1[%c0_233, %741] : memref<2x84xf32, #tpu.memory_space<smem>>
    %743 = vector.broadcast %742 : f32 to vector<24x128xf32>
    %744 = arith.mulf %743, %740 : vector<24x128xf32>
    %745 = arith.addf %732, %744 : vector<24x128xf32>
    %c1_234 = arith.constant 1 : index
    %746 = arith.index_cast %c56_i32 : i32 to index
    %747 = memref.load %arg1[%c1_234, %746] : memref<2x84xf32, #tpu.memory_space<smem>>
    %748 = vector.broadcast %747 : f32 to vector<24x128xf32>
    %749 = arith.mulf %748, %740 : vector<24x128xf32>
    %750 = arith.addf %737, %749 : vector<24x128xf32>
    %c57_i32 = arith.constant 57 : i32
    %751 = arith.index_cast %c57_i32 : i32 to index
    %c0_235 = arith.constant 0 : index
    %c0_236 = arith.constant 0 : index
    %752 = vector.load %arg2[%751, %c0_235, %c0_236] : memref<84x24x128xf32, #tpu.memory_space<vmem>>, vector<1x24x128xf32>
    %753 = vector.shape_cast %752 : vector<1x24x128xf32> to vector<24x128xf32>
    %c0_237 = arith.constant 0 : index
    %754 = arith.index_cast %c57_i32 : i32 to index
    %755 = memref.load %arg1[%c0_237, %754] : memref<2x84xf32, #tpu.memory_space<smem>>
    %756 = vector.broadcast %755 : f32 to vector<24x128xf32>
    %757 = arith.mulf %756, %753 : vector<24x128xf32>
    %758 = arith.addf %745, %757 : vector<24x128xf32>
    %c1_238 = arith.constant 1 : index
    %759 = arith.index_cast %c57_i32 : i32 to index
    %760 = memref.load %arg1[%c1_238, %759] : memref<2x84xf32, #tpu.memory_space<smem>>
    %761 = vector.broadcast %760 : f32 to vector<24x128xf32>
    %762 = arith.mulf %761, %753 : vector<24x128xf32>
    %763 = arith.addf %750, %762 : vector<24x128xf32>
    %c58_i32 = arith.constant 58 : i32
    %764 = arith.index_cast %c58_i32 : i32 to index
    %c0_239 = arith.constant 0 : index
    %c0_240 = arith.constant 0 : index
    %765 = vector.load %arg2[%764, %c0_239, %c0_240] : memref<84x24x128xf32, #tpu.memory_space<vmem>>, vector<1x24x128xf32>
    %766 = vector.shape_cast %765 : vector<1x24x128xf32> to vector<24x128xf32>
    %c0_241 = arith.constant 0 : index
    %767 = arith.index_cast %c58_i32 : i32 to index
    %768 = memref.load %arg1[%c0_241, %767] : memref<2x84xf32, #tpu.memory_space<smem>>
    %769 = vector.broadcast %768 : f32 to vector<24x128xf32>
    %770 = arith.mulf %769, %766 : vector<24x128xf32>
    %771 = arith.addf %758, %770 : vector<24x128xf32>
    %c1_242 = arith.constant 1 : index
    %772 = arith.index_cast %c58_i32 : i32 to index
    %773 = memref.load %arg1[%c1_242, %772] : memref<2x84xf32, #tpu.memory_space<smem>>
    %774 = vector.broadcast %773 : f32 to vector<24x128xf32>
    %775 = arith.mulf %774, %766 : vector<24x128xf32>
    %776 = arith.addf %763, %775 : vector<24x128xf32>
    %c59_i32 = arith.constant 59 : i32
    %777 = arith.index_cast %c59_i32 : i32 to index
    %c0_243 = arith.constant 0 : index
    %c0_244 = arith.constant 0 : index
    %778 = vector.load %arg2[%777, %c0_243, %c0_244] : memref<84x24x128xf32, #tpu.memory_space<vmem>>, vector<1x24x128xf32>
    %779 = vector.shape_cast %778 : vector<1x24x128xf32> to vector<24x128xf32>
    %c0_245 = arith.constant 0 : index
    %780 = arith.index_cast %c59_i32 : i32 to index
    %781 = memref.load %arg1[%c0_245, %780] : memref<2x84xf32, #tpu.memory_space<smem>>
    %782 = vector.broadcast %781 : f32 to vector<24x128xf32>
    %783 = arith.mulf %782, %779 : vector<24x128xf32>
    %784 = arith.addf %771, %783 : vector<24x128xf32>
    %c1_246 = arith.constant 1 : index
    %785 = arith.index_cast %c59_i32 : i32 to index
    %786 = memref.load %arg1[%c1_246, %785] : memref<2x84xf32, #tpu.memory_space<smem>>
    %787 = vector.broadcast %786 : f32 to vector<24x128xf32>
    %788 = arith.mulf %787, %779 : vector<24x128xf32>
    %789 = arith.addf %776, %788 : vector<24x128xf32>
    %c60_i32 = arith.constant 60 : i32
    %790 = arith.index_cast %c60_i32 : i32 to index
    %c0_247 = arith.constant 0 : index
    %c0_248 = arith.constant 0 : index
    %791 = vector.load %arg2[%790, %c0_247, %c0_248] : memref<84x24x128xf32, #tpu.memory_space<vmem>>, vector<1x24x128xf32>
    %792 = vector.shape_cast %791 : vector<1x24x128xf32> to vector<24x128xf32>
    %c0_249 = arith.constant 0 : index
    %793 = arith.index_cast %c60_i32 : i32 to index
    %794 = memref.load %arg1[%c0_249, %793] : memref<2x84xf32, #tpu.memory_space<smem>>
    %795 = vector.broadcast %794 : f32 to vector<24x128xf32>
    %796 = arith.mulf %795, %792 : vector<24x128xf32>
    %797 = arith.addf %784, %796 : vector<24x128xf32>
    %c1_250 = arith.constant 1 : index
    %798 = arith.index_cast %c60_i32 : i32 to index
    %799 = memref.load %arg1[%c1_250, %798] : memref<2x84xf32, #tpu.memory_space<smem>>
    %800 = vector.broadcast %799 : f32 to vector<24x128xf32>
    %801 = arith.mulf %800, %792 : vector<24x128xf32>
    %802 = arith.addf %789, %801 : vector<24x128xf32>
    %c61_i32 = arith.constant 61 : i32
    %803 = arith.index_cast %c61_i32 : i32 to index
    %c0_251 = arith.constant 0 : index
    %c0_252 = arith.constant 0 : index
    %804 = vector.load %arg2[%803, %c0_251, %c0_252] : memref<84x24x128xf32, #tpu.memory_space<vmem>>, vector<1x24x128xf32>
    %805 = vector.shape_cast %804 : vector<1x24x128xf32> to vector<24x128xf32>
    %c0_253 = arith.constant 0 : index
    %806 = arith.index_cast %c61_i32 : i32 to index
    %807 = memref.load %arg1[%c0_253, %806] : memref<2x84xf32, #tpu.memory_space<smem>>
    %808 = vector.broadcast %807 : f32 to vector<24x128xf32>
    %809 = arith.mulf %808, %805 : vector<24x128xf32>
    %810 = arith.addf %797, %809 : vector<24x128xf32>
    %c1_254 = arith.constant 1 : index
    %811 = arith.index_cast %c61_i32 : i32 to index
    %812 = memref.load %arg1[%c1_254, %811] : memref<2x84xf32, #tpu.memory_space<smem>>
    %813 = vector.broadcast %812 : f32 to vector<24x128xf32>
    %814 = arith.mulf %813, %805 : vector<24x128xf32>
    %815 = arith.addf %802, %814 : vector<24x128xf32>
    %c62_i32 = arith.constant 62 : i32
    %816 = arith.index_cast %c62_i32 : i32 to index
    %c0_255 = arith.constant 0 : index
    %c0_256 = arith.constant 0 : index
    %817 = vector.load %arg2[%816, %c0_255, %c0_256] : memref<84x24x128xf32, #tpu.memory_space<vmem>>, vector<1x24x128xf32>
    %818 = vector.shape_cast %817 : vector<1x24x128xf32> to vector<24x128xf32>
    %c0_257 = arith.constant 0 : index
    %819 = arith.index_cast %c62_i32 : i32 to index
    %820 = memref.load %arg1[%c0_257, %819] : memref<2x84xf32, #tpu.memory_space<smem>>
    %821 = vector.broadcast %820 : f32 to vector<24x128xf32>
    %822 = arith.mulf %821, %818 : vector<24x128xf32>
    %823 = arith.addf %810, %822 : vector<24x128xf32>
    %c1_258 = arith.constant 1 : index
    %824 = arith.index_cast %c62_i32 : i32 to index
    %825 = memref.load %arg1[%c1_258, %824] : memref<2x84xf32, #tpu.memory_space<smem>>
    %826 = vector.broadcast %825 : f32 to vector<24x128xf32>
    %827 = arith.mulf %826, %818 : vector<24x128xf32>
    %828 = arith.addf %815, %827 : vector<24x128xf32>
    %c63_i32 = arith.constant 63 : i32
    %829 = arith.index_cast %c63_i32 : i32 to index
    %c0_259 = arith.constant 0 : index
    %c0_260 = arith.constant 0 : index
    %830 = vector.load %arg2[%829, %c0_259, %c0_260] : memref<84x24x128xf32, #tpu.memory_space<vmem>>, vector<1x24x128xf32>
    %831 = vector.shape_cast %830 : vector<1x24x128xf32> to vector<24x128xf32>
    %c0_261 = arith.constant 0 : index
    %832 = arith.index_cast %c63_i32 : i32 to index
    %833 = memref.load %arg1[%c0_261, %832] : memref<2x84xf32, #tpu.memory_space<smem>>
    %834 = vector.broadcast %833 : f32 to vector<24x128xf32>
    %835 = arith.mulf %834, %831 : vector<24x128xf32>
    %836 = arith.addf %823, %835 : vector<24x128xf32>
    %c1_262 = arith.constant 1 : index
    %837 = arith.index_cast %c63_i32 : i32 to index
    %838 = memref.load %arg1[%c1_262, %837] : memref<2x84xf32, #tpu.memory_space<smem>>
    %839 = vector.broadcast %838 : f32 to vector<24x128xf32>
    %840 = arith.mulf %839, %831 : vector<24x128xf32>
    %841 = arith.addf %828, %840 : vector<24x128xf32>
    %c64_i32 = arith.constant 64 : i32
    %842 = arith.index_cast %c64_i32 : i32 to index
    %c0_263 = arith.constant 0 : index
    %c0_264 = arith.constant 0 : index
    %843 = vector.load %arg2[%842, %c0_263, %c0_264] : memref<84x24x128xf32, #tpu.memory_space<vmem>>, vector<1x24x128xf32>
    %844 = vector.shape_cast %843 : vector<1x24x128xf32> to vector<24x128xf32>
    %c0_265 = arith.constant 0 : index
    %845 = arith.index_cast %c64_i32 : i32 to index
    %846 = memref.load %arg1[%c0_265, %845] : memref<2x84xf32, #tpu.memory_space<smem>>
    %847 = vector.broadcast %846 : f32 to vector<24x128xf32>
    %848 = arith.mulf %847, %844 : vector<24x128xf32>
    %849 = arith.addf %836, %848 : vector<24x128xf32>
    %c1_266 = arith.constant 1 : index
    %850 = arith.index_cast %c64_i32 : i32 to index
    %851 = memref.load %arg1[%c1_266, %850] : memref<2x84xf32, #tpu.memory_space<smem>>
    %852 = vector.broadcast %851 : f32 to vector<24x128xf32>
    %853 = arith.mulf %852, %844 : vector<24x128xf32>
    %854 = arith.addf %841, %853 : vector<24x128xf32>
    %c65_i32 = arith.constant 65 : i32
    %855 = arith.index_cast %c65_i32 : i32 to index
    %c0_267 = arith.constant 0 : index
    %c0_268 = arith.constant 0 : index
    %856 = vector.load %arg2[%855, %c0_267, %c0_268] : memref<84x24x128xf32, #tpu.memory_space<vmem>>, vector<1x24x128xf32>
    %857 = vector.shape_cast %856 : vector<1x24x128xf32> to vector<24x128xf32>
    %c0_269 = arith.constant 0 : index
    %858 = arith.index_cast %c65_i32 : i32 to index
    %859 = memref.load %arg1[%c0_269, %858] : memref<2x84xf32, #tpu.memory_space<smem>>
    %860 = vector.broadcast %859 : f32 to vector<24x128xf32>
    %861 = arith.mulf %860, %857 : vector<24x128xf32>
    %862 = arith.addf %849, %861 : vector<24x128xf32>
    %c1_270 = arith.constant 1 : index
    %863 = arith.index_cast %c65_i32 : i32 to index
    %864 = memref.load %arg1[%c1_270, %863] : memref<2x84xf32, #tpu.memory_space<smem>>
    %865 = vector.broadcast %864 : f32 to vector<24x128xf32>
    %866 = arith.mulf %865, %857 : vector<24x128xf32>
    %867 = arith.addf %854, %866 : vector<24x128xf32>
    %c66_i32 = arith.constant 66 : i32
    %868 = arith.index_cast %c66_i32 : i32 to index
    %c0_271 = arith.constant 0 : index
    %c0_272 = arith.constant 0 : index
    %869 = vector.load %arg2[%868, %c0_271, %c0_272] : memref<84x24x128xf32, #tpu.memory_space<vmem>>, vector<1x24x128xf32>
    %870 = vector.shape_cast %869 : vector<1x24x128xf32> to vector<24x128xf32>
    %c0_273 = arith.constant 0 : index
    %871 = arith.index_cast %c66_i32 : i32 to index
    %872 = memref.load %arg1[%c0_273, %871] : memref<2x84xf32, #tpu.memory_space<smem>>
    %873 = vector.broadcast %872 : f32 to vector<24x128xf32>
    %874 = arith.mulf %873, %870 : vector<24x128xf32>
    %875 = arith.addf %862, %874 : vector<24x128xf32>
    %c1_274 = arith.constant 1 : index
    %876 = arith.index_cast %c66_i32 : i32 to index
    %877 = memref.load %arg1[%c1_274, %876] : memref<2x84xf32, #tpu.memory_space<smem>>
    %878 = vector.broadcast %877 : f32 to vector<24x128xf32>
    %879 = arith.mulf %878, %870 : vector<24x128xf32>
    %880 = arith.addf %867, %879 : vector<24x128xf32>
    %c67_i32 = arith.constant 67 : i32
    %881 = arith.index_cast %c67_i32 : i32 to index
    %c0_275 = arith.constant 0 : index
    %c0_276 = arith.constant 0 : index
    %882 = vector.load %arg2[%881, %c0_275, %c0_276] : memref<84x24x128xf32, #tpu.memory_space<vmem>>, vector<1x24x128xf32>
    %883 = vector.shape_cast %882 : vector<1x24x128xf32> to vector<24x128xf32>
    %c0_277 = arith.constant 0 : index
    %884 = arith.index_cast %c67_i32 : i32 to index
    %885 = memref.load %arg1[%c0_277, %884] : memref<2x84xf32, #tpu.memory_space<smem>>
    %886 = vector.broadcast %885 : f32 to vector<24x128xf32>
    %887 = arith.mulf %886, %883 : vector<24x128xf32>
    %888 = arith.addf %875, %887 : vector<24x128xf32>
    %c1_278 = arith.constant 1 : index
    %889 = arith.index_cast %c67_i32 : i32 to index
    %890 = memref.load %arg1[%c1_278, %889] : memref<2x84xf32, #tpu.memory_space<smem>>
    %891 = vector.broadcast %890 : f32 to vector<24x128xf32>
    %892 = arith.mulf %891, %883 : vector<24x128xf32>
    %893 = arith.addf %880, %892 : vector<24x128xf32>
    %c68_i32 = arith.constant 68 : i32
    %894 = arith.index_cast %c68_i32 : i32 to index
    %c0_279 = arith.constant 0 : index
    %c0_280 = arith.constant 0 : index
    %895 = vector.load %arg2[%894, %c0_279, %c0_280] : memref<84x24x128xf32, #tpu.memory_space<vmem>>, vector<1x24x128xf32>
    %896 = vector.shape_cast %895 : vector<1x24x128xf32> to vector<24x128xf32>
    %c0_281 = arith.constant 0 : index
    %897 = arith.index_cast %c68_i32 : i32 to index
    %898 = memref.load %arg1[%c0_281, %897] : memref<2x84xf32, #tpu.memory_space<smem>>
    %899 = vector.broadcast %898 : f32 to vector<24x128xf32>
    %900 = arith.mulf %899, %896 : vector<24x128xf32>
    %901 = arith.addf %888, %900 : vector<24x128xf32>
    %c1_282 = arith.constant 1 : index
    %902 = arith.index_cast %c68_i32 : i32 to index
    %903 = memref.load %arg1[%c1_282, %902] : memref<2x84xf32, #tpu.memory_space<smem>>
    %904 = vector.broadcast %903 : f32 to vector<24x128xf32>
    %905 = arith.mulf %904, %896 : vector<24x128xf32>
    %906 = arith.addf %893, %905 : vector<24x128xf32>
    %c69_i32 = arith.constant 69 : i32
    %907 = arith.index_cast %c69_i32 : i32 to index
    %c0_283 = arith.constant 0 : index
    %c0_284 = arith.constant 0 : index
    %908 = vector.load %arg2[%907, %c0_283, %c0_284] : memref<84x24x128xf32, #tpu.memory_space<vmem>>, vector<1x24x128xf32>
    %909 = vector.shape_cast %908 : vector<1x24x128xf32> to vector<24x128xf32>
    %c0_285 = arith.constant 0 : index
    %910 = arith.index_cast %c69_i32 : i32 to index
    %911 = memref.load %arg1[%c0_285, %910] : memref<2x84xf32, #tpu.memory_space<smem>>
    %912 = vector.broadcast %911 : f32 to vector<24x128xf32>
    %913 = arith.mulf %912, %909 : vector<24x128xf32>
    %914 = arith.addf %901, %913 : vector<24x128xf32>
    %c1_286 = arith.constant 1 : index
    %915 = arith.index_cast %c69_i32 : i32 to index
    %916 = memref.load %arg1[%c1_286, %915] : memref<2x84xf32, #tpu.memory_space<smem>>
    %917 = vector.broadcast %916 : f32 to vector<24x128xf32>
    %918 = arith.mulf %917, %909 : vector<24x128xf32>
    %919 = arith.addf %906, %918 : vector<24x128xf32>
    %c70_i32 = arith.constant 70 : i32
    %920 = arith.index_cast %c70_i32 : i32 to index
    %c0_287 = arith.constant 0 : index
    %c0_288 = arith.constant 0 : index
    %921 = vector.load %arg2[%920, %c0_287, %c0_288] : memref<84x24x128xf32, #tpu.memory_space<vmem>>, vector<1x24x128xf32>
    %922 = vector.shape_cast %921 : vector<1x24x128xf32> to vector<24x128xf32>
    %c0_289 = arith.constant 0 : index
    %923 = arith.index_cast %c70_i32 : i32 to index
    %924 = memref.load %arg1[%c0_289, %923] : memref<2x84xf32, #tpu.memory_space<smem>>
    %925 = vector.broadcast %924 : f32 to vector<24x128xf32>
    %926 = arith.mulf %925, %922 : vector<24x128xf32>
    %927 = arith.addf %914, %926 : vector<24x128xf32>
    %c1_290 = arith.constant 1 : index
    %928 = arith.index_cast %c70_i32 : i32 to index
    %929 = memref.load %arg1[%c1_290, %928] : memref<2x84xf32, #tpu.memory_space<smem>>
    %930 = vector.broadcast %929 : f32 to vector<24x128xf32>
    %931 = arith.mulf %930, %922 : vector<24x128xf32>
    %932 = arith.addf %919, %931 : vector<24x128xf32>
    %c71_i32 = arith.constant 71 : i32
    %933 = arith.index_cast %c71_i32 : i32 to index
    %c0_291 = arith.constant 0 : index
    %c0_292 = arith.constant 0 : index
    %934 = vector.load %arg2[%933, %c0_291, %c0_292] : memref<84x24x128xf32, #tpu.memory_space<vmem>>, vector<1x24x128xf32>
    %935 = vector.shape_cast %934 : vector<1x24x128xf32> to vector<24x128xf32>
    %c0_293 = arith.constant 0 : index
    %936 = arith.index_cast %c71_i32 : i32 to index
    %937 = memref.load %arg1[%c0_293, %936] : memref<2x84xf32, #tpu.memory_space<smem>>
    %938 = vector.broadcast %937 : f32 to vector<24x128xf32>
    %939 = arith.mulf %938, %935 : vector<24x128xf32>
    %940 = arith.addf %927, %939 : vector<24x128xf32>
    %c1_294 = arith.constant 1 : index
    %941 = arith.index_cast %c71_i32 : i32 to index
    %942 = memref.load %arg1[%c1_294, %941] : memref<2x84xf32, #tpu.memory_space<smem>>
    %943 = vector.broadcast %942 : f32 to vector<24x128xf32>
    %944 = arith.mulf %943, %935 : vector<24x128xf32>
    %945 = arith.addf %932, %944 : vector<24x128xf32>
    %c72_i32 = arith.constant 72 : i32
    %946 = arith.index_cast %c72_i32 : i32 to index
    %c0_295 = arith.constant 0 : index
    %c0_296 = arith.constant 0 : index
    %947 = vector.load %arg2[%946, %c0_295, %c0_296] : memref<84x24x128xf32, #tpu.memory_space<vmem>>, vector<1x24x128xf32>
    %948 = vector.shape_cast %947 : vector<1x24x128xf32> to vector<24x128xf32>
    %c0_297 = arith.constant 0 : index
    %949 = arith.index_cast %c72_i32 : i32 to index
    %950 = memref.load %arg1[%c0_297, %949] : memref<2x84xf32, #tpu.memory_space<smem>>
    %951 = vector.broadcast %950 : f32 to vector<24x128xf32>
    %952 = arith.mulf %951, %948 : vector<24x128xf32>
    %953 = arith.addf %940, %952 : vector<24x128xf32>
    %c1_298 = arith.constant 1 : index
    %954 = arith.index_cast %c72_i32 : i32 to index
    %955 = memref.load %arg1[%c1_298, %954] : memref<2x84xf32, #tpu.memory_space<smem>>
    %956 = vector.broadcast %955 : f32 to vector<24x128xf32>
    %957 = arith.mulf %956, %948 : vector<24x128xf32>
    %958 = arith.addf %945, %957 : vector<24x128xf32>
    %c73_i32 = arith.constant 73 : i32
    %959 = arith.index_cast %c73_i32 : i32 to index
    %c0_299 = arith.constant 0 : index
    %c0_300 = arith.constant 0 : index
    %960 = vector.load %arg2[%959, %c0_299, %c0_300] : memref<84x24x128xf32, #tpu.memory_space<vmem>>, vector<1x24x128xf32>
    %961 = vector.shape_cast %960 : vector<1x24x128xf32> to vector<24x128xf32>
    %c0_301 = arith.constant 0 : index
    %962 = arith.index_cast %c73_i32 : i32 to index
    %963 = memref.load %arg1[%c0_301, %962] : memref<2x84xf32, #tpu.memory_space<smem>>
    %964 = vector.broadcast %963 : f32 to vector<24x128xf32>
    %965 = arith.mulf %964, %961 : vector<24x128xf32>
    %966 = arith.addf %953, %965 : vector<24x128xf32>
    %c1_302 = arith.constant 1 : index
    %967 = arith.index_cast %c73_i32 : i32 to index
    %968 = memref.load %arg1[%c1_302, %967] : memref<2x84xf32, #tpu.memory_space<smem>>
    %969 = vector.broadcast %968 : f32 to vector<24x128xf32>
    %970 = arith.mulf %969, %961 : vector<24x128xf32>
    %971 = arith.addf %958, %970 : vector<24x128xf32>
    %c74_i32 = arith.constant 74 : i32
    %972 = arith.index_cast %c74_i32 : i32 to index
    %c0_303 = arith.constant 0 : index
    %c0_304 = arith.constant 0 : index
    %973 = vector.load %arg2[%972, %c0_303, %c0_304] : memref<84x24x128xf32, #tpu.memory_space<vmem>>, vector<1x24x128xf32>
    %974 = vector.shape_cast %973 : vector<1x24x128xf32> to vector<24x128xf32>
    %c0_305 = arith.constant 0 : index
    %975 = arith.index_cast %c74_i32 : i32 to index
    %976 = memref.load %arg1[%c0_305, %975] : memref<2x84xf32, #tpu.memory_space<smem>>
    %977 = vector.broadcast %976 : f32 to vector<24x128xf32>
    %978 = arith.mulf %977, %974 : vector<24x128xf32>
    %979 = arith.addf %966, %978 : vector<24x128xf32>
    %c1_306 = arith.constant 1 : index
    %980 = arith.index_cast %c74_i32 : i32 to index
    %981 = memref.load %arg1[%c1_306, %980] : memref<2x84xf32, #tpu.memory_space<smem>>
    %982 = vector.broadcast %981 : f32 to vector<24x128xf32>
    %983 = arith.mulf %982, %974 : vector<24x128xf32>
    %984 = arith.addf %971, %983 : vector<24x128xf32>
    %c75_i32 = arith.constant 75 : i32
    %985 = arith.index_cast %c75_i32 : i32 to index
    %c0_307 = arith.constant 0 : index
    %c0_308 = arith.constant 0 : index
    %986 = vector.load %arg2[%985, %c0_307, %c0_308] : memref<84x24x128xf32, #tpu.memory_space<vmem>>, vector<1x24x128xf32>
    %987 = vector.shape_cast %986 : vector<1x24x128xf32> to vector<24x128xf32>
    %c0_309 = arith.constant 0 : index
    %988 = arith.index_cast %c75_i32 : i32 to index
    %989 = memref.load %arg1[%c0_309, %988] : memref<2x84xf32, #tpu.memory_space<smem>>
    %990 = vector.broadcast %989 : f32 to vector<24x128xf32>
    %991 = arith.mulf %990, %987 : vector<24x128xf32>
    %992 = arith.addf %979, %991 : vector<24x128xf32>
    %c1_310 = arith.constant 1 : index
    %993 = arith.index_cast %c75_i32 : i32 to index
    %994 = memref.load %arg1[%c1_310, %993] : memref<2x84xf32, #tpu.memory_space<smem>>
    %995 = vector.broadcast %994 : f32 to vector<24x128xf32>
    %996 = arith.mulf %995, %987 : vector<24x128xf32>
    %997 = arith.addf %984, %996 : vector<24x128xf32>
    %c76_i32 = arith.constant 76 : i32
    %998 = arith.index_cast %c76_i32 : i32 to index
    %c0_311 = arith.constant 0 : index
    %c0_312 = arith.constant 0 : index
    %999 = vector.load %arg2[%998, %c0_311, %c0_312] : memref<84x24x128xf32, #tpu.memory_space<vmem>>, vector<1x24x128xf32>
    %1000 = vector.shape_cast %999 : vector<1x24x128xf32> to vector<24x128xf32>
    %c0_313 = arith.constant 0 : index
    %1001 = arith.index_cast %c76_i32 : i32 to index
    %1002 = memref.load %arg1[%c0_313, %1001] : memref<2x84xf32, #tpu.memory_space<smem>>
    %1003 = vector.broadcast %1002 : f32 to vector<24x128xf32>
    %1004 = arith.mulf %1003, %1000 : vector<24x128xf32>
    %1005 = arith.addf %992, %1004 : vector<24x128xf32>
    %c1_314 = arith.constant 1 : index
    %1006 = arith.index_cast %c76_i32 : i32 to index
    %1007 = memref.load %arg1[%c1_314, %1006] : memref<2x84xf32, #tpu.memory_space<smem>>
    %1008 = vector.broadcast %1007 : f32 to vector<24x128xf32>
    %1009 = arith.mulf %1008, %1000 : vector<24x128xf32>
    %1010 = arith.addf %997, %1009 : vector<24x128xf32>
    %c77_i32 = arith.constant 77 : i32
    %1011 = arith.index_cast %c77_i32 : i32 to index
    %c0_315 = arith.constant 0 : index
    %c0_316 = arith.constant 0 : index
    %1012 = vector.load %arg2[%1011, %c0_315, %c0_316] : memref<84x24x128xf32, #tpu.memory_space<vmem>>, vector<1x24x128xf32>
    %1013 = vector.shape_cast %1012 : vector<1x24x128xf32> to vector<24x128xf32>
    %c0_317 = arith.constant 0 : index
    %1014 = arith.index_cast %c77_i32 : i32 to index
    %1015 = memref.load %arg1[%c0_317, %1014] : memref<2x84xf32, #tpu.memory_space<smem>>
    %1016 = vector.broadcast %1015 : f32 to vector<24x128xf32>
    %1017 = arith.mulf %1016, %1013 : vector<24x128xf32>
    %1018 = arith.addf %1005, %1017 : vector<24x128xf32>
    %c1_318 = arith.constant 1 : index
    %1019 = arith.index_cast %c77_i32 : i32 to index
    %1020 = memref.load %arg1[%c1_318, %1019] : memref<2x84xf32, #tpu.memory_space<smem>>
    %1021 = vector.broadcast %1020 : f32 to vector<24x128xf32>
    %1022 = arith.mulf %1021, %1013 : vector<24x128xf32>
    %1023 = arith.addf %1010, %1022 : vector<24x128xf32>
    %c78_i32 = arith.constant 78 : i32
    %1024 = arith.index_cast %c78_i32 : i32 to index
    %c0_319 = arith.constant 0 : index
    %c0_320 = arith.constant 0 : index
    %1025 = vector.load %arg2[%1024, %c0_319, %c0_320] : memref<84x24x128xf32, #tpu.memory_space<vmem>>, vector<1x24x128xf32>
    %1026 = vector.shape_cast %1025 : vector<1x24x128xf32> to vector<24x128xf32>
    %c0_321 = arith.constant 0 : index
    %1027 = arith.index_cast %c78_i32 : i32 to index
    %1028 = memref.load %arg1[%c0_321, %1027] : memref<2x84xf32, #tpu.memory_space<smem>>
    %1029 = vector.broadcast %1028 : f32 to vector<24x128xf32>
    %1030 = arith.mulf %1029, %1026 : vector<24x128xf32>
    %1031 = arith.addf %1018, %1030 : vector<24x128xf32>
    %c1_322 = arith.constant 1 : index
    %1032 = arith.index_cast %c78_i32 : i32 to index
    %1033 = memref.load %arg1[%c1_322, %1032] : memref<2x84xf32, #tpu.memory_space<smem>>
    %1034 = vector.broadcast %1033 : f32 to vector<24x128xf32>
    %1035 = arith.mulf %1034, %1026 : vector<24x128xf32>
    %1036 = arith.addf %1023, %1035 : vector<24x128xf32>
    %c79_i32 = arith.constant 79 : i32
    %1037 = arith.index_cast %c79_i32 : i32 to index
    %c0_323 = arith.constant 0 : index
    %c0_324 = arith.constant 0 : index
    %1038 = vector.load %arg2[%1037, %c0_323, %c0_324] : memref<84x24x128xf32, #tpu.memory_space<vmem>>, vector<1x24x128xf32>
    %1039 = vector.shape_cast %1038 : vector<1x24x128xf32> to vector<24x128xf32>
    %c0_325 = arith.constant 0 : index
    %1040 = arith.index_cast %c79_i32 : i32 to index
    %1041 = memref.load %arg1[%c0_325, %1040] : memref<2x84xf32, #tpu.memory_space<smem>>
    %1042 = vector.broadcast %1041 : f32 to vector<24x128xf32>
    %1043 = arith.mulf %1042, %1039 : vector<24x128xf32>
    %1044 = arith.addf %1031, %1043 : vector<24x128xf32>
    %c1_326 = arith.constant 1 : index
    %1045 = arith.index_cast %c79_i32 : i32 to index
    %1046 = memref.load %arg1[%c1_326, %1045] : memref<2x84xf32, #tpu.memory_space<smem>>
    %1047 = vector.broadcast %1046 : f32 to vector<24x128xf32>
    %1048 = arith.mulf %1047, %1039 : vector<24x128xf32>
    %1049 = arith.addf %1036, %1048 : vector<24x128xf32>
    %c80_i32 = arith.constant 80 : i32
    %1050 = arith.index_cast %c80_i32 : i32 to index
    %c0_327 = arith.constant 0 : index
    %c0_328 = arith.constant 0 : index
    %1051 = vector.load %arg2[%1050, %c0_327, %c0_328] : memref<84x24x128xf32, #tpu.memory_space<vmem>>, vector<1x24x128xf32>
    %1052 = vector.shape_cast %1051 : vector<1x24x128xf32> to vector<24x128xf32>
    %c0_329 = arith.constant 0 : index
    %1053 = arith.index_cast %c80_i32 : i32 to index
    %1054 = memref.load %arg1[%c0_329, %1053] : memref<2x84xf32, #tpu.memory_space<smem>>
    %1055 = vector.broadcast %1054 : f32 to vector<24x128xf32>
    %1056 = arith.mulf %1055, %1052 : vector<24x128xf32>
    %1057 = arith.addf %1044, %1056 : vector<24x128xf32>
    %c1_330 = arith.constant 1 : index
    %1058 = arith.index_cast %c80_i32 : i32 to index
    %1059 = memref.load %arg1[%c1_330, %1058] : memref<2x84xf32, #tpu.memory_space<smem>>
    %1060 = vector.broadcast %1059 : f32 to vector<24x128xf32>
    %1061 = arith.mulf %1060, %1052 : vector<24x128xf32>
    %1062 = arith.addf %1049, %1061 : vector<24x128xf32>
    %c81_i32 = arith.constant 81 : i32
    %1063 = arith.index_cast %c81_i32 : i32 to index
    %c0_331 = arith.constant 0 : index
    %c0_332 = arith.constant 0 : index
    %1064 = vector.load %arg2[%1063, %c0_331, %c0_332] : memref<84x24x128xf32, #tpu.memory_space<vmem>>, vector<1x24x128xf32>
    %1065 = vector.shape_cast %1064 : vector<1x24x128xf32> to vector<24x128xf32>
    %c0_333 = arith.constant 0 : index
    %1066 = arith.index_cast %c81_i32 : i32 to index
    %1067 = memref.load %arg1[%c0_333, %1066] : memref<2x84xf32, #tpu.memory_space<smem>>
    %1068 = vector.broadcast %1067 : f32 to vector<24x128xf32>
    %1069 = arith.mulf %1068, %1065 : vector<24x128xf32>
    %1070 = arith.addf %1057, %1069 : vector<24x128xf32>
    %c1_334 = arith.constant 1 : index
    %1071 = arith.index_cast %c81_i32 : i32 to index
    %1072 = memref.load %arg1[%c1_334, %1071] : memref<2x84xf32, #tpu.memory_space<smem>>
    %1073 = vector.broadcast %1072 : f32 to vector<24x128xf32>
    %1074 = arith.mulf %1073, %1065 : vector<24x128xf32>
    %1075 = arith.addf %1062, %1074 : vector<24x128xf32>
    %c82_i32 = arith.constant 82 : i32
    %1076 = arith.index_cast %c82_i32 : i32 to index
    %c0_335 = arith.constant 0 : index
    %c0_336 = arith.constant 0 : index
    %1077 = vector.load %arg2[%1076, %c0_335, %c0_336] : memref<84x24x128xf32, #tpu.memory_space<vmem>>, vector<1x24x128xf32>
    %1078 = vector.shape_cast %1077 : vector<1x24x128xf32> to vector<24x128xf32>
    %c0_337 = arith.constant 0 : index
    %1079 = arith.index_cast %c82_i32 : i32 to index
    %1080 = memref.load %arg1[%c0_337, %1079] : memref<2x84xf32, #tpu.memory_space<smem>>
    %1081 = vector.broadcast %1080 : f32 to vector<24x128xf32>
    %1082 = arith.mulf %1081, %1078 : vector<24x128xf32>
    %1083 = arith.addf %1070, %1082 : vector<24x128xf32>
    %c1_338 = arith.constant 1 : index
    %1084 = arith.index_cast %c82_i32 : i32 to index
    %1085 = memref.load %arg1[%c1_338, %1084] : memref<2x84xf32, #tpu.memory_space<smem>>
    %1086 = vector.broadcast %1085 : f32 to vector<24x128xf32>
    %1087 = arith.mulf %1086, %1078 : vector<24x128xf32>
    %1088 = arith.addf %1075, %1087 : vector<24x128xf32>
    %c83_i32 = arith.constant 83 : i32
    %1089 = arith.index_cast %c83_i32 : i32 to index
    %c0_339 = arith.constant 0 : index
    %c0_340 = arith.constant 0 : index
    %1090 = vector.load %arg2[%1089, %c0_339, %c0_340] : memref<84x24x128xf32, #tpu.memory_space<vmem>>, vector<1x24x128xf32>
    %1091 = vector.shape_cast %1090 : vector<1x24x128xf32> to vector<24x128xf32>
    %c0_341 = arith.constant 0 : index
    %1092 = arith.index_cast %c83_i32 : i32 to index
    %1093 = memref.load %arg1[%c0_341, %1092] : memref<2x84xf32, #tpu.memory_space<smem>>
    %1094 = vector.broadcast %1093 : f32 to vector<24x128xf32>
    %1095 = arith.mulf %1094, %1091 : vector<24x128xf32>
    %1096 = arith.addf %1083, %1095 : vector<24x128xf32>
    %c1_342 = arith.constant 1 : index
    %1097 = arith.index_cast %c83_i32 : i32 to index
    %1098 = memref.load %arg1[%c1_342, %1097] : memref<2x84xf32, #tpu.memory_space<smem>>
    %1099 = vector.broadcast %1098 : f32 to vector<24x128xf32>
    %1100 = arith.mulf %1099, %1091 : vector<24x128xf32>
    %1101 = arith.addf %1088, %1100 : vector<24x128xf32>
    %c36_i32_343 = arith.constant 36 : i32
    %1102 = arith.addf %0, %1096 : vector<24x128xf32>
    %c0_344 = arith.constant 0 : index
    %c0_345 = arith.constant 0 : index
    %c0_346 = arith.constant 0 : index
    %1103 = vector.load %arg5[%c0_344, %c0_345, %c0_346] : memref<2x24x128xf32, #tpu.memory_space<vmem>>, vector<1x24x128xf32>
    %1104 = vector.shape_cast %1103 : vector<1x24x128xf32> to vector<24x128xf32>
    %1105 = vector.shape_cast %1102 : vector<24x128xf32> to vector<1x24x128xf32>
    tpu.vector_store %arg5[%c0_344, %c0_345, %c0_346], %1105 {strides = array<i32>} : memref<2x24x128xf32, #tpu.memory_space<vmem>>, vector<1x24x128xf32>,
    %1106 = arith.addf %0, %1101 : vector<24x128xf32>
    %c1_347 = arith.constant 1 : index
    %c0_348 = arith.constant 0 : index
    %c0_349 = arith.constant 0 : index
    %1107 = vector.load %arg5[%c1_347, %c0_348, %c0_349] : memref<2x24x128xf32, #tpu.memory_space<vmem>>, vector<1x24x128xf32>
    %1108 = vector.shape_cast %1107 : vector<1x24x128xf32> to vector<24x128xf32>
    %1109 = vector.shape_cast %1106 : vector<24x128xf32> to vector<1x24x128xf32>
    tpu.vector_store %arg5[%c1_347, %c0_348, %c0_349], %1109 {strides = array<i32>} : memref<2x24x128xf32, #tpu.memory_space<vmem>>, vector<1x24x128xf32>,
    return
  }
  func.func @transform_0(%arg0: i32, %arg1: memref<2x84xf32, #tpu.memory_space<smem>>) -> (i32, i32, i32) {
    %c0_i32 = arith.constant 0 : i32
    %c0_i32_0 = arith.constant 0 : i32
    %c0_i32_1 = arith.constant 0 : i32
    return %c0_i32, %arg0, %c0_i32_0 : i32, i32, i32
  }
  func.func @transform_1(%arg0: i32, %arg1: memref<2x84xf32, #tpu.memory_space<smem>>) -> (i32, i32) {
    %c0_i32 = arith.constant 0 : i32
    %c0_i32_0 = arith.constant 0 : i32
    return %arg0, %c0_i32 : i32, i32
  }
  func.func @transform_2(%arg0: i32, %arg1: memref<2x84xf32, #tpu.memory_space<smem>>) -> (i32, i32, i32) {
    %c0_i32 = arith.constant 0 : i32
    %c0_i32_0 = arith.constant 0 : i32
    %c0_i32_1 = arith.constant 0 : i32
    return %c0_i32, %arg0, %c0_i32_0 : i32, i32, i32
  }
  func.func @transform_3(%arg0: i32, %arg1: memref<2x84xf32, #tpu.memory_space<smem>>) -> (i32, i32, i32) {
    %c0_i32 = arith.constant 0 : i32
    %c0_i32_0 = arith.constant 0 : i32
    %c0_i32_1 = arith.constant 0 : i32
    return %c0_i32, %arg0, %c0_i32_0 : i32, i32, i32
  }
}

module attributes {stable_mosaic.version = 11 : i64} {
  func.func @_skin_kernel(%arg0: i32, %arg1: memref<120xf32, #tpu.memory_space<smem>>, %arg2: memref<5x8x128xf32, #tpu.memory_space<vmem>>, %arg3: memref<2x3x8x128xf32, #tpu.memory_space<vmem>>, %arg4: memref<2x3x8x128xf32, #tpu.memory_space<vmem>>) attributes {dimension_semantics = [#tpu.dimension_semantics<parallel>], iteration_bounds = array<i64: 2>, scalar_prefetch = 1 : i64, scratch_operands = 0 : i64, tpu.core_type = #tpu.core_type<tc>, window_params = [{transform_indices = @transform_0, window_bounds = array<i64: 5, 8, 128>}, {transform_indices = @transform_1, window_bounds = array<i64: 2, 3, 8, 128>}, {transform_indices = @transform_2, window_bounds = array<i64: 2, 3, 8, 128>}]} {
    %c0 = arith.constant 0 : index
    %c0_0 = arith.constant 0 : index
    %c0_1 = arith.constant 0 : index
    %c0_2 = arith.constant 0 : index
    %0 = vector.load %arg3[%c0, %c0_0, %c0_1, %c0_2] : memref<2x3x8x128xf32, #tpu.memory_space<vmem>>, vector<1x1x8x128xf32>
    %1 = vector.shape_cast %0 : vector<1x1x8x128xf32> to vector<8x128xf32>
    %c0_3 = arith.constant 0 : index
    %c1 = arith.constant 1 : index
    %c0_4 = arith.constant 0 : index
    %c0_5 = arith.constant 0 : index
    %2 = vector.load %arg3[%c0_3, %c1, %c0_4, %c0_5] : memref<2x3x8x128xf32, #tpu.memory_space<vmem>>, vector<1x1x8x128xf32>
    %3 = vector.shape_cast %2 : vector<1x1x8x128xf32> to vector<8x128xf32>
    %c0_6 = arith.constant 0 : index
    %c2 = arith.constant 2 : index
    %c0_7 = arith.constant 0 : index
    %c0_8 = arith.constant 0 : index
    %4 = vector.load %arg3[%c0_6, %c2, %c0_7, %c0_8] : memref<2x3x8x128xf32, #tpu.memory_space<vmem>>, vector<1x1x8x128xf32>
    %5 = vector.shape_cast %4 : vector<1x1x8x128xf32> to vector<8x128xf32>
    %cst = arith.constant 0.000000e+00 : f32
    %6 = vector.broadcast %cst : f32 to vector<8x128xf32>
    %cst_9 = arith.constant 0.000000e+00 : f32
    %7 = vector.broadcast %cst_9 : f32 to vector<8x128xf32>
    %cst_10 = arith.constant 0.000000e+00 : f32
    %8 = vector.broadcast %cst_10 : f32 to vector<8x128xf32>
    %c0_11 = arith.constant 0 : index
    %c0_12 = arith.constant 0 : index
    %c0_13 = arith.constant 0 : index
    %9 = vector.load %arg2[%c0_11, %c0_12, %c0_13] : memref<5x8x128xf32, #tpu.memory_space<vmem>>, vector<1x8x128xf32>
    %10 = vector.shape_cast %9 : vector<1x8x128xf32> to vector<8x128xf32>
    %c0_14 = arith.constant 0 : index
    %11 = memref.load %arg1[%c0_14] : memref<120xf32, #tpu.memory_space<smem>>
    %c1_15 = arith.constant 1 : index
    %12 = memref.load %arg1[%c1_15] : memref<120xf32, #tpu.memory_space<smem>>
    %c2_16 = arith.constant 2 : index
    %13 = memref.load %arg1[%c2_16] : memref<120xf32, #tpu.memory_space<smem>>
    %c3 = arith.constant 3 : index
    %14 = memref.load %arg1[%c3] : memref<120xf32, #tpu.memory_space<smem>>
    %c4 = arith.constant 4 : index
    %15 = memref.load %arg1[%c4] : memref<120xf32, #tpu.memory_space<smem>>
    %c5 = arith.constant 5 : index
    %16 = memref.load %arg1[%c5] : memref<120xf32, #tpu.memory_space<smem>>
    %c6 = arith.constant 6 : index
    %17 = memref.load %arg1[%c6] : memref<120xf32, #tpu.memory_space<smem>>
    %c7 = arith.constant 7 : index
    %18 = memref.load %arg1[%c7] : memref<120xf32, #tpu.memory_space<smem>>
    %c8 = arith.constant 8 : index
    %19 = memref.load %arg1[%c8] : memref<120xf32, #tpu.memory_space<smem>>
    %c9 = arith.constant 9 : index
    %20 = memref.load %arg1[%c9] : memref<120xf32, #tpu.memory_space<smem>>
    %c10 = arith.constant 10 : index
    %21 = memref.load %arg1[%c10] : memref<120xf32, #tpu.memory_space<smem>>
    %c11 = arith.constant 11 : index
    %22 = memref.load %arg1[%c11] : memref<120xf32, #tpu.memory_space<smem>>
    %23 = vector.broadcast %11 : f32 to vector<8x128xf32>
    %24 = arith.mulf %23, %1 : vector<8x128xf32>
    %25 = vector.broadcast %12 : f32 to vector<8x128xf32>
    %26 = arith.mulf %25, %3 : vector<8x128xf32>
    %27 = arith.addf %24, %26 : vector<8x128xf32>
    %28 = vector.broadcast %13 : f32 to vector<8x128xf32>
    %29 = arith.mulf %28, %5 : vector<8x128xf32>
    %30 = arith.addf %27, %29 : vector<8x128xf32>
    %31 = vector.broadcast %14 : f32 to vector<8x128xf32>
    %32 = arith.addf %30, %31 : vector<8x128xf32>
    %33 = arith.mulf %10, %32 : vector<8x128xf32>
    %34 = arith.addf %6, %33 : vector<8x128xf32>
    %35 = vector.broadcast %15 : f32 to vector<8x128xf32>
    %36 = arith.mulf %35, %1 : vector<8x128xf32>
    %37 = vector.broadcast %16 : f32 to vector<8x128xf32>
    %38 = arith.mulf %37, %3 : vector<8x128xf32>
    %39 = arith.addf %36, %38 : vector<8x128xf32>
    %40 = vector.broadcast %17 : f32 to vector<8x128xf32>
    %41 = arith.mulf %40, %5 : vector<8x128xf32>
    %42 = arith.addf %39, %41 : vector<8x128xf32>
    %43 = vector.broadcast %18 : f32 to vector<8x128xf32>
    %44 = arith.addf %42, %43 : vector<8x128xf32>
    %45 = arith.mulf %10, %44 : vector<8x128xf32>
    %46 = arith.addf %7, %45 : vector<8x128xf32>
    %47 = vector.broadcast %19 : f32 to vector<8x128xf32>
    %48 = arith.mulf %47, %1 : vector<8x128xf32>
    %49 = vector.broadcast %20 : f32 to vector<8x128xf32>
    %50 = arith.mulf %49, %3 : vector<8x128xf32>
    %51 = arith.addf %48, %50 : vector<8x128xf32>
    %52 = vector.broadcast %21 : f32 to vector<8x128xf32>
    %53 = arith.mulf %52, %5 : vector<8x128xf32>
    %54 = arith.addf %51, %53 : vector<8x128xf32>
    %55 = vector.broadcast %22 : f32 to vector<8x128xf32>
    %56 = arith.addf %54, %55 : vector<8x128xf32>
    %57 = arith.mulf %10, %56 : vector<8x128xf32>
    %58 = arith.addf %8, %57 : vector<8x128xf32>
    %c1_17 = arith.constant 1 : index
    %c0_18 = arith.constant 0 : index
    %c0_19 = arith.constant 0 : index
    %59 = vector.load %arg2[%c1_17, %c0_18, %c0_19] : memref<5x8x128xf32, #tpu.memory_space<vmem>>, vector<1x8x128xf32>
    %60 = vector.shape_cast %59 : vector<1x8x128xf32> to vector<8x128xf32>
    %c12 = arith.constant 12 : index
    %61 = memref.load %arg1[%c12] : memref<120xf32, #tpu.memory_space<smem>>
    %c13 = arith.constant 13 : index
    %62 = memref.load %arg1[%c13] : memref<120xf32, #tpu.memory_space<smem>>
    %c14 = arith.constant 14 : index
    %63 = memref.load %arg1[%c14] : memref<120xf32, #tpu.memory_space<smem>>
    %c15 = arith.constant 15 : index
    %64 = memref.load %arg1[%c15] : memref<120xf32, #tpu.memory_space<smem>>
    %c16 = arith.constant 16 : index
    %65 = memref.load %arg1[%c16] : memref<120xf32, #tpu.memory_space<smem>>
    %c17 = arith.constant 17 : index
    %66 = memref.load %arg1[%c17] : memref<120xf32, #tpu.memory_space<smem>>
    %c18 = arith.constant 18 : index
    %67 = memref.load %arg1[%c18] : memref<120xf32, #tpu.memory_space<smem>>
    %c19 = arith.constant 19 : index
    %68 = memref.load %arg1[%c19] : memref<120xf32, #tpu.memory_space<smem>>
    %c20 = arith.constant 20 : index
    %69 = memref.load %arg1[%c20] : memref<120xf32, #tpu.memory_space<smem>>
    %c21 = arith.constant 21 : index
    %70 = memref.load %arg1[%c21] : memref<120xf32, #tpu.memory_space<smem>>
    %c22 = arith.constant 22 : index
    %71 = memref.load %arg1[%c22] : memref<120xf32, #tpu.memory_space<smem>>
    %c23 = arith.constant 23 : index
    %72 = memref.load %arg1[%c23] : memref<120xf32, #tpu.memory_space<smem>>
    %73 = vector.broadcast %61 : f32 to vector<8x128xf32>
    %74 = arith.mulf %73, %1 : vector<8x128xf32>
    %75 = vector.broadcast %62 : f32 to vector<8x128xf32>
    %76 = arith.mulf %75, %3 : vector<8x128xf32>
    %77 = arith.addf %74, %76 : vector<8x128xf32>
    %78 = vector.broadcast %63 : f32 to vector<8x128xf32>
    %79 = arith.mulf %78, %5 : vector<8x128xf32>
    %80 = arith.addf %77, %79 : vector<8x128xf32>
    %81 = vector.broadcast %64 : f32 to vector<8x128xf32>
    %82 = arith.addf %80, %81 : vector<8x128xf32>
    %83 = arith.mulf %60, %82 : vector<8x128xf32>
    %84 = arith.addf %34, %83 : vector<8x128xf32>
    %85 = vector.broadcast %65 : f32 to vector<8x128xf32>
    %86 = arith.mulf %85, %1 : vector<8x128xf32>
    %87 = vector.broadcast %66 : f32 to vector<8x128xf32>
    %88 = arith.mulf %87, %3 : vector<8x128xf32>
    %89 = arith.addf %86, %88 : vector<8x128xf32>
    %90 = vector.broadcast %67 : f32 to vector<8x128xf32>
    %91 = arith.mulf %90, %5 : vector<8x128xf32>
    %92 = arith.addf %89, %91 : vector<8x128xf32>
    %93 = vector.broadcast %68 : f32 to vector<8x128xf32>
    %94 = arith.addf %92, %93 : vector<8x128xf32>
    %95 = arith.mulf %60, %94 : vector<8x128xf32>
    %96 = arith.addf %46, %95 : vector<8x128xf32>
    %97 = vector.broadcast %69 : f32 to vector<8x128xf32>
    %98 = arith.mulf %97, %1 : vector<8x128xf32>
    %99 = vector.broadcast %70 : f32 to vector<8x128xf32>
    %100 = arith.mulf %99, %3 : vector<8x128xf32>
    %101 = arith.addf %98, %100 : vector<8x128xf32>
    %102 = vector.broadcast %71 : f32 to vector<8x128xf32>
    %103 = arith.mulf %102, %5 : vector<8x128xf32>
    %104 = arith.addf %101, %103 : vector<8x128xf32>
    %105 = vector.broadcast %72 : f32 to vector<8x128xf32>
    %106 = arith.addf %104, %105 : vector<8x128xf32>
    %107 = arith.mulf %60, %106 : vector<8x128xf32>
    %108 = arith.addf %58, %107 : vector<8x128xf32>
    %c2_20 = arith.constant 2 : index
    %c0_21 = arith.constant 0 : index
    %c0_22 = arith.constant 0 : index
    %109 = vector.load %arg2[%c2_20, %c0_21, %c0_22] : memref<5x8x128xf32, #tpu.memory_space<vmem>>, vector<1x8x128xf32>
    %110 = vector.shape_cast %109 : vector<1x8x128xf32> to vector<8x128xf32>
    %c24 = arith.constant 24 : index
    %111 = memref.load %arg1[%c24] : memref<120xf32, #tpu.memory_space<smem>>
    %c25 = arith.constant 25 : index
    %112 = memref.load %arg1[%c25] : memref<120xf32, #tpu.memory_space<smem>>
    %c26 = arith.constant 26 : index
    %113 = memref.load %arg1[%c26] : memref<120xf32, #tpu.memory_space<smem>>
    %c27 = arith.constant 27 : index
    %114 = memref.load %arg1[%c27] : memref<120xf32, #tpu.memory_space<smem>>
    %c28 = arith.constant 28 : index
    %115 = memref.load %arg1[%c28] : memref<120xf32, #tpu.memory_space<smem>>
    %c29 = arith.constant 29 : index
    %116 = memref.load %arg1[%c29] : memref<120xf32, #tpu.memory_space<smem>>
    %c30 = arith.constant 30 : index
    %117 = memref.load %arg1[%c30] : memref<120xf32, #tpu.memory_space<smem>>
    %c31 = arith.constant 31 : index
    %118 = memref.load %arg1[%c31] : memref<120xf32, #tpu.memory_space<smem>>
    %c32 = arith.constant 32 : index
    %119 = memref.load %arg1[%c32] : memref<120xf32, #tpu.memory_space<smem>>
    %c33 = arith.constant 33 : index
    %120 = memref.load %arg1[%c33] : memref<120xf32, #tpu.memory_space<smem>>
    %c34 = arith.constant 34 : index
    %121 = memref.load %arg1[%c34] : memref<120xf32, #tpu.memory_space<smem>>
    %c35 = arith.constant 35 : index
    %122 = memref.load %arg1[%c35] : memref<120xf32, #tpu.memory_space<smem>>
    %123 = vector.broadcast %111 : f32 to vector<8x128xf32>
    %124 = arith.mulf %123, %1 : vector<8x128xf32>
    %125 = vector.broadcast %112 : f32 to vector<8x128xf32>
    %126 = arith.mulf %125, %3 : vector<8x128xf32>
    %127 = arith.addf %124, %126 : vector<8x128xf32>
    %128 = vector.broadcast %113 : f32 to vector<8x128xf32>
    %129 = arith.mulf %128, %5 : vector<8x128xf32>
    %130 = arith.addf %127, %129 : vector<8x128xf32>
    %131 = vector.broadcast %114 : f32 to vector<8x128xf32>
    %132 = arith.addf %130, %131 : vector<8x128xf32>
    %133 = arith.mulf %110, %132 : vector<8x128xf32>
    %134 = arith.addf %84, %133 : vector<8x128xf32>
    %135 = vector.broadcast %115 : f32 to vector<8x128xf32>
    %136 = arith.mulf %135, %1 : vector<8x128xf32>
    %137 = vector.broadcast %116 : f32 to vector<8x128xf32>
    %138 = arith.mulf %137, %3 : vector<8x128xf32>
    %139 = arith.addf %136, %138 : vector<8x128xf32>
    %140 = vector.broadcast %117 : f32 to vector<8x128xf32>
    %141 = arith.mulf %140, %5 : vector<8x128xf32>
    %142 = arith.addf %139, %141 : vector<8x128xf32>
    %143 = vector.broadcast %118 : f32 to vector<8x128xf32>
    %144 = arith.addf %142, %143 : vector<8x128xf32>
    %145 = arith.mulf %110, %144 : vector<8x128xf32>
    %146 = arith.addf %96, %145 : vector<8x128xf32>
    %147 = vector.broadcast %119 : f32 to vector<8x128xf32>
    %148 = arith.mulf %147, %1 : vector<8x128xf32>
    %149 = vector.broadcast %120 : f32 to vector<8x128xf32>
    %150 = arith.mulf %149, %3 : vector<8x128xf32>
    %151 = arith.addf %148, %150 : vector<8x128xf32>
    %152 = vector.broadcast %121 : f32 to vector<8x128xf32>
    %153 = arith.mulf %152, %5 : vector<8x128xf32>
    %154 = arith.addf %151, %153 : vector<8x128xf32>
    %155 = vector.broadcast %122 : f32 to vector<8x128xf32>
    %156 = arith.addf %154, %155 : vector<8x128xf32>
    %157 = arith.mulf %110, %156 : vector<8x128xf32>
    %158 = arith.addf %108, %157 : vector<8x128xf32>
    %c3_23 = arith.constant 3 : index
    %c0_24 = arith.constant 0 : index
    %c0_25 = arith.constant 0 : index
    %159 = vector.load %arg2[%c3_23, %c0_24, %c0_25] : memref<5x8x128xf32, #tpu.memory_space<vmem>>, vector<1x8x128xf32>
    %160 = vector.shape_cast %159 : vector<1x8x128xf32> to vector<8x128xf32>
    %c36 = arith.constant 36 : index
    %161 = memref.load %arg1[%c36] : memref<120xf32, #tpu.memory_space<smem>>
    %c37 = arith.constant 37 : index
    %162 = memref.load %arg1[%c37] : memref<120xf32, #tpu.memory_space<smem>>
    %c38 = arith.constant 38 : index
    %163 = memref.load %arg1[%c38] : memref<120xf32, #tpu.memory_space<smem>>
    %c39 = arith.constant 39 : index
    %164 = memref.load %arg1[%c39] : memref<120xf32, #tpu.memory_space<smem>>
    %c40 = arith.constant 40 : index
    %165 = memref.load %arg1[%c40] : memref<120xf32, #tpu.memory_space<smem>>
    %c41 = arith.constant 41 : index
    %166 = memref.load %arg1[%c41] : memref<120xf32, #tpu.memory_space<smem>>
    %c42 = arith.constant 42 : index
    %167 = memref.load %arg1[%c42] : memref<120xf32, #tpu.memory_space<smem>>
    %c43 = arith.constant 43 : index
    %168 = memref.load %arg1[%c43] : memref<120xf32, #tpu.memory_space<smem>>
    %c44 = arith.constant 44 : index
    %169 = memref.load %arg1[%c44] : memref<120xf32, #tpu.memory_space<smem>>
    %c45 = arith.constant 45 : index
    %170 = memref.load %arg1[%c45] : memref<120xf32, #tpu.memory_space<smem>>
    %c46 = arith.constant 46 : index
    %171 = memref.load %arg1[%c46] : memref<120xf32, #tpu.memory_space<smem>>
    %c47 = arith.constant 47 : index
    %172 = memref.load %arg1[%c47] : memref<120xf32, #tpu.memory_space<smem>>
    %173 = vector.broadcast %161 : f32 to vector<8x128xf32>
    %174 = arith.mulf %173, %1 : vector<8x128xf32>
    %175 = vector.broadcast %162 : f32 to vector<8x128xf32>
    %176 = arith.mulf %175, %3 : vector<8x128xf32>
    %177 = arith.addf %174, %176 : vector<8x128xf32>
    %178 = vector.broadcast %163 : f32 to vector<8x128xf32>
    %179 = arith.mulf %178, %5 : vector<8x128xf32>
    %180 = arith.addf %177, %179 : vector<8x128xf32>
    %181 = vector.broadcast %164 : f32 to vector<8x128xf32>
    %182 = arith.addf %180, %181 : vector<8x128xf32>
    %183 = arith.mulf %160, %182 : vector<8x128xf32>
    %184 = arith.addf %134, %183 : vector<8x128xf32>
    %185 = vector.broadcast %165 : f32 to vector<8x128xf32>
    %186 = arith.mulf %185, %1 : vector<8x128xf32>
    %187 = vector.broadcast %166 : f32 to vector<8x128xf32>
    %188 = arith.mulf %187, %3 : vector<8x128xf32>
    %189 = arith.addf %186, %188 : vector<8x128xf32>
    %190 = vector.broadcast %167 : f32 to vector<8x128xf32>
    %191 = arith.mulf %190, %5 : vector<8x128xf32>
    %192 = arith.addf %189, %191 : vector<8x128xf32>
    %193 = vector.broadcast %168 : f32 to vector<8x128xf32>
    %194 = arith.addf %192, %193 : vector<8x128xf32>
    %195 = arith.mulf %160, %194 : vector<8x128xf32>
    %196 = arith.addf %146, %195 : vector<8x128xf32>
    %197 = vector.broadcast %169 : f32 to vector<8x128xf32>
    %198 = arith.mulf %197, %1 : vector<8x128xf32>
    %199 = vector.broadcast %170 : f32 to vector<8x128xf32>
    %200 = arith.mulf %199, %3 : vector<8x128xf32>
    %201 = arith.addf %198, %200 : vector<8x128xf32>
    %202 = vector.broadcast %171 : f32 to vector<8x128xf32>
    %203 = arith.mulf %202, %5 : vector<8x128xf32>
    %204 = arith.addf %201, %203 : vector<8x128xf32>
    %205 = vector.broadcast %172 : f32 to vector<8x128xf32>
    %206 = arith.addf %204, %205 : vector<8x128xf32>
    %207 = arith.mulf %160, %206 : vector<8x128xf32>
    %208 = arith.addf %158, %207 : vector<8x128xf32>
    %c4_26 = arith.constant 4 : index
    %c0_27 = arith.constant 0 : index
    %c0_28 = arith.constant 0 : index
    %209 = vector.load %arg2[%c4_26, %c0_27, %c0_28] : memref<5x8x128xf32, #tpu.memory_space<vmem>>, vector<1x8x128xf32>
    %210 = vector.shape_cast %209 : vector<1x8x128xf32> to vector<8x128xf32>
    %c48 = arith.constant 48 : index
    %211 = memref.load %arg1[%c48] : memref<120xf32, #tpu.memory_space<smem>>
    %c49 = arith.constant 49 : index
    %212 = memref.load %arg1[%c49] : memref<120xf32, #tpu.memory_space<smem>>
    %c50 = arith.constant 50 : index
    %213 = memref.load %arg1[%c50] : memref<120xf32, #tpu.memory_space<smem>>
    %c51 = arith.constant 51 : index
    %214 = memref.load %arg1[%c51] : memref<120xf32, #tpu.memory_space<smem>>
    %c52 = arith.constant 52 : index
    %215 = memref.load %arg1[%c52] : memref<120xf32, #tpu.memory_space<smem>>
    %c53 = arith.constant 53 : index
    %216 = memref.load %arg1[%c53] : memref<120xf32, #tpu.memory_space<smem>>
    %c54 = arith.constant 54 : index
    %217 = memref.load %arg1[%c54] : memref<120xf32, #tpu.memory_space<smem>>
    %c55 = arith.constant 55 : index
    %218 = memref.load %arg1[%c55] : memref<120xf32, #tpu.memory_space<smem>>
    %c56 = arith.constant 56 : index
    %219 = memref.load %arg1[%c56] : memref<120xf32, #tpu.memory_space<smem>>
    %c57 = arith.constant 57 : index
    %220 = memref.load %arg1[%c57] : memref<120xf32, #tpu.memory_space<smem>>
    %c58 = arith.constant 58 : index
    %221 = memref.load %arg1[%c58] : memref<120xf32, #tpu.memory_space<smem>>
    %c59 = arith.constant 59 : index
    %222 = memref.load %arg1[%c59] : memref<120xf32, #tpu.memory_space<smem>>
    %223 = vector.broadcast %211 : f32 to vector<8x128xf32>
    %224 = arith.mulf %223, %1 : vector<8x128xf32>
    %225 = vector.broadcast %212 : f32 to vector<8x128xf32>
    %226 = arith.mulf %225, %3 : vector<8x128xf32>
    %227 = arith.addf %224, %226 : vector<8x128xf32>
    %228 = vector.broadcast %213 : f32 to vector<8x128xf32>
    %229 = arith.mulf %228, %5 : vector<8x128xf32>
    %230 = arith.addf %227, %229 : vector<8x128xf32>
    %231 = vector.broadcast %214 : f32 to vector<8x128xf32>
    %232 = arith.addf %230, %231 : vector<8x128xf32>
    %233 = arith.mulf %210, %232 : vector<8x128xf32>
    %234 = arith.addf %184, %233 : vector<8x128xf32>
    %235 = vector.broadcast %215 : f32 to vector<8x128xf32>
    %236 = arith.mulf %235, %1 : vector<8x128xf32>
    %237 = vector.broadcast %216 : f32 to vector<8x128xf32>
    %238 = arith.mulf %237, %3 : vector<8x128xf32>
    %239 = arith.addf %236, %238 : vector<8x128xf32>
    %240 = vector.broadcast %217 : f32 to vector<8x128xf32>
    %241 = arith.mulf %240, %5 : vector<8x128xf32>
    %242 = arith.addf %239, %241 : vector<8x128xf32>
    %243 = vector.broadcast %218 : f32 to vector<8x128xf32>
    %244 = arith.addf %242, %243 : vector<8x128xf32>
    %245 = arith.mulf %210, %244 : vector<8x128xf32>
    %246 = arith.addf %196, %245 : vector<8x128xf32>
    %247 = vector.broadcast %219 : f32 to vector<8x128xf32>
    %248 = arith.mulf %247, %1 : vector<8x128xf32>
    %249 = vector.broadcast %220 : f32 to vector<8x128xf32>
    %250 = arith.mulf %249, %3 : vector<8x128xf32>
    %251 = arith.addf %248, %250 : vector<8x128xf32>
    %252 = vector.broadcast %221 : f32 to vector<8x128xf32>
    %253 = arith.mulf %252, %5 : vector<8x128xf32>
    %254 = arith.addf %251, %253 : vector<8x128xf32>
    %255 = vector.broadcast %222 : f32 to vector<8x128xf32>
    %256 = arith.addf %254, %255 : vector<8x128xf32>
    %257 = arith.mulf %210, %256 : vector<8x128xf32>
    %258 = arith.addf %208, %257 : vector<8x128xf32>
    %c0_29 = arith.constant 0 : index
    %c0_30 = arith.constant 0 : index
    %c0_31 = arith.constant 0 : index
    %c0_32 = arith.constant 0 : index
    %259 = vector.load %arg4[%c0_29, %c0_30, %c0_31, %c0_32] : memref<2x3x8x128xf32, #tpu.memory_space<vmem>>, vector<1x1x8x128xf32>
    %260 = vector.shape_cast %259 : vector<1x1x8x128xf32> to vector<8x128xf32>
    %261 = vector.shape_cast %234 : vector<8x128xf32> to vector<1x1x8x128xf32>
    tpu.vector_store %arg4[%c0_29, %c0_30, %c0_31, %c0_32], %261 {strides = array<i32>} : memref<2x3x8x128xf32, #tpu.memory_space<vmem>>, vector<1x1x8x128xf32>,
    %c0_33 = arith.constant 0 : index
    %c1_34 = arith.constant 1 : index
    %c0_35 = arith.constant 0 : index
    %c0_36 = arith.constant 0 : index
    %262 = vector.load %arg4[%c0_33, %c1_34, %c0_35, %c0_36] : memref<2x3x8x128xf32, #tpu.memory_space<vmem>>, vector<1x1x8x128xf32>
    %263 = vector.shape_cast %262 : vector<1x1x8x128xf32> to vector<8x128xf32>
    %264 = vector.shape_cast %246 : vector<8x128xf32> to vector<1x1x8x128xf32>
    tpu.vector_store %arg4[%c0_33, %c1_34, %c0_35, %c0_36], %264 {strides = array<i32>} : memref<2x3x8x128xf32, #tpu.memory_space<vmem>>, vector<1x1x8x128xf32>,
    %c0_37 = arith.constant 0 : index
    %c2_38 = arith.constant 2 : index
    %c0_39 = arith.constant 0 : index
    %c0_40 = arith.constant 0 : index
    %265 = vector.load %arg4[%c0_37, %c2_38, %c0_39, %c0_40] : memref<2x3x8x128xf32, #tpu.memory_space<vmem>>, vector<1x1x8x128xf32>
    %266 = vector.shape_cast %265 : vector<1x1x8x128xf32> to vector<8x128xf32>
    %267 = vector.shape_cast %258 : vector<8x128xf32> to vector<1x1x8x128xf32>
    tpu.vector_store %arg4[%c0_37, %c2_38, %c0_39, %c0_40], %267 {strides = array<i32>} : memref<2x3x8x128xf32, #tpu.memory_space<vmem>>, vector<1x1x8x128xf32>,
    %c1_41 = arith.constant 1 : index
    %c0_42 = arith.constant 0 : index
    %c0_43 = arith.constant 0 : index
    %c0_44 = arith.constant 0 : index
    %268 = vector.load %arg3[%c1_41, %c0_42, %c0_43, %c0_44] : memref<2x3x8x128xf32, #tpu.memory_space<vmem>>, vector<1x1x8x128xf32>
    %269 = vector.shape_cast %268 : vector<1x1x8x128xf32> to vector<8x128xf32>
    %c1_45 = arith.constant 1 : index
    %c1_46 = arith.constant 1 : index
    %c0_47 = arith.constant 0 : index
    %c0_48 = arith.constant 0 : index
    %270 = vector.load %arg3[%c1_45, %c1_46, %c0_47, %c0_48] : memref<2x3x8x128xf32, #tpu.memory_space<vmem>>, vector<1x1x8x128xf32>
    %271 = vector.shape_cast %270 : vector<1x1x8x128xf32> to vector<8x128xf32>
    %c1_49 = arith.constant 1 : index
    %c2_50 = arith.constant 2 : index
    %c0_51 = arith.constant 0 : index
    %c0_52 = arith.constant 0 : index
    %272 = vector.load %arg3[%c1_49, %c2_50, %c0_51, %c0_52] : memref<2x3x8x128xf32, #tpu.memory_space<vmem>>, vector<1x1x8x128xf32>
    %273 = vector.shape_cast %272 : vector<1x1x8x128xf32> to vector<8x128xf32>
    %cst_53 = arith.constant 0.000000e+00 : f32
    %274 = vector.broadcast %cst_53 : f32 to vector<8x128xf32>
    %cst_54 = arith.constant 0.000000e+00 : f32
    %275 = vector.broadcast %cst_54 : f32 to vector<8x128xf32>
    %cst_55 = arith.constant 0.000000e+00 : f32
    %276 = vector.broadcast %cst_55 : f32 to vector<8x128xf32>
    %c0_56 = arith.constant 0 : index
    %c0_57 = arith.constant 0 : index
    %c0_58 = arith.constant 0 : index
    %277 = vector.load %arg2[%c0_56, %c0_57, %c0_58] : memref<5x8x128xf32, #tpu.memory_space<vmem>>, vector<1x8x128xf32>
    %278 = vector.shape_cast %277 : vector<1x8x128xf32> to vector<8x128xf32>
    %c60 = arith.constant 60 : index
    %279 = memref.load %arg1[%c60] : memref<120xf32, #tpu.memory_space<smem>>
    %c61 = arith.constant 61 : index
    %280 = memref.load %arg1[%c61] : memref<120xf32, #tpu.memory_space<smem>>
    %c62 = arith.constant 62 : index
    %281 = memref.load %arg1[%c62] : memref<120xf32, #tpu.memory_space<smem>>
    %c63 = arith.constant 63 : index
    %282 = memref.load %arg1[%c63] : memref<120xf32, #tpu.memory_space<smem>>
    %c64 = arith.constant 64 : index
    %283 = memref.load %arg1[%c64] : memref<120xf32, #tpu.memory_space<smem>>
    %c65 = arith.constant 65 : index
    %284 = memref.load %arg1[%c65] : memref<120xf32, #tpu.memory_space<smem>>
    %c66 = arith.constant 66 : index
    %285 = memref.load %arg1[%c66] : memref<120xf32, #tpu.memory_space<smem>>
    %c67 = arith.constant 67 : index
    %286 = memref.load %arg1[%c67] : memref<120xf32, #tpu.memory_space<smem>>
    %c68 = arith.constant 68 : index
    %287 = memref.load %arg1[%c68] : memref<120xf32, #tpu.memory_space<smem>>
    %c69 = arith.constant 69 : index
    %288 = memref.load %arg1[%c69] : memref<120xf32, #tpu.memory_space<smem>>
    %c70 = arith.constant 70 : index
    %289 = memref.load %arg1[%c70] : memref<120xf32, #tpu.memory_space<smem>>
    %c71 = arith.constant 71 : index
    %290 = memref.load %arg1[%c71] : memref<120xf32, #tpu.memory_space<smem>>
    %291 = vector.broadcast %279 : f32 to vector<8x128xf32>
    %292 = arith.mulf %291, %269 : vector<8x128xf32>
    %293 = vector.broadcast %280 : f32 to vector<8x128xf32>
    %294 = arith.mulf %293, %271 : vector<8x128xf32>
    %295 = arith.addf %292, %294 : vector<8x128xf32>
    %296 = vector.broadcast %281 : f32 to vector<8x128xf32>
    %297 = arith.mulf %296, %273 : vector<8x128xf32>
    %298 = arith.addf %295, %297 : vector<8x128xf32>
    %299 = vector.broadcast %282 : f32 to vector<8x128xf32>
    %300 = arith.addf %298, %299 : vector<8x128xf32>
    %301 = arith.mulf %278, %300 : vector<8x128xf32>
    %302 = arith.addf %274, %301 : vector<8x128xf32>
    %303 = vector.broadcast %283 : f32 to vector<8x128xf32>
    %304 = arith.mulf %303, %269 : vector<8x128xf32>
    %305 = vector.broadcast %284 : f32 to vector<8x128xf32>
    %306 = arith.mulf %305, %271 : vector<8x128xf32>
    %307 = arith.addf %304, %306 : vector<8x128xf32>
    %308 = vector.broadcast %285 : f32 to vector<8x128xf32>
    %309 = arith.mulf %308, %273 : vector<8x128xf32>
    %310 = arith.addf %307, %309 : vector<8x128xf32>
    %311 = vector.broadcast %286 : f32 to vector<8x128xf32>
    %312 = arith.addf %310, %311 : vector<8x128xf32>
    %313 = arith.mulf %278, %312 : vector<8x128xf32>
    %314 = arith.addf %275, %313 : vector<8x128xf32>
    %315 = vector.broadcast %287 : f32 to vector<8x128xf32>
    %316 = arith.mulf %315, %269 : vector<8x128xf32>
    %317 = vector.broadcast %288 : f32 to vector<8x128xf32>
    %318 = arith.mulf %317, %271 : vector<8x128xf32>
    %319 = arith.addf %316, %318 : vector<8x128xf32>
    %320 = vector.broadcast %289 : f32 to vector<8x128xf32>
    %321 = arith.mulf %320, %273 : vector<8x128xf32>
    %322 = arith.addf %319, %321 : vector<8x128xf32>
    %323 = vector.broadcast %290 : f32 to vector<8x128xf32>
    %324 = arith.addf %322, %323 : vector<8x128xf32>
    %325 = arith.mulf %278, %324 : vector<8x128xf32>
    %326 = arith.addf %276, %325 : vector<8x128xf32>
    %c1_59 = arith.constant 1 : index
    %c0_60 = arith.constant 0 : index
    %c0_61 = arith.constant 0 : index
    %327 = vector.load %arg2[%c1_59, %c0_60, %c0_61] : memref<5x8x128xf32, #tpu.memory_space<vmem>>, vector<1x8x128xf32>
    %328 = vector.shape_cast %327 : vector<1x8x128xf32> to vector<8x128xf32>
    %c72 = arith.constant 72 : index
    %329 = memref.load %arg1[%c72] : memref<120xf32, #tpu.memory_space<smem>>
    %c73 = arith.constant 73 : index
    %330 = memref.load %arg1[%c73] : memref<120xf32, #tpu.memory_space<smem>>
    %c74 = arith.constant 74 : index
    %331 = memref.load %arg1[%c74] : memref<120xf32, #tpu.memory_space<smem>>
    %c75 = arith.constant 75 : index
    %332 = memref.load %arg1[%c75] : memref<120xf32, #tpu.memory_space<smem>>
    %c76 = arith.constant 76 : index
    %333 = memref.load %arg1[%c76] : memref<120xf32, #tpu.memory_space<smem>>
    %c77 = arith.constant 77 : index
    %334 = memref.load %arg1[%c77] : memref<120xf32, #tpu.memory_space<smem>>
    %c78 = arith.constant 78 : index
    %335 = memref.load %arg1[%c78] : memref<120xf32, #tpu.memory_space<smem>>
    %c79 = arith.constant 79 : index
    %336 = memref.load %arg1[%c79] : memref<120xf32, #tpu.memory_space<smem>>
    %c80 = arith.constant 80 : index
    %337 = memref.load %arg1[%c80] : memref<120xf32, #tpu.memory_space<smem>>
    %c81 = arith.constant 81 : index
    %338 = memref.load %arg1[%c81] : memref<120xf32, #tpu.memory_space<smem>>
    %c82 = arith.constant 82 : index
    %339 = memref.load %arg1[%c82] : memref<120xf32, #tpu.memory_space<smem>>
    %c83 = arith.constant 83 : index
    %340 = memref.load %arg1[%c83] : memref<120xf32, #tpu.memory_space<smem>>
    %341 = vector.broadcast %329 : f32 to vector<8x128xf32>
    %342 = arith.mulf %341, %269 : vector<8x128xf32>
    %343 = vector.broadcast %330 : f32 to vector<8x128xf32>
    %344 = arith.mulf %343, %271 : vector<8x128xf32>
    %345 = arith.addf %342, %344 : vector<8x128xf32>
    %346 = vector.broadcast %331 : f32 to vector<8x128xf32>
    %347 = arith.mulf %346, %273 : vector<8x128xf32>
    %348 = arith.addf %345, %347 : vector<8x128xf32>
    %349 = vector.broadcast %332 : f32 to vector<8x128xf32>
    %350 = arith.addf %348, %349 : vector<8x128xf32>
    %351 = arith.mulf %328, %350 : vector<8x128xf32>
    %352 = arith.addf %302, %351 : vector<8x128xf32>
    %353 = vector.broadcast %333 : f32 to vector<8x128xf32>
    %354 = arith.mulf %353, %269 : vector<8x128xf32>
    %355 = vector.broadcast %334 : f32 to vector<8x128xf32>
    %356 = arith.mulf %355, %271 : vector<8x128xf32>
    %357 = arith.addf %354, %356 : vector<8x128xf32>
    %358 = vector.broadcast %335 : f32 to vector<8x128xf32>
    %359 = arith.mulf %358, %273 : vector<8x128xf32>
    %360 = arith.addf %357, %359 : vector<8x128xf32>
    %361 = vector.broadcast %336 : f32 to vector<8x128xf32>
    %362 = arith.addf %360, %361 : vector<8x128xf32>
    %363 = arith.mulf %328, %362 : vector<8x128xf32>
    %364 = arith.addf %314, %363 : vector<8x128xf32>
    %365 = vector.broadcast %337 : f32 to vector<8x128xf32>
    %366 = arith.mulf %365, %269 : vector<8x128xf32>
    %367 = vector.broadcast %338 : f32 to vector<8x128xf32>
    %368 = arith.mulf %367, %271 : vector<8x128xf32>
    %369 = arith.addf %366, %368 : vector<8x128xf32>
    %370 = vector.broadcast %339 : f32 to vector<8x128xf32>
    %371 = arith.mulf %370, %273 : vector<8x128xf32>
    %372 = arith.addf %369, %371 : vector<8x128xf32>
    %373 = vector.broadcast %340 : f32 to vector<8x128xf32>
    %374 = arith.addf %372, %373 : vector<8x128xf32>
    %375 = arith.mulf %328, %374 : vector<8x128xf32>
    %376 = arith.addf %326, %375 : vector<8x128xf32>
    %c2_62 = arith.constant 2 : index
    %c0_63 = arith.constant 0 : index
    %c0_64 = arith.constant 0 : index
    %377 = vector.load %arg2[%c2_62, %c0_63, %c0_64] : memref<5x8x128xf32, #tpu.memory_space<vmem>>, vector<1x8x128xf32>
    %378 = vector.shape_cast %377 : vector<1x8x128xf32> to vector<8x128xf32>
    %c84 = arith.constant 84 : index
    %379 = memref.load %arg1[%c84] : memref<120xf32, #tpu.memory_space<smem>>
    %c85 = arith.constant 85 : index
    %380 = memref.load %arg1[%c85] : memref<120xf32, #tpu.memory_space<smem>>
    %c86 = arith.constant 86 : index
    %381 = memref.load %arg1[%c86] : memref<120xf32, #tpu.memory_space<smem>>
    %c87 = arith.constant 87 : index
    %382 = memref.load %arg1[%c87] : memref<120xf32, #tpu.memory_space<smem>>
    %c88 = arith.constant 88 : index
    %383 = memref.load %arg1[%c88] : memref<120xf32, #tpu.memory_space<smem>>
    %c89 = arith.constant 89 : index
    %384 = memref.load %arg1[%c89] : memref<120xf32, #tpu.memory_space<smem>>
    %c90 = arith.constant 90 : index
    %385 = memref.load %arg1[%c90] : memref<120xf32, #tpu.memory_space<smem>>
    %c91 = arith.constant 91 : index
    %386 = memref.load %arg1[%c91] : memref<120xf32, #tpu.memory_space<smem>>
    %c92 = arith.constant 92 : index
    %387 = memref.load %arg1[%c92] : memref<120xf32, #tpu.memory_space<smem>>
    %c93 = arith.constant 93 : index
    %388 = memref.load %arg1[%c93] : memref<120xf32, #tpu.memory_space<smem>>
    %c94 = arith.constant 94 : index
    %389 = memref.load %arg1[%c94] : memref<120xf32, #tpu.memory_space<smem>>
    %c95 = arith.constant 95 : index
    %390 = memref.load %arg1[%c95] : memref<120xf32, #tpu.memory_space<smem>>
    %391 = vector.broadcast %379 : f32 to vector<8x128xf32>
    %392 = arith.mulf %391, %269 : vector<8x128xf32>
    %393 = vector.broadcast %380 : f32 to vector<8x128xf32>
    %394 = arith.mulf %393, %271 : vector<8x128xf32>
    %395 = arith.addf %392, %394 : vector<8x128xf32>
    %396 = vector.broadcast %381 : f32 to vector<8x128xf32>
    %397 = arith.mulf %396, %273 : vector<8x128xf32>
    %398 = arith.addf %395, %397 : vector<8x128xf32>
    %399 = vector.broadcast %382 : f32 to vector<8x128xf32>
    %400 = arith.addf %398, %399 : vector<8x128xf32>
    %401 = arith.mulf %378, %400 : vector<8x128xf32>
    %402 = arith.addf %352, %401 : vector<8x128xf32>
    %403 = vector.broadcast %383 : f32 to vector<8x128xf32>
    %404 = arith.mulf %403, %269 : vector<8x128xf32>
    %405 = vector.broadcast %384 : f32 to vector<8x128xf32>
    %406 = arith.mulf %405, %271 : vector<8x128xf32>
    %407 = arith.addf %404, %406 : vector<8x128xf32>
    %408 = vector.broadcast %385 : f32 to vector<8x128xf32>
    %409 = arith.mulf %408, %273 : vector<8x128xf32>
    %410 = arith.addf %407, %409 : vector<8x128xf32>
    %411 = vector.broadcast %386 : f32 to vector<8x128xf32>
    %412 = arith.addf %410, %411 : vector<8x128xf32>
    %413 = arith.mulf %378, %412 : vector<8x128xf32>
    %414 = arith.addf %364, %413 : vector<8x128xf32>
    %415 = vector.broadcast %387 : f32 to vector<8x128xf32>
    %416 = arith.mulf %415, %269 : vector<8x128xf32>
    %417 = vector.broadcast %388 : f32 to vector<8x128xf32>
    %418 = arith.mulf %417, %271 : vector<8x128xf32>
    %419 = arith.addf %416, %418 : vector<8x128xf32>
    %420 = vector.broadcast %389 : f32 to vector<8x128xf32>
    %421 = arith.mulf %420, %273 : vector<8x128xf32>
    %422 = arith.addf %419, %421 : vector<8x128xf32>
    %423 = vector.broadcast %390 : f32 to vector<8x128xf32>
    %424 = arith.addf %422, %423 : vector<8x128xf32>
    %425 = arith.mulf %378, %424 : vector<8x128xf32>
    %426 = arith.addf %376, %425 : vector<8x128xf32>
    %c3_65 = arith.constant 3 : index
    %c0_66 = arith.constant 0 : index
    %c0_67 = arith.constant 0 : index
    %427 = vector.load %arg2[%c3_65, %c0_66, %c0_67] : memref<5x8x128xf32, #tpu.memory_space<vmem>>, vector<1x8x128xf32>
    %428 = vector.shape_cast %427 : vector<1x8x128xf32> to vector<8x128xf32>
    %c96 = arith.constant 96 : index
    %429 = memref.load %arg1[%c96] : memref<120xf32, #tpu.memory_space<smem>>
    %c97 = arith.constant 97 : index
    %430 = memref.load %arg1[%c97] : memref<120xf32, #tpu.memory_space<smem>>
    %c98 = arith.constant 98 : index
    %431 = memref.load %arg1[%c98] : memref<120xf32, #tpu.memory_space<smem>>
    %c99 = arith.constant 99 : index
    %432 = memref.load %arg1[%c99] : memref<120xf32, #tpu.memory_space<smem>>
    %c100 = arith.constant 100 : index
    %433 = memref.load %arg1[%c100] : memref<120xf32, #tpu.memory_space<smem>>
    %c101 = arith.constant 101 : index
    %434 = memref.load %arg1[%c101] : memref<120xf32, #tpu.memory_space<smem>>
    %c102 = arith.constant 102 : index
    %435 = memref.load %arg1[%c102] : memref<120xf32, #tpu.memory_space<smem>>
    %c103 = arith.constant 103 : index
    %436 = memref.load %arg1[%c103] : memref<120xf32, #tpu.memory_space<smem>>
    %c104 = arith.constant 104 : index
    %437 = memref.load %arg1[%c104] : memref<120xf32, #tpu.memory_space<smem>>
    %c105 = arith.constant 105 : index
    %438 = memref.load %arg1[%c105] : memref<120xf32, #tpu.memory_space<smem>>
    %c106 = arith.constant 106 : index
    %439 = memref.load %arg1[%c106] : memref<120xf32, #tpu.memory_space<smem>>
    %c107 = arith.constant 107 : index
    %440 = memref.load %arg1[%c107] : memref<120xf32, #tpu.memory_space<smem>>
    %441 = vector.broadcast %429 : f32 to vector<8x128xf32>
    %442 = arith.mulf %441, %269 : vector<8x128xf32>
    %443 = vector.broadcast %430 : f32 to vector<8x128xf32>
    %444 = arith.mulf %443, %271 : vector<8x128xf32>
    %445 = arith.addf %442, %444 : vector<8x128xf32>
    %446 = vector.broadcast %431 : f32 to vector<8x128xf32>
    %447 = arith.mulf %446, %273 : vector<8x128xf32>
    %448 = arith.addf %445, %447 : vector<8x128xf32>
    %449 = vector.broadcast %432 : f32 to vector<8x128xf32>
    %450 = arith.addf %448, %449 : vector<8x128xf32>
    %451 = arith.mulf %428, %450 : vector<8x128xf32>
    %452 = arith.addf %402, %451 : vector<8x128xf32>
    %453 = vector.broadcast %433 : f32 to vector<8x128xf32>
    %454 = arith.mulf %453, %269 : vector<8x128xf32>
    %455 = vector.broadcast %434 : f32 to vector<8x128xf32>
    %456 = arith.mulf %455, %271 : vector<8x128xf32>
    %457 = arith.addf %454, %456 : vector<8x128xf32>
    %458 = vector.broadcast %435 : f32 to vector<8x128xf32>
    %459 = arith.mulf %458, %273 : vector<8x128xf32>
    %460 = arith.addf %457, %459 : vector<8x128xf32>
    %461 = vector.broadcast %436 : f32 to vector<8x128xf32>
    %462 = arith.addf %460, %461 : vector<8x128xf32>
    %463 = arith.mulf %428, %462 : vector<8x128xf32>
    %464 = arith.addf %414, %463 : vector<8x128xf32>
    %465 = vector.broadcast %437 : f32 to vector<8x128xf32>
    %466 = arith.mulf %465, %269 : vector<8x128xf32>
    %467 = vector.broadcast %438 : f32 to vector<8x128xf32>
    %468 = arith.mulf %467, %271 : vector<8x128xf32>
    %469 = arith.addf %466, %468 : vector<8x128xf32>
    %470 = vector.broadcast %439 : f32 to vector<8x128xf32>
    %471 = arith.mulf %470, %273 : vector<8x128xf32>
    %472 = arith.addf %469, %471 : vector<8x128xf32>
    %473 = vector.broadcast %440 : f32 to vector<8x128xf32>
    %474 = arith.addf %472, %473 : vector<8x128xf32>
    %475 = arith.mulf %428, %474 : vector<8x128xf32>
    %476 = arith.addf %426, %475 : vector<8x128xf32>
    %c4_68 = arith.constant 4 : index
    %c0_69 = arith.constant 0 : index
    %c0_70 = arith.constant 0 : index
    %477 = vector.load %arg2[%c4_68, %c0_69, %c0_70] : memref<5x8x128xf32, #tpu.memory_space<vmem>>, vector<1x8x128xf32>
    %478 = vector.shape_cast %477 : vector<1x8x128xf32> to vector<8x128xf32>
    %c108 = arith.constant 108 : index
    %479 = memref.load %arg1[%c108] : memref<120xf32, #tpu.memory_space<smem>>
    %c109 = arith.constant 109 : index
    %480 = memref.load %arg1[%c109] : memref<120xf32, #tpu.memory_space<smem>>
    %c110 = arith.constant 110 : index
    %481 = memref.load %arg1[%c110] : memref<120xf32, #tpu.memory_space<smem>>
    %c111 = arith.constant 111 : index
    %482 = memref.load %arg1[%c111] : memref<120xf32, #tpu.memory_space<smem>>
    %c112 = arith.constant 112 : index
    %483 = memref.load %arg1[%c112] : memref<120xf32, #tpu.memory_space<smem>>
    %c113 = arith.constant 113 : index
    %484 = memref.load %arg1[%c113] : memref<120xf32, #tpu.memory_space<smem>>
    %c114 = arith.constant 114 : index
    %485 = memref.load %arg1[%c114] : memref<120xf32, #tpu.memory_space<smem>>
    %c115 = arith.constant 115 : index
    %486 = memref.load %arg1[%c115] : memref<120xf32, #tpu.memory_space<smem>>
    %c116 = arith.constant 116 : index
    %487 = memref.load %arg1[%c116] : memref<120xf32, #tpu.memory_space<smem>>
    %c117 = arith.constant 117 : index
    %488 = memref.load %arg1[%c117] : memref<120xf32, #tpu.memory_space<smem>>
    %c118 = arith.constant 118 : index
    %489 = memref.load %arg1[%c118] : memref<120xf32, #tpu.memory_space<smem>>
    %c119 = arith.constant 119 : index
    %490 = memref.load %arg1[%c119] : memref<120xf32, #tpu.memory_space<smem>>
    %491 = vector.broadcast %479 : f32 to vector<8x128xf32>
    %492 = arith.mulf %491, %269 : vector<8x128xf32>
    %493 = vector.broadcast %480 : f32 to vector<8x128xf32>
    %494 = arith.mulf %493, %271 : vector<8x128xf32>
    %495 = arith.addf %492, %494 : vector<8x128xf32>
    %496 = vector.broadcast %481 : f32 to vector<8x128xf32>
    %497 = arith.mulf %496, %273 : vector<8x128xf32>
    %498 = arith.addf %495, %497 : vector<8x128xf32>
    %499 = vector.broadcast %482 : f32 to vector<8x128xf32>
    %500 = arith.addf %498, %499 : vector<8x128xf32>
    %501 = arith.mulf %478, %500 : vector<8x128xf32>
    %502 = arith.addf %452, %501 : vector<8x128xf32>
    %503 = vector.broadcast %483 : f32 to vector<8x128xf32>
    %504 = arith.mulf %503, %269 : vector<8x128xf32>
    %505 = vector.broadcast %484 : f32 to vector<8x128xf32>
    %506 = arith.mulf %505, %271 : vector<8x128xf32>
    %507 = arith.addf %504, %506 : vector<8x128xf32>
    %508 = vector.broadcast %485 : f32 to vector<8x128xf32>
    %509 = arith.mulf %508, %273 : vector<8x128xf32>
    %510 = arith.addf %507, %509 : vector<8x128xf32>
    %511 = vector.broadcast %486 : f32 to vector<8x128xf32>
    %512 = arith.addf %510, %511 : vector<8x128xf32>
    %513 = arith.mulf %478, %512 : vector<8x128xf32>
    %514 = arith.addf %464, %513 : vector<8x128xf32>
    %515 = vector.broadcast %487 : f32 to vector<8x128xf32>
    %516 = arith.mulf %515, %269 : vector<8x128xf32>
    %517 = vector.broadcast %488 : f32 to vector<8x128xf32>
    %518 = arith.mulf %517, %271 : vector<8x128xf32>
    %519 = arith.addf %516, %518 : vector<8x128xf32>
    %520 = vector.broadcast %489 : f32 to vector<8x128xf32>
    %521 = arith.mulf %520, %273 : vector<8x128xf32>
    %522 = arith.addf %519, %521 : vector<8x128xf32>
    %523 = vector.broadcast %490 : f32 to vector<8x128xf32>
    %524 = arith.addf %522, %523 : vector<8x128xf32>
    %525 = arith.mulf %478, %524 : vector<8x128xf32>
    %526 = arith.addf %476, %525 : vector<8x128xf32>
    %c1_71 = arith.constant 1 : index
    %c0_72 = arith.constant 0 : index
    %c0_73 = arith.constant 0 : index
    %c0_74 = arith.constant 0 : index
    %527 = vector.load %arg4[%c1_71, %c0_72, %c0_73, %c0_74] : memref<2x3x8x128xf32, #tpu.memory_space<vmem>>, vector<1x1x8x128xf32>
    %528 = vector.shape_cast %527 : vector<1x1x8x128xf32> to vector<8x128xf32>
    %529 = vector.shape_cast %502 : vector<8x128xf32> to vector<1x1x8x128xf32>
    tpu.vector_store %arg4[%c1_71, %c0_72, %c0_73, %c0_74], %529 {strides = array<i32>} : memref<2x3x8x128xf32, #tpu.memory_space<vmem>>, vector<1x1x8x128xf32>,
    %c1_75 = arith.constant 1 : index
    %c1_76 = arith.constant 1 : index
    %c0_77 = arith.constant 0 : index
    %c0_78 = arith.constant 0 : index
    %530 = vector.load %arg4[%c1_75, %c1_76, %c0_77, %c0_78] : memref<2x3x8x128xf32, #tpu.memory_space<vmem>>, vector<1x1x8x128xf32>
    %531 = vector.shape_cast %530 : vector<1x1x8x128xf32> to vector<8x128xf32>
    %532 = vector.shape_cast %514 : vector<8x128xf32> to vector<1x1x8x128xf32>
    tpu.vector_store %arg4[%c1_75, %c1_76, %c0_77, %c0_78], %532 {strides = array<i32>} : memref<2x3x8x128xf32, #tpu.memory_space<vmem>>, vector<1x1x8x128xf32>,
    %c1_79 = arith.constant 1 : index
    %c2_80 = arith.constant 2 : index
    %c0_81 = arith.constant 0 : index
    %c0_82 = arith.constant 0 : index
    %533 = vector.load %arg4[%c1_79, %c2_80, %c0_81, %c0_82] : memref<2x3x8x128xf32, #tpu.memory_space<vmem>>, vector<1x1x8x128xf32>
    %534 = vector.shape_cast %533 : vector<1x1x8x128xf32> to vector<8x128xf32>
    %535 = vector.shape_cast %526 : vector<8x128xf32> to vector<1x1x8x128xf32>
    tpu.vector_store %arg4[%c1_79, %c2_80, %c0_81, %c0_82], %535 {strides = array<i32>} : memref<2x3x8x128xf32, #tpu.memory_space<vmem>>, vector<1x1x8x128xf32>,
    return
  }
  func.func @transform_0(%arg0: i32, %arg1: memref<120xf32, #tpu.memory_space<smem>>) -> (i32, i32, i32) {
    %c0_i32 = arith.constant 0 : i32
    %c0_i32_0 = arith.constant 0 : i32
    %c0_i32_1 = arith.constant 0 : i32
    return %c0_i32, %arg0, %c0_i32_0 : i32, i32, i32
  }
  func.func @transform_1(%arg0: i32, %arg1: memref<120xf32, #tpu.memory_space<smem>>) -> (i32, i32, i32, i32) {
    %c0_i32 = arith.constant 0 : i32
    %c0_i32_0 = arith.constant 0 : i32
    %c0_i32_1 = arith.constant 0 : i32
    %c0_i32_2 = arith.constant 0 : i32
    return %c0_i32, %c0_i32_0, %arg0, %c0_i32_1 : i32, i32, i32, i32
  }
  func.func @transform_2(%arg0: i32, %arg1: memref<120xf32, #tpu.memory_space<smem>>) -> (i32, i32, i32, i32) {
    %c0_i32 = arith.constant 0 : i32
    %c0_i32_0 = arith.constant 0 : i32
    %c0_i32_1 = arith.constant 0 : i32
    %c0_i32_2 = arith.constant 0 : i32
    return %c0_i32, %c0_i32_0, %arg0, %c0_i32_1 : i32, i32, i32, i32
  }
}

</mosaic_0001>

<bundles_post_ra>
// kernel: _lambda_.2
= control target key start
LH: loop header
LB: loop body
LE: loop exit
PB: predicated region body
PF: predicated region fallthrough
CT: control target
= control target key end

     0   :  { %s3766_s0 = inlined_call_operand.vmem [shape: f32[2,84], index: 0, kind: input, shape index: {}]   ;;  %s3767_s1 = inlined_call_operand.hbm [shape: f32[84,48,128], index: 1, kind: input, shape index: {}]   ;;  %s3768_s2 = inlined_call_operand.hbm [shape: f32[48,128], index: 2, kind: input, shape index: {}]   ;;  %s3769_s3 = inlined_call_operand.vmem [shape: f32[2,48,128], index: 3, kind: output, shape index: {0}]   ;;  %s3770_s4 = inlined_call_operand.vmem [shape: f32[2,48,128], index: 4, kind: output, shape index: {1}]  }
   0x1   :  { %s10_s17 = sshll.u32 %s3766_s0, 4  ;;  %s11_s17 = int_to_ptr.vmem [resolvable:$true] %s10_s17 }
   0x2   :  { %s2711_s18 = scalar_lea.vmem %s11_s17, 32  ;;  %p2716_p1 = scmp.lt.s32.totalorder %s11_s17, %s11_s17 }
   0x3   :  { %p2712_p0 = scmp.ne.s32.totalorder %s11_s17, %s2711_s18  ;;  %p2717_p2 = scmp.lt.s32.totalorder %s2711_s18, %s2711_s18 }
   0x5   :  { %p2718_p3 = por %p2717_p2, %p2716_p1 }
   0x7   :  { %p2719_p4 = pnand %p2718_p3, %p2712_p0 }
   0x9   :  { %2722 = shalt.err (!%p2719_p4)  }
   0xa   :  { %s2793_s19 = smov [#allocation3]  }
   0xb   :  { %13 = dma.vmem_to_smem %s11_s17, 32, %s2793_s19, [#allocation2] }
   0xc   :  { %2767 = dma.done.wait [#allocation2], 32 }
   0xd   :  { %2768 = vsyncadd [#allocation2], 4294967264 }
   0xe   :  { %15 = sfence }
   0xf   :  { %16 = vsyncpa [#allocation5], 0 }
  0x10   :  { %18 = vsyncpa [#allocation5 + $0x1], 0 }
  0x11   :  { %19 = vsyncpa [#allocation7], 0 }
  0x12   :  { %21 = vsyncpa [#allocation7 + $0x1], 0  ;;  %s2831_s20 = smov 0   ;;  %s2833_s0 = smov 0  }
  0x13   :  { %s2835_s21 = smov 0   ;;  %s2837_s22 = smov 0  }
  0x14 LB: > { %s2850_s23 = sadd.s32 4294967295, %s2791_s22   ;;  %s2853_s24 = sadd.s32 1, %s2791_s22   ;;  %s2791_s22 = sphi %s2837_s22, %s3779_s22   ;;  %s2787_s21 = sphi %s2835_s21, %s3778_s21   ;;  %s2783_s0 = sphi %s2833_s0, %s3777_s0   ;;  %s2779_s20 = sphi %s2831_s20, %s3776_s20  }
  0x15   : > { %s31_s25 = ssub.s32 %s2791_s22, %s2853_s24  ;;  %s34_s26 = sadd.s32 1, %s2787_s21 }
  0x16   : > { %p32_p5 = scmp.eq.s32.totalorder %s31_s25, 0  ;;  %p41_p6 = scmp.ne.s32.totalorder %s2787_s21, %s2783_s0 }
  0x17   : > { %p42_p7 = scmp.eq.s32.totalorder %s2791_s22, 0  ;;  %p47_p8 = scmp.ne.s32.totalorder %s2783_s0, %s2779_s20 }
  0x18   : > { %s2863_s27 = scalar_select %p32_p5, %s2787_s21, %s34_s26  }
  0x19   : > { %p2865_p9 = por %p42_p7, %p41_p6  ;;  %p48_p10 = scmp.eq.s32.totalorder %s2850_s23, 0 }
  0x1a   : > { %p97_p11 = scmp.eq.s32.totalorder %s2850_s23, 1  ;;  %p2215_p0 = scmp.ge.s32.totalorder %s2791_s22, 2 }
  0x1b   : > { %p2871_p12 = por %p48_p10, %p47_p8 }
  0x1c   : > { %p2875_p13 = por %p97_p11, %p41_p6  ;;  %145 = sbr.rel (%p2215_p0) target bundleno = 73 (0x49), region = 16 }
  0x1e   : > { %s3773_s30 = scalar_select %p2875_p13, 1, 0 }
  0x23   : > { %s2881_s5 = sand.u32 1, %s2787_s21   ;;  %s2647_s6 = smul.u32 384, %s2791_s22 }
  0x24   : > { %s2651_s7 = smul.u32 2016, %s2881_s5  ;;  %s2794_s8 = smov 768  }
  0x25   : > { %2657 = sst [smem:[#allocation11]] (%p2865_p9), %s2794_s8  ;;  %s159_s12 = scalar_lea.hbm %s3767_s1, %s2647_s6 }
  0x26   : > { %s2656_s9 = scalar_select %p2865_p9, [#allocation0], [#allocation12] }
  0x27   : > { %s153_s14 = scalar_lea.vmem [#allocation4], %s2651_s7  ;;  %s2795_s16 = smov 384  }
  0x28   : > { %s164_s13 = sld [smem:[%s2656_s9]]   ;;  %s172_s15 = sshll.u32 %s153_s14, 4  ;;  %s173_s15 = int_to_ptr.vmem [resolvable:$true] %s172_s15 }
  0x29   : > { %2658 = sst [smem:[#allocation11 + $0x1]] (%p2865_p9), %s2795_s16  ;;  %s2796_s17 = smov 3  }
  0x2a   : > { %2659 = sst [smem:[#allocation11 + $0x2]] (%p2865_p9), %s2796_s17  ;;  %s2797_s18 = smov 128  }
  0x2b   : > { %2660 = sst [smem:[#allocation11 + $0x3]] (%p2865_p9), %s2797_s18  ;;  %s2798_s19 = smov 8  }
  0x2c   : > { %2661 = sst [smem:[#allocation11 + $0x4]] (%p2865_p9), %s2797_s18  ;;  %s150_s26 = scalar_lea.sflag [#allocation5], %s2881_s5 }
  0x2d   : > { %2662 = sst [smem:[#allocation11 + $0x5]] (%p2865_p9), %s2798_s19  ;;  %s2799_s7 = smov [#allocation10]  }
  0x2e   : > { %s2217_s20 = sshll.u32 %s164_s13, 26  ;;  %s2652_s8 = smul.u32 24, %s2881_s5 }
  0x2f   : > { %s2218_s25 = sadd.s32 134217728, %s2217_s20  ;;  %s2909_s11 = scalar_lea.hbm %s3768_s2, %s2647_s6 }
  0x30   : > { %2663 = dma.general (%p2865_p9), %s159_s12, 32256, %s173_s15, %s150_s26, %s2799_s7, [#allocation11], %s2218_s25, 0  }
  0x31   : > { %s199_s14 = scalar_lea.vmem [#allocation6], %s2652_s8  ;;  %s196_s16 = scalar_lea.sflag [#allocation7], %s2881_s5 }
  0x32   : > { %s206_s13 = sshll.u32 %s199_s14, 4  ;;  %s2723_s17 = scalar_lea.hbm %s2909_s11, 384  ;;  %s2911_s13 = int_to_ptr.vmem [resolvable:$true] %s206_s13 }
  0x33   : > { %p2724_p1 = scmp.ne.s32.totalorder %s2909_s11, %s2723_s17  ;;  %s2727_s18 = scalar_lea.hbm %s3768_s2, 768 }
  0x34   : > { %p2728_p4 = scmp.lt.u32.totalorder %s2909_s11, %s3768_s2  ;;  %p2729_p5 = scmp.lt.u32.totalorder %s2727_s18, %s2723_s17 }
  0x35   : > { %p2725_p2 = pnand %p2724_p1, %p2865_p9  ;;  %p2731_p7 = scmp.lt.u32.totalorder %s2723_s17, %s2909_s11 }
  0x36   : > { %p2730_p6 = por %p2729_p5, %p2728_p4 }
  0x37   : > { %p2726_p3 = pneg %p2725_p2 }
  0x38   : > { %p2732_p8 = por %p2731_p7, %p2730_p6 }
  0x3a   : > { %p2733_p10 = pnand %p2732_p8, %p2726_p3 }
  0x3c   : > { %2736 = shalt.err (!%p2733_p10)
}
  0x3d   : > { %s2737_s20 = scalar_lea.vmem %s2911_s13, 384  ;;  %s2800_s25 = smov [#allocation6]  }
  0x3e   : > { %p2738_p11 = scmp.ne.s32.totalorder %s2911_s13, %s2737_s20  ;;  %s2741_s26 = sshll.u32 %s2800_s25, 4  ;;  %s2742_s26 = int_to_ptr.vmem [resolvable:$false] %s2741_s26 }
  0x3f   : > { %s2743_s7 = scalar_lea.vmem %s2742_s26, 768  ;;  %p2744_p2 = scmp.lt.s32.totalorder %s2911_s13, %s2742_s26 }
  0x40   : > { %p2739_p0 = pnand %p2738_p11, %p2865_p9  ;;  %p2745_p13 = scmp.lt.s32.totalorder %s2743_s7, %s2737_s20 }
  0x42   : > { %p2740_p1 = pneg %p2739_p0  ;;  %p2746_p4 = por %p2745_p13, %p2744_p2 }
  0x44   : > { %p2747_p5 = pnand %p2746_p4, %p2740_p1 }
  0x46   : > { %2750 = shalt.err (!%p2747_p5)
}
  0x47   : > { %s2801_s8 = smov 128   ;;  %s2802_s9 = smov 8  }
  0x48   : > { %2664 = dma.hbm_to_vmem [thread:$0]  (%p2865_p9), %s2909_s11, 384, %s2911_s13, %s196_s16, %s2801_s8, %s2801_s8, %s2802_s9  }
  0x49 PF: > { %p2220_p3 = scmp.ge.s32.totalorder %s2791_s22, 1  ;;  %p214_p6 = scmp.lt.s32.totalorder %s2791_s22, 3 }
  0x4b   : > { %p215_p7 = pnand %p2220_p3, %p214_p6 }
  0x4c   : > { %s2940_s10 = sand.u32 (!%p215_p7), 1, %s2783_s0  }
  0x4d   : > { %218 = sbr.rel (%p215_p7) target bundleno = 405 (0x195), region = 28  ;;  %s221_s17 = scalar_lea.sflag (!%p215_p7), [#allocation5], %s2940_s10 }
  0x4e   : > { %s2653_s14 = smul.u32 (!%p215_p7), 2016, %s2940_s10 }
  0x50   : > { %s2944_s12 = scalar_lea.vmem (!%p215_p7), [#allocation4], %s2653_s14 }
  0x54   : > { %2770 = dma.done.wait (%p2871_p12), %s221_s17, 32256  }
  0x55   : > { %2772 = vsyncadd (%p2871_p12), %s221_s17, 4294935040  ;;  %s2654_s22 = smul.u32 24, %s2940_s10  ;;  %s230_s28 = scalar_lea.sflag [#allocation7], %s2940_s10 }
  0x57   : > { %s2952_s5 = scalar_lea.vmem [#allocation6], %s2654_s22 }
  0x58   : > { %2774 = dma.done.wait (%p2871_p12), %s230_s28, 384  }
  0x59   : > { %2776 = vsyncadd (%p2871_p12), %s230_s28, 4294966912  ;;  %s274_s11 = sld [smem:[#allocation3]]  ;;  %s2225_s16 = sld [smem:[#allocation3 + $0x1]]  ;;  %v271_v1 = vld [vmem:[%s2944_s12] sm:$0xff]  ;;  %v272_v2 = vld [vmem:[%s2944_s12 + $0x8] sm:$0xff] }
  0x5a   : > { %s2221_s13 = sld [smem:[#allocation3 + $0x80]]  ;;  %s2226_s15 = sld [smem:[#allocation3 + $0x81]]  ;;  %v273_v3 = vld [vmem:[%s2944_s12 + $0x10] sm:$0xff]  ;;  %v2222_v9 = vld [vmem:[%s2944_s12 + $0x18] sm:$0xff]  ;;  %v2223_v10 = vld [vmem:[%s2944_s12 + $0x20] sm:$0xff] }
  0x5b   : > { %s2958_s18 = sld [smem:[#allocation3 + $0x2]]  ;;  %s2962_s19 = sld [smem:[#allocation3 + $0x3]]  ;;  %v2224_v11 = vld [vmem:[%s2944_s12 + $0x28] sm:$0xff]  ;;  %v2227_v20 = vld [vmem:[%s2944_s12 + $0x30] sm:$0xff]  ;;  %v2228_v21 = vld [vmem:[%s2944_s12 + $0x38] sm:$0xff] }
  0x5c   : > { %s2960_s6 = sld [smem:[#allocation3 + $0x82]]  ;;  %s2967_s29 = sld [smem:[#allocation3 + $0x83]]  ;;  %v2229_v24 = vld [vmem:[%s2944_s12 + $0x40] sm:$0xff]  ;;  %v2232_v39 = vld [vmem:[%s2944_s12 + $0x48] sm:$0xff]  ;;  %v2233_v40 = vld [vmem:[%s2944_s12 + $0x50] sm:$0xff] }
  0x5d   : > { %s2974_s20 = sld [smem:[#allocation3 + $0x4]]  ;;  %s2981_s26 = sld [smem:[#allocation3 + $0x5]]  ;;  %v2234_v41 = vld [vmem:[%s2944_s12 + $0x58] sm:$0xff]  ;;  %v2237_v54 = vld [vmem:[%s2944_s12 + $0x60] sm:$0xff]  ;;  %v2238_v55 = vld [vmem:[%s2944_s12 + $0x68] sm:$0xff] }
  0x5e   : > { %s2976_s25 = sld [smem:[#allocation3 + $0x84]]  ;;  %s2986_s7 = sld [smem:[#allocation3 + $0x85]]  ;;  %v2239_v58 = vld [vmem:[%s2944_s12 + $0x70] sm:$0xff] }
  0x5f   : > { %v275_v0 = vstv %s274_s11  ;;  %v295_v14 = vstv %s2225_s16  ;;  %s2992_s8 = sld [smem:[#allocation3 + $0x6]]  ;;  %s2999_s14 = sld [smem:[#allocation3 + $0x7]] }
  0x60   : > { %v283_v4 = vstv %s2221_s13  ;;  %v276_v5 = vmul.f32 %v275_v0, %v271_v1  ;;  %v277_v6 = vmul.f32 %v275_v0, %v272_v2  ;;  %v278_v7 = vmul.f32 %v275_v0, %v273_v3  ;;  %s2994_s9 = sld [smem:[#allocation3 + $0x86]]  ;;  %s3004_s17 = sld [smem:[#allocation3 + $0x87]] }
  0x61   : > { %v284_v8 = vmul.f32 %v283_v4, %v271_v1  ;;  %v285_v12 = vmul.f32 %v283_v4, %v272_v2  ;;  %v286_v13 = vmul.f32 %v283_v4, %v273_v3  ;;  %v303_v15 = vstv %s2226_s15  ;;  %s3010_s22 = sld [smem:[#allocation3 + $0x8]]  ;;  %s3017_s11 = sld [smem:[#allocation3 + $0x9]] }
  0x62   : > { %v296_v16 = vmul.f32 %v2222_v9, %v295_v14  ;;  %v297_v17 = vmul.f32 %v2223_v10, %v295_v14  ;;  %v298_v18 = vmul.f32 %v2224_v11, %v295_v14  ;;  %v304_v19 = vmul.f32 %v2222_v9, %v303_v15  ;;  %v2242_v9 = vld [vmem:[%s2944_s12 + $0x78] sm:$0xff]  ;;  %s3012_s28 = sld [smem:[#allocation3 + $0x88]]  ;;  %s3022_s13 = sld [smem:[#allocation3 + $0x89]] }
  0x63   : > { %v305_v22 = vmul.f32 %v2223_v10, %v303_v15  ;;  %v306_v23 = vmul.f32 %v2224_v11, %v303_v15  ;;  %v315_v25 = vstv %s2958_s18  ;;  %v323_v26 = vstv %s2960_s6  ;;  %v2243_v10 = vld [vmem:[%s2944_s12 + $0x80] sm:$0xff]  ;;  %v2244_v11 = vld [vmem:[%s2944_s12 + $0x88] sm:$0xff]  ;;  %s3028_s16 = sld [smem:[#allocation3 + $0xa]]  ;;  %s3035_s18 = sld [smem:[#allocation3 + $0xb]] }
  0x64   : > { %v299_v27 = vadd.f32 %v296_v16, %v276_v5  ;;  %v300_v28 = vadd.f32 %v297_v17, %v277_v6  ;;  %v301_v29 = vadd.f32 %v298_v18, %v278_v7  ;;  %v307_v30 = vadd.f32 %v304_v19, %v284_v8  ;;  %s3030_s15 = sld [smem:[#allocation3 + $0x8a]]  ;;  %s3040_s6 = sld [smem:[#allocation3 + $0x8b]] }
  0x65   : > { %v308_v31 = vadd.f32 %v305_v22, %v285_v12  ;;  %v309_v32 = vadd.f32 %v306_v23, %v286_v13  ;;  %v316_v33 = vmul.f32 %v2227_v20, %v315_v25  ;;  %v317_v34 = vmul.f32 %v2228_v21, %v315_v25  ;;  %p3774_p9 = scmp.ne.s32.totalorder %s3773_s30, 0 }
  0x66   : > { %v318_v35 = vmul.f32 %v2229_v24, %v315_v25  ;;  %v324_v36 = vmul.f32 %v2227_v20, %v323_v26  ;;  %v325_v37 = vmul.f32 %v2228_v21, %v323_v26  ;;  %v326_v38 = vmul.f32 %v2229_v24, %v323_v26  ;;  %v2247_v24 = vld [vmem:[%s2944_s12 + $0x90] sm:$0xff]  ;;  %v2248_v25 = vld [vmem:[%s2944_s12 + $0x98] sm:$0xff] }
  0x67   : > { %v319_v42 = vadd.f32 %v316_v33, %v299_v27  ;;  %v320_v43 = vadd.f32 %v317_v34, %v300_v28  ;;  %v335_v44 = vstv %s2962_s19  ;;  %v343_v45 = vstv %s2967_s29  ;;  %v2249_v28 = vld [vmem:[%s2944_s12 + $0xa0] sm:$0xff]  ;;  %s3046_s19 = sld [smem:[#allocation3 + $0xc]] }
  0x68   : > { %v321_v46 = vadd.f32 %v318_v35, %v301_v29  ;;  %v327_v47 = vadd.f32 %v324_v36, %v307_v30  ;;  %v328_v48 = vadd.f32 %v325_v37, %v308_v31  ;;  %v329_v49 = vadd.f32 %v326_v38, %v309_v32  ;;  %s3048_s29 = sld [smem:[#allocation3 + $0x8c]] }
  0x69   : > { %v336_v50 = vmul.f32 %v2232_v39, %v335_v44  ;;  %v337_v51 = vmul.f32 %v2233_v40, %v335_v44  ;;  %v338_v52 = vmul.f32 %v2234_v41, %v335_v44  ;;  %v344_v53 = vmul.f32 %v2232_v39, %v343_v45  ;;  %v2253_v44 = vld [vmem:[%s2944_s12 + $0xb0] sm:$0xff] }
  0x6a   : > { %v345_v56 = vmul.f32 %v2233_v40, %v343_v45  ;;  %v346_v57 = vmul.f32 %v2234_v41, %v343_v45  ;;  %v355_v59 = vstv %s2974_s20  ;;  %v363_v60 = vstv %s2976_s25  ;;  %v2254_v45 = vld [vmem:[%s2944_s12 + $0xb8] sm:$0xff]  ;;  %s3053_s20 = sld [smem:[#allocation3 + $0xd]] }
  0x6b   : > { %v339_v61 = vadd.f32 %v336_v50, %v319_v42  ;;  %v340_v62 = vadd.f32 %v337_v51, %v320_v43  ;;  %v341_v63 = vadd.f32 %v338_v52, %v321_v46  ;;  %v347_v0 = vadd.f32 %v344_v53, %v327_v47  ;;  %v2252_v43 = vld [vmem:[%s2944_s12 + $0xa8] sm:$0xff]  ;;  %s3058_s25 = sld [smem:[#allocation3 + $0x8d]] }
  0x6c   : > { %v348_v1 = vadd.f32 %v345_v56, %v328_v48  ;;  %v349_v2 = vadd.f32 %v346_v57, %v329_v49  ;;  %v356_v3 = vmul.f32 %v2237_v54, %v355_v59  ;;  %v357_v4 = vmul.f32 %v2238_v55, %v355_v59 }
  0x6d   : > { %v358_v5 = vmul.f32 %v2239_v58, %v355_v59  ;;  %v364_v6 = vmul.f32 %v2237_v54, %v363_v60  ;;  %v365_v7 = vmul.f32 %v2238_v55, %v363_v60  ;;  %v366_v8 = vmul.f32 %v2239_v58, %v363_v60  ;;  %v2257_v58 = vld [vmem:[%s2944_s12 + $0xc0] sm:$0xff]  ;;  %v2258_v59 = vld [vmem:[%s2944_s12 + $0xc8] sm:$0xff] }
  0x6e   : > { %v359_v12 = vadd.f32 %v356_v3, %v339_v61  ;;  %v360_v13 = vadd.f32 %v357_v4, %v340_v62  ;;  %v375_v14 = vstv %s2981_s26  ;;  %v383_v15 = vstv %s2986_s7  ;;  %v2259_v62 = vld [vmem:[%s2944_s12 + $0xd0] sm:$0xff]  ;;  %s3064_s26 = sld [smem:[#allocation3 + $0xe]] }
  0x6f   : > { %v361_v16 = vadd.f32 %v358_v5, %v341_v63  ;;  %v367_v17 = vadd.f32 %v364_v6, %v347_v0  ;;  %v368_v18 = vadd.f32 %v365_v7, %v348_v1  ;;  %v369_v19 = vadd.f32 %v366_v8, %v349_v2  ;;  %s3066_s7 = sld [smem:[#allocation3 + $0x8e]] }
  0x70   : > { %v376_v20 = vmul.f32 %v2242_v9, %v375_v14  ;;  %v377_v21 = vmul.f32 %v2243_v10, %v375_v14  ;;  %v378_v22 = vmul.f32 %v2244_v11, %v375_v14  ;;  %v384_v23 = vmul.f32 %v2242_v9, %v383_v15  ;;  %v2263_v14 = vld [vmem:[%s2944_s12 + $0xe0] sm:$0xff] }
  0x71   : > { %v385_v26 = vmul.f32 %v2243_v10, %v383_v15  ;;  %v386_v27 = vmul.f32 %v2244_v11, %v383_v15  ;;  %v395_v29 = vstv %s2992_s8  ;;  %v403_v30 = vstv %s2994_s9  ;;  %v2264_v15 = vld [vmem:[%s2944_s12 + $0xe8] sm:$0xff]  ;;  %s3074_s8 = sld [smem:[#allocation3 + $0xf]] }
  0x72   : > { %v379_v31 = vadd.f32 %v376_v20, %v359_v12  ;;  %v380_v32 = vadd.f32 %v377_v21, %v360_v13  ;;  %v381_v33 = vadd.f32 %v378_v22, %v361_v16  ;;  %v387_v34 = vadd.f32 %v384_v23, %v367_v17  ;;  %v2262_v13 = vld [vmem:[%s2944_s12 + $0xd8] sm:$0xff]  ;;  %s3076_s9 = sld [smem:[#allocation3 + $0x8f]] }
  0x73   : > { %v388_v35 = vadd.f32 %v385_v26, %v368_v18  ;;  %v389_v36 = vadd.f32 %v386_v27, %v369_v19  ;;  %v396_v37 = vmul.f32 %v2247_v24, %v395_v29  ;;  %v397_v38 = vmul.f32 %v2248_v25, %v395_v29 }
  0x74   : > { %v398_v39 = vmul.f32 %v2249_v28, %v395_v29  ;;  %v404_v40 = vmul.f32 %v2247_v24, %v403_v30  ;;  %v405_v41 = vmul.f32 %v2248_v25, %v403_v30  ;;  %v406_v42 = vmul.f32 %v2249_v28, %v403_v30  ;;  %v2267_v28 = vld [vmem:[%s2944_s12 + $0xf0] sm:$0xff]  ;;  %v2268_v29 = vld [vmem:[%s2944_s12 + $0xf8] sm:$0xff] }
  0x75   : > { %v399_v46 = vadd.f32 %v396_v37, %v379_v31  ;;  %v400_v47 = vadd.f32 %v397_v38, %v380_v32  ;;  %v415_v48 = vstv %s2999_s14  ;;  %v423_v49 = vstv %s3004_s17  ;;  %v2269_v32 = vld [vmem:[%s2944_s12 + $0x100] sm:$0xff]  ;;  %s3082_s14 = sld [smem:[#allocation3 + $0x10]] }
  0x76   : > { %v401_v50 = vadd.f32 %v398_v39, %v381_v33  ;;  %v407_v51 = vadd.f32 %v404_v40, %v387_v34  ;;  %v408_v52 = vadd.f32 %v405_v41, %v388_v35  ;;  %v409_v53 = vadd.f32 %v406_v42, %v389_v36  ;;  %s3084_s17 = sld [smem:[#allocation3 + $0x90]] }
  0x77   : > { %v416_v54 = vmul.f32 %v2252_v43, %v415_v48  ;;  %v417_v55 = vmul.f32 %v2253_v44, %v415_v48  ;;  %v418_v56 = vmul.f32 %v2254_v45, %v415_v48  ;;  %v424_v57 = vmul.f32 %v2252_v43, %v423_v49  ;;  %v2273_v48 = vld [vmem:[%s2944_s12 + $0x110] sm:$0xff] }
  0x78   : > { %v425_v60 = vmul.f32 %v2253_v44, %v423_v49  ;;  %v426_v61 = vmul.f32 %v2254_v45, %v423_v49  ;;  %v435_v63 = vstv %s3010_s22  ;;  %v443_v0 = vstv %s3012_s28  ;;  %v2274_v49 = vld [vmem:[%s2944_s12 + $0x118] sm:$0xff]  ;;  %s3092_s22 = sld [smem:[#allocation3 + $0x11]] }
  0x79   : > { %v419_v1 = vadd.f32 %v416_v54, %v399_v46  ;;  %v420_v2 = vadd.f32 %v417_v55, %v400_v47  ;;  %v421_v3 = vadd.f32 %v418_v56, %v401_v50  ;;  %v427_v4 = vadd.f32 %v424_v57, %v407_v51  ;;  %v2272_v47 = vld [vmem:[%s2944_s12 + $0x108] sm:$0xff]  ;;  %s3094_s28 = sld [smem:[#allocation3 + $0x91]] }
  0x7a   : > { %v428_v5 = vadd.f32 %v425_v60, %v408_v52  ;;  %v429_v6 = vadd.f32 %v426_v61, %v409_v53  ;;  %v436_v7 = vmul.f32 %v2257_v58, %v435_v63  ;;  %v437_v8 = vmul.f32 %v2258_v59, %v435_v63 }
  0x7b   : > { %v438_v9 = vmul.f32 %v2259_v62, %v435_v63  ;;  %v444_v10 = vmul.f32 %v2257_v58, %v443_v0  ;;  %v445_v11 = vmul.f32 %v2258_v59, %v443_v0  ;;  %v446_v12 = vmul.f32 %v2259_v62, %v443_v0  ;;  %v2277_v62 = vld [vmem:[%s2944_s12 + $0x120] sm:$0xff]  ;;  %v2278_v63 = vld [vmem:[%s2944_s12 + $0x128] sm:$0xff] }
  0x7c   : > { %v439_v16 = vadd.f32 %v436_v7, %v419_v1  ;;  %v440_v17 = vadd.f32 %v437_v8, %v420_v2  ;;  %v455_v18 = vstv %s3017_s11  ;;  %v463_v19 = vstv %s3022_s13  ;;  %v2279_v2 = vld [vmem:[%s2944_s12 + $0x130] sm:$0xff]  ;;  %s3100_s11 = sld [smem:[#allocation3 + $0x12]] }
  0x7d   : > { %v441_v20 = vadd.f32 %v438_v9, %v421_v3  ;;  %v447_v21 = vadd.f32 %v444_v10, %v427_v4  ;;  %v448_v22 = vadd.f32 %v445_v11, %v428_v5  ;;  %v449_v23 = vadd.f32 %v446_v12, %v429_v6  ;;  %s3102_s13 = sld [smem:[#allocation3 + $0x92]] }
  0x7e   : > { %v456_v24 = vmul.f32 %v2262_v13, %v455_v18  ;;  %v457_v25 = vmul.f32 %v2263_v14, %v455_v18  ;;  %v458_v26 = vmul.f32 %v2264_v15, %v455_v18  ;;  %v464_v27 = vmul.f32 %v2262_v13, %v463_v19  ;;  %v2282_v13 = vld [vmem:[%s2944_s12 + $0x138] sm:$0xff]  ;;  %v2283_v18 = vld [vmem:[%s2944_s12 + $0x140] sm:$0xff] }
  0x7f   : > { %v465_v30 = vmul.f32 %v2263_v14, %v463_v19  ;;  %v466_v31 = vmul.f32 %v2264_v15, %v463_v19  ;;  %v475_v33 = vstv %s3028_s16  ;;  %v483_v34 = vstv %s3030_s15  ;;  %v2284_v19 = vld [vmem:[%s2944_s12 + $0x148] sm:$0xff]  ;;  %s3110_s16 = sld [smem:[#allocation3 + $0x13]] }
  0x80   : > { %v459_v35 = vadd.f32 %v456_v24, %v439_v16  ;;  %v460_v36 = vadd.f32 %v457_v25, %v440_v17  ;;  %v461_v37 = vadd.f32 %v458_v26, %v441_v20  ;;  %v467_v38 = vadd.f32 %v464_v27, %v447_v21  ;;  %s3112_s15 = sld [smem:[#allocation3 + $0x93]] }
  0x81   : > { %v468_v39 = vadd.f32 %v465_v30, %v448_v22  ;;  %v469_v40 = vadd.f32 %v466_v31, %v449_v23  ;;  %v476_v41 = vmul.f32 %v2267_v28, %v475_v33  ;;  %v477_v42 = vmul.f32 %v2268_v29, %v475_v33 }
  0x82   : > { %v478_v43 = vmul.f32 %v2269_v32, %v475_v33  ;;  %v484_v44 = vmul.f32 %v2267_v28, %v483_v34  ;;  %v485_v45 = vmul.f32 %v2268_v29, %v483_v34  ;;  %v486_v46 = vmul.f32 %v2269_v32, %v483_v34  ;;  %v2287_v32 = vld [vmem:[%s2944_s12 + $0x150] sm:$0xff]  ;;  %v2288_v33 = vld [vmem:[%s2944_s12 + $0x158] sm:$0xff] }
  0x83   : > { %v479_v50 = vadd.f32 %v476_v41, %v459_v35  ;;  %v480_v51 = vadd.f32 %v477_v42, %v460_v36  ;;  %v495_v52 = vstv %s3035_s18  ;;  %v503_v53 = vstv %s3040_s6  ;;  %v2289_v36 = vld [vmem:[%s2944_s12 + $0x160] sm:$0xff]  ;;  %s3118_s18 = sld [smem:[#allocation3 + $0x14]] }
  0x84   : > { %v481_v54 = vadd.f32 %v478_v43, %v461_v37  ;;  %v487_v55 = vadd.f32 %v484_v44, %v467_v38  ;;  %v488_v56 = vadd.f32 %v485_v45, %v468_v39  ;;  %v489_v57 = vadd.f32 %v486_v46, %v469_v40  ;;  %s3120_s6 = sld [smem:[#allocation3 + $0x94]] }
  0x85   : > { %v496_v58 = vmul.f32 %v2272_v47, %v495_v52  ;;  %v497_v59 = vmul.f32 %v2273_v48, %v495_v52  ;;  %v498_v60 = vmul.f32 %v2274_v49, %v495_v52  ;;  %v504_v61 = vmul.f32 %v2272_v47, %v503_v53  ;;  %v2292_v47 = vld [vmem:[%s2944_s12 + $0x168] sm:$0xff]  ;;  %v2293_v52 = vld [vmem:[%s2944_s12 + $0x170] sm:$0xff] }
  0x86   : > { %v505_v0 = vmul.f32 %v2273_v48, %v503_v53  ;;  %v506_v1 = vmul.f32 %v2274_v49, %v503_v53  ;;  %v515_v3 = vstv %s3046_s19  ;;  %v523_v4 = vstv %s3048_s29  ;;  %v2294_v53 = vld [vmem:[%s2944_s12 + $0x178] sm:$0xff]  ;;  %s3128_s19 = sld [smem:[#allocation3 + $0x15]] }
  0x87   : > { %v499_v5 = vadd.f32 %v496_v58, %v479_v50  ;;  %v500_v6 = vadd.f32 %v497_v59, %v480_v51  ;;  %v501_v7 = vadd.f32 %v498_v60, %v481_v54  ;;  %v507_v8 = vadd.f32 %v504_v61, %v487_v55  ;;  %s3130_s29 = sld [smem:[#allocation3 + $0x95]] }
  0x88   : > { %v508_v9 = vadd.f32 %v505_v0, %v488_v56  ;;  %v509_v10 = vadd.f32 %v506_v1, %v489_v57  ;;  %v516_v11 = vmul.f32 %v2277_v62, %v515_v3  ;;  %v517_v12 = vmul.f32 %v2278_v63, %v515_v3 }
  0x89   : > { %v518_v14 = vmul.f32 %v2279_v2, %v515_v3  ;;  %v524_v15 = vmul.f32 %v2277_v62, %v523_v4  ;;  %v525_v16 = vmul.f32 %v2278_v63, %v523_v4  ;;  %v526_v17 = vmul.f32 %v2279_v2, %v523_v4  ;;  %v2297_v2 = vld [vmem:[%s2944_s12 + $0x180] sm:$0xff]  ;;  %v2298_v3 = vld [vmem:[%s2944_s12 + $0x188] sm:$0xff] }
  0x8a   : > { %v519_v20 = vadd.f32 %v516_v11, %v499_v5  ;;  %v520_v21 = vadd.f32 %v517_v12, %v500_v6  ;;  %v535_v22 = vstv %s3053_s20  ;;  %v543_v23 = vstv %s3058_s25  ;;  %v2299_v6 = vld [vmem:[%s2944_s12 + $0x190] sm:$0xff]  ;;  %s3136_s20 = sld [smem:[#allocation3 + $0x16]] }
  0x8b   : > { %v521_v24 = vadd.f32 %v518_v14, %v501_v7  ;;  %v527_v25 = vadd.f32 %v524_v15, %v507_v8  ;;  %v528_v26 = vadd.f32 %v525_v16, %v508_v9  ;;  %v529_v27 = vadd.f32 %v526_v17, %v509_v10  ;;  %v2302_v17 = vld [vmem:[%s2944_s12 + $0x198] sm:$0xff]  ;;  %s3138_s25 = sld [smem:[#allocation3 + $0x96]] }
  0x8c   : > { %v536_v28 = vmul.f32 %v2282_v13, %v535_v22  ;;  %v537_v29 = vmul.f32 %v2283_v18, %v535_v22  ;;  %v538_v30 = vmul.f32 %v2284_v19, %v535_v22  ;;  %v544_v31 = vmul.f32 %v2282_v13, %v543_v23  ;;  %v2303_v22 = vld [vmem:[%s2944_s12 + $0x1a0] sm:$0xff] }
  0x8d   : > { %v545_v34 = vmul.f32 %v2283_v18, %v543_v23  ;;  %v546_v35 = vmul.f32 %v2284_v19, %v543_v23  ;;  %v555_v37 = vstv %s3064_s26  ;;  %v563_v38 = vstv %s3066_s7  ;;  %v2304_v23 = vld [vmem:[%s2944_s12 + $0x1a8] sm:$0xff]  ;;  %s3146_s26 = sld [smem:[#allocation3 + $0x17]] }
  0x8e   : > { %v539_v39 = vadd.f32 %v536_v28, %v519_v20  ;;  %v540_v40 = vadd.f32 %v537_v29, %v520_v21  ;;  %v541_v41 = vadd.f32 %v538_v30, %v521_v24  ;;  %v547_v42 = vadd.f32 %v544_v31, %v527_v25  ;;  %s3148_s7 = sld [smem:[#allocation3 + $0x97]] }
  0x8f   : > { %v548_v43 = vadd.f32 %v545_v34, %v528_v26  ;;  %v549_v44 = vadd.f32 %v546_v35, %v529_v27  ;;  %v556_v45 = vmul.f32 %v2287_v32, %v555_v37  ;;  %v557_v46 = vmul.f32 %v2288_v33, %v555_v37 }
  0x90   : > { %v558_v48 = vmul.f32 %v2289_v36, %v555_v37  ;;  %v564_v49 = vmul.f32 %v2287_v32, %v563_v38  ;;  %v565_v50 = vmul.f32 %v2288_v33, %v563_v38  ;;  %v566_v51 = vmul.f32 %v2289_v36, %v563_v38  ;;  %v2307_v36 = vld [vmem:[%s2944_s12 + $0x1b0] sm:$0xff]  ;;  %v2308_v37 = vld [vmem:[%s2944_s12 + $0x1b8] sm:$0xff] }
  0x91   : > { %v559_v54 = vadd.f32 %v556_v45, %v539_v39  ;;  %v560_v55 = vadd.f32 %v557_v46, %v540_v40  ;;  %v575_v56 = vstv %s3074_s8  ;;  %v583_v57 = vstv %s3076_s9  ;;  %v2309_v40 = vld [vmem:[%s2944_s12 + $0x1c0] sm:$0xff]  ;;  %s3154_s8 = sld [smem:[#allocation3 + $0x18]] }
  0x92   : > { %v561_v58 = vadd.f32 %v558_v48, %v541_v41  ;;  %v567_v59 = vadd.f32 %v564_v49, %v547_v42  ;;  %v568_v60 = vadd.f32 %v565_v50, %v548_v43  ;;  %v569_v61 = vadd.f32 %v566_v51, %v549_v44  ;;  %v2312_v51 = vld [vmem:[%s2944_s12 + $0x1c8] sm:$0xff]  ;;  %s3156_s9 = sld [smem:[#allocation3 + $0x98]] }
  0x93   : > { %v576_v62 = vmul.f32 %v2292_v47, %v575_v56  ;;  %v577_v63 = vmul.f32 %v2293_v52, %v575_v56  ;;  %v578_v0 = vmul.f32 %v2294_v53, %v575_v56  ;;  %v584_v1 = vmul.f32 %v2292_v47, %v583_v57  ;;  %v2313_v56 = vld [vmem:[%s2944_s12 + $0x1d0] sm:$0xff] }
  0x94   : > { %v585_v4 = vmul.f32 %v2293_v52, %v583_v57  ;;  %v586_v5 = vmul.f32 %v2294_v53, %v583_v57  ;;  %v595_v7 = vstv %s3082_s14  ;;  %v603_v8 = vstv %s3084_s17  ;;  %v2314_v57 = vld [vmem:[%s2944_s12 + $0x1d8] sm:$0xff]  ;;  %s3164_s14 = sld [smem:[#allocation3 + $0x19]] }
  0x95   : > { %v579_v9 = vadd.f32 %v576_v62, %v559_v54  ;;  %v580_v10 = vadd.f32 %v577_v63, %v560_v55  ;;  %v581_v11 = vadd.f32 %v578_v0, %v561_v58  ;;  %v587_v12 = vadd.f32 %v584_v1, %v567_v59  ;;  %s3166_s17 = sld [smem:[#allocation3 + $0x99]] }
  0x96   : > { %v588_v13 = vadd.f32 %v585_v4, %v568_v60  ;;  %v589_v14 = vadd.f32 %v586_v5, %v569_v61  ;;  %v596_v15 = vmul.f32 %v2297_v2, %v595_v7  ;;  %v597_v16 = vmul.f32 %v2298_v3, %v595_v7 }
  0x97   : > { %v598_v18 = vmul.f32 %v2299_v6, %v595_v7  ;;  %v604_v19 = vmul.f32 %v2297_v2, %v603_v8  ;;  %v605_v20 = vmul.f32 %v2298_v3, %v603_v8  ;;  %v606_v21 = vmul.f32 %v2299_v6, %v603_v8  ;;  %v2317_v6 = vld [vmem:[%s2944_s12 + $0x1e0] sm:$0xff]  ;;  %v2318_v7 = vld [vmem:[%s2944_s12 + $0x1e8] sm:$0xff] }
  0x98   : > { %v599_v24 = vadd.f32 %v596_v15, %v579_v9  ;;  %v600_v25 = vadd.f32 %v597_v16, %v580_v10  ;;  %v615_v26 = vstv %s3092_s22  ;;  %v623_v27 = vstv %s3094_s28  ;;  %v2319_v10 = vld [vmem:[%s2944_s12 + $0x1f0] sm:$0xff]  ;;  %s3172_s22 = sld [smem:[#allocation3 + $0x1a]] }
  0x99   : > { %v601_v28 = vadd.f32 %v598_v18, %v581_v11  ;;  %v607_v29 = vadd.f32 %v604_v19, %v587_v12  ;;  %v608_v30 = vadd.f32 %v605_v20, %v588_v13  ;;  %v609_v31 = vadd.f32 %v606_v21, %v589_v14  ;;  %v2322_v21 = vld [vmem:[%s2944_s12 + $0x1f8] sm:$0xff]  ;;  %s3174_s28 = sld [smem:[#allocation3 + $0x9a]] }
  0x9a   : > { %v616_v32 = vmul.f32 %v2302_v17, %v615_v26  ;;  %v617_v33 = vmul.f32 %v2303_v22, %v615_v26  ;;  %v618_v34 = vmul.f32 %v2304_v23, %v615_v26  ;;  %v624_v35 = vmul.f32 %v2302_v17, %v623_v27  ;;  %v2323_v26 = vld [vmem:[%s2944_s12 + $0x200] sm:$0xff] }
  0x9b   : > { %v625_v38 = vmul.f32 %v2303_v22, %v623_v27  ;;  %v626_v39 = vmul.f32 %v2304_v23, %v623_v27  ;;  %v635_v41 = vstv %s3100_s11  ;;  %v643_v42 = vstv %s3102_s13  ;;  %v2324_v27 = vld [vmem:[%s2944_s12 + $0x208] sm:$0xff]  ;;  %s3182_s11 = sld [smem:[#allocation3 + $0x1b]] }
  0x9c   : > { %v619_v43 = vadd.f32 %v616_v32, %v599_v24  ;;  %v620_v44 = vadd.f32 %v617_v33, %v600_v25  ;;  %v621_v45 = vadd.f32 %v618_v34, %v601_v28  ;;  %v627_v46 = vadd.f32 %v624_v35, %v607_v29  ;;  %s3184_s13 = sld [smem:[#allocation3 + $0x9b]] }
  0x9d   : > { %v628_v47 = vadd.f32 %v625_v38, %v608_v30  ;;  %v629_v48 = vadd.f32 %v626_v39, %v609_v31  ;;  %v636_v49 = vmul.f32 %v2307_v36, %v635_v41  ;;  %v637_v50 = vmul.f32 %v2308_v37, %v635_v41 }
  0x9e   : > { %v638_v52 = vmul.f32 %v2309_v40, %v635_v41  ;;  %v644_v53 = vmul.f32 %v2307_v36, %v643_v42  ;;  %v645_v54 = vmul.f32 %v2308_v37, %v643_v42  ;;  %v646_v55 = vmul.f32 %v2309_v40, %v643_v42  ;;  %v2327_v40 = vld [vmem:[%s2944_s12 + $0x210] sm:$0xff]  ;;  %v2328_v41 = vld [vmem:[%s2944_s12 + $0x218] sm:$0xff] }
  0x9f   : > { %v639_v58 = vadd.f32 %v636_v49, %v619_v43  ;;  %v640_v59 = vadd.f32 %v637_v50, %v620_v44  ;;  %v655_v60 = vstv %s3110_s16  ;;  %v663_v61 = vstv %s3112_s15  ;;  %v2329_v44 = vld [vmem:[%s2944_s12 + $0x220] sm:$0xff]  ;;  %s3190_s16 = sld [smem:[#allocation3 + $0x1c]] }
  0xa0   : > { %v641_v62 = vadd.f32 %v638_v52, %v621_v45  ;;  %v647_v63 = vadd.f32 %v644_v53, %v627_v46  ;;  %v648_v0 = vadd.f32 %v645_v54, %v628_v47  ;;  %v649_v1 = vadd.f32 %v646_v55, %v629_v48  ;;  %v2332_v55 = vld [vmem:[%s2944_s12 + $0x228] sm:$0xff]  ;;  %s3192_s15 = sld [smem:[#allocation3 + $0x9c]] }
  0xa1   : > { %v656_v2 = vmul.f32 %v2312_v51, %v655_v60  ;;  %v657_v3 = vmul.f32 %v2313_v56, %v655_v60  ;;  %v658_v4 = vmul.f32 %v2314_v57, %v655_v60  ;;  %v664_v5 = vmul.f32 %v2312_v51, %v663_v61  ;;  %v2333_v60 = vld [vmem:[%s2944_s12 + $0x230] sm:$0xff] }
  0xa2   : > { %v665_v8 = vmul.f32 %v2313_v56, %v663_v61  ;;  %v666_v9 = vmul.f32 %v2314_v57, %v663_v61  ;;  %v675_v11 = vstv %s3118_s18  ;;  %v683_v12 = vstv %s3120_s6  ;;  %v2334_v61 = vld [vmem:[%s2944_s12 + $0x238] sm:$0xff]  ;;  %s3200_s18 = sld [smem:[#allocation3 + $0x1d]] }
  0xa3   : > { %v659_v13 = vadd.f32 %v656_v2, %v639_v58  ;;  %v660_v14 = vadd.f32 %v657_v3, %v640_v59  ;;  %v661_v15 = vadd.f32 %v658_v4, %v641_v62  ;;  %v667_v16 = vadd.f32 %v664_v5, %v647_v63  ;;  %s3202_s6 = sld [smem:[#allocation3 + $0x9d]] }
  0xa4   : > { %v668_v17 = vadd.f32 %v665_v8, %v648_v0  ;;  %v669_v18 = vadd.f32 %v666_v9, %v649_v1  ;;  %v676_v19 = vmul.f32 %v2317_v6, %v675_v11  ;;  %v677_v20 = vmul.f32 %v2318_v7, %v675_v11 }
  0xa5   : > { %v678_v22 = vmul.f32 %v2319_v10, %v675_v11  ;;  %v684_v23 = vmul.f32 %v2317_v6, %v683_v12  ;;  %v685_v24 = vmul.f32 %v2318_v7, %v683_v12  ;;  %v686_v25 = vmul.f32 %v2319_v10, %v683_v12  ;;  %v2337_v10 = vld [vmem:[%s2944_s12 + $0x240] sm:$0xff]  ;;  %v2338_v11 = vld [vmem:[%s2944_s12 + $0x248] sm:$0xff] }
  0xa6   : > { %v679_v28 = vadd.f32 %v676_v19, %v659_v13  ;;  %v680_v29 = vadd.f32 %v677_v20, %v660_v14  ;;  %v695_v30 = vstv %s3128_s19  ;;  %v703_v31 = vstv %s3130_s29  ;;  %v2339_v14 = vld [vmem:[%s2944_s12 + $0x250] sm:$0xff]  ;;  %s3208_s19 = sld [smem:[#allocation3 + $0x1e]] }
  0xa7   : > { %v681_v32 = vadd.f32 %v678_v22, %v661_v15  ;;  %v687_v33 = vadd.f32 %v684_v23, %v667_v16  ;;  %v688_v34 = vadd.f32 %v685_v24, %v668_v17  ;;  %v689_v35 = vadd.f32 %v686_v25, %v669_v18  ;;  %v2342_v25 = vld [vmem:[%s2944_s12 + $0x258] sm:$0xff]  ;;  %s3210_s29 = sld [smem:[#allocation3 + $0x9e]] }
  0xa8   : > { %v696_v36 = vmul.f32 %v2322_v21, %v695_v30  ;;  %v697_v37 = vmul.f32 %v2323_v26, %v695_v30  ;;  %v698_v38 = vmul.f32 %v2324_v27, %v695_v30  ;;  %v704_v39 = vmul.f32 %v2322_v21, %v703_v31  ;;  %v2343_v30 = vld [vmem:[%s2944_s12 + $0x260] sm:$0xff] }
  0xa9   : > { %v705_v42 = vmul.f32 %v2323_v26, %v703_v31  ;;  %v706_v43 = vmul.f32 %v2324_v27, %v703_v31  ;;  %v715_v45 = vstv %s3136_s20  ;;  %v723_v46 = vstv %s3138_s25  ;;  %v2344_v31 = vld [vmem:[%s2944_s12 + $0x268] sm:$0xff]  ;;  %s3218_s20 = sld [smem:[#allocation3 + $0x1f]] }
  0xaa   : > { %v699_v47 = vadd.f32 %v696_v36, %v679_v28  ;;  %v700_v48 = vadd.f32 %v697_v37, %v680_v29  ;;  %v701_v49 = vadd.f32 %v698_v38, %v681_v32  ;;  %v707_v50 = vadd.f32 %v704_v39, %v687_v33  ;;  %s3220_s25 = sld [smem:[#allocation3 + $0x9f]] }
  0xab   : > { %v708_v51 = vadd.f32 %v705_v42, %v688_v34  ;;  %v709_v52 = vadd.f32 %v706_v43, %v689_v35  ;;  %v716_v53 = vmul.f32 %v2327_v40, %v715_v45  ;;  %v717_v54 = vmul.f32 %v2328_v41, %v715_v45 }
  0xac   : > { %v718_v56 = vmul.f32 %v2329_v44, %v715_v45  ;;  %v724_v57 = vmul.f32 %v2327_v40, %v723_v46  ;;  %v725_v58 = vmul.f32 %v2328_v41, %v723_v46  ;;  %v726_v59 = vmul.f32 %v2329_v44, %v723_v46  ;;  %v2347_v44 = vld [vmem:[%s2944_s12 + $0x270] sm:$0xff]  ;;  %v2348_v45 = vld [vmem:[%s2944_s12 + $0x278] sm:$0xff] }
  0xad   : > { %v719_v62 = vadd.f32 %v716_v53, %v699_v47  ;;  %v720_v63 = vadd.f32 %v717_v54, %v700_v48  ;;  %v735_v0 = vstv %s3146_s26  ;;  %v743_v1 = vstv %s3148_s7  ;;  %v2349_v48 = vld [vmem:[%s2944_s12 + $0x280] sm:$0xff]  ;;  %s3226_s26 = sld [smem:[#allocation3 + $0x20]] }
  0xae   : > { %v721_v2 = vadd.f32 %v718_v56, %v701_v49  ;;  %v727_v3 = vadd.f32 %v724_v57, %v707_v50  ;;  %v728_v4 = vadd.f32 %v725_v58, %v708_v51  ;;  %v729_v5 = vadd.f32 %v726_v59, %v709_v52  ;;  %v2352_v59 = vld [vmem:[%s2944_s12 + $0x288] sm:$0xff]  ;;  %s3228_s7 = sld [smem:[#allocation3 + $0xa0]] }
  0xaf   : > { %v736_v6 = vmul.f32 %v2332_v55, %v735_v0  ;;  %v737_v7 = vmul.f32 %v2333_v60, %v735_v0  ;;  %v738_v8 = vmul.f32 %v2334_v61, %v735_v0  ;;  %v744_v9 = vmul.f32 %v2332_v55, %v743_v1  ;;  %v2353_v0 = vld [vmem:[%s2944_s12 + $0x290] sm:$0xff] }
  0xb0   : > { %v745_v12 = vmul.f32 %v2333_v60, %v743_v1  ;;  %v746_v13 = vmul.f32 %v2334_v61, %v743_v1  ;;  %v755_v15 = vstv %s3154_s8  ;;  %v763_v16 = vstv %s3156_s9  ;;  %v2354_v1 = vld [vmem:[%s2944_s12 + $0x298] sm:$0xff]  ;;  %s3236_s8 = sld [smem:[#allocation3 + $0x21]] }
  0xb1   : > { %v739_v17 = vadd.f32 %v736_v6, %v719_v62  ;;  %v740_v18 = vadd.f32 %v737_v7, %v720_v63  ;;  %v741_v19 = vadd.f32 %v738_v8, %v721_v2  ;;  %v747_v20 = vadd.f32 %v744_v9, %v727_v3  ;;  %s3238_s9 = sld [smem:[#allocation3 + $0xa1]] }
  0xb2   : > { %v748_v21 = vadd.f32 %v745_v12, %v728_v4  ;;  %v749_v22 = vadd.f32 %v746_v13, %v729_v5  ;;  %v756_v23 = vmul.f32 %v2337_v10, %v755_v15  ;;  %v757_v24 = vmul.f32 %v2338_v11, %v755_v15 }
  0xb3   : > { %v758_v26 = vmul.f32 %v2339_v14, %v755_v15  ;;  %v764_v27 = vmul.f32 %v2337_v10, %v763_v16  ;;  %v765_v28 = vmul.f32 %v2338_v11, %v763_v16  ;;  %v766_v29 = vmul.f32 %v2339_v14, %v763_v16  ;;  %v2357_v14 = vld [vmem:[%s2944_s12 + $0x2a0] sm:$0xff]  ;;  %v2358_v15 = vld [vmem:[%s2944_s12 + $0x2a8] sm:$0xff] }
  0xb4   : > { %v759_v32 = vadd.f32 %v756_v23, %v739_v17  ;;  %v760_v33 = vadd.f32 %v757_v24, %v740_v18  ;;  %v775_v34 = vstv %s3164_s14  ;;  %v783_v35 = vstv %s3166_s17  ;;  %v2359_v18 = vld [vmem:[%s2944_s12 + $0x2b0] sm:$0xff]  ;;  %s3244_s14 = sld [smem:[#allocation3 + $0x22]] }
  0xb5   : > { %v761_v36 = vadd.f32 %v758_v26, %v741_v19  ;;  %v767_v37 = vadd.f32 %v764_v27, %v747_v20  ;;  %v768_v38 = vadd.f32 %v765_v28, %v748_v21  ;;  %v769_v39 = vadd.f32 %v766_v29, %v749_v22  ;;  %v2362_v29 = vld [vmem:[%s2944_s12 + $0x2b8] sm:$0xff]  ;;  %s3246_s17 = sld [smem:[#allocation3 + $0xa2]] }
  0xb6   : > { %v776_v40 = vmul.f32 %v2342_v25, %v775_v34  ;;  %v777_v41 = vmul.f32 %v2343_v30, %v775_v34  ;;  %v778_v42 = vmul.f32 %v2344_v31, %v775_v34  ;;  %v784_v43 = vmul.f32 %v2342_v25, %v783_v35  ;;  %v2363_v34 = vld [vmem:[%s2944_s12 + $0x2c0] sm:$0xff] }
  0xb7   : > { %v785_v46 = vmul.f32 %v2343_v30, %v783_v35  ;;  %v786_v47 = vmul.f32 %v2344_v31, %v783_v35  ;;  %v795_v49 = vstv %s3172_s22  ;;  %v803_v50 = vstv %s3174_s28  ;;  %v2364_v35 = vld [vmem:[%s2944_s12 + $0x2c8] sm:$0xff]  ;;  %s3254_s22 = sld [smem:[#allocation3 + $0x23]] }
  0xb8   : > { %v779_v51 = vadd.f32 %v776_v40, %v759_v32  ;;  %v780_v52 = vadd.f32 %v777_v41, %v760_v33  ;;  %v781_v53 = vadd.f32 %v778_v42, %v761_v36  ;;  %v787_v54 = vadd.f32 %v784_v43, %v767_v37  ;;  %s3256_s28 = sld [smem:[#allocation3 + $0xa3]] }
  0xb9   : > { %v788_v55 = vadd.f32 %v785_v46, %v768_v38  ;;  %v789_v56 = vadd.f32 %v786_v47, %v769_v39  ;;  %v796_v57 = vmul.f32 %v2347_v44, %v795_v49  ;;  %v797_v58 = vmul.f32 %v2348_v45, %v795_v49 }
  0xba   : > { %v798_v60 = vmul.f32 %v2349_v48, %v795_v49  ;;  %v804_v61 = vmul.f32 %v2347_v44, %v803_v50  ;;  %v805_v62 = vmul.f32 %v2348_v45, %v803_v50  ;;  %v806_v63 = vmul.f32 %v2349_v48, %v803_v50  ;;  %v2367_v48 = vld [vmem:[%s2944_s12 + $0x2d0] sm:$0xff]  ;;  %v2368_v49 = vld [vmem:[%s2944_s12 + $0x2d8] sm:$0xff] }
  0xbb   : > { %v799_v2 = vadd.f32 %v796_v57, %v779_v51  ;;  %v800_v3 = vadd.f32 %v797_v58, %v780_v52  ;;  %v815_v4 = vstv %s3182_s11  ;;  %v823_v5 = vstv %s3184_s13  ;;  %v2369_v52 = vld [vmem:[%s2944_s12 + $0x2e0] sm:$0xff]  ;;  %s3262_s11 = sld [smem:[#allocation3 + $0x24]] }
  0xbc   : > { %v801_v6 = vadd.f32 %v798_v60, %v781_v53  ;;  %v807_v7 = vadd.f32 %v804_v61, %v787_v54  ;;  %v808_v8 = vadd.f32 %v805_v62, %v788_v55  ;;  %v809_v9 = vadd.f32 %v806_v63, %v789_v56  ;;  %v2372_v63 = vld [vmem:[%s2944_s12 + $0x2e8] sm:$0xff]  ;;  %s3264_s13 = sld [smem:[#allocation3 + $0xa4]] }
  0xbd   : > { %v816_v10 = vmul.f32 %v2352_v59, %v815_v4  ;;  %v817_v11 = vmul.f32 %v2353_v0, %v815_v4  ;;  %v818_v12 = vmul.f32 %v2354_v1, %v815_v4  ;;  %v824_v13 = vmul.f32 %v2352_v59, %v823_v5  ;;  %v2373_v4 = vld [vmem:[%s2944_s12 + $0x2f0] sm:$0xff] }
  0xbe   : > { %v825_v16 = vmul.f32 %v2353_v0, %v823_v5  ;;  %v826_v17 = vmul.f32 %v2354_v1, %v823_v5  ;;  %v835_v19 = vstv %s3190_s16  ;;  %v843_v20 = vstv %s3192_s15  ;;  %v2374_v5 = vld [vmem:[%s2944_s12 + $0x2f8] sm:$0xff]  ;;  %s3272_s16 = sld [smem:[#allocation3 + $0x25]] }
  0xbf   : > { %v819_v21 = vadd.f32 %v816_v10, %v799_v2  ;;  %v820_v22 = vadd.f32 %v817_v11, %v800_v3  ;;  %v821_v23 = vadd.f32 %v818_v12, %v801_v6  ;;  %v827_v24 = vadd.f32 %v824_v13, %v807_v7  ;;  %s3274_s15 = sld [smem:[#allocation3 + $0xa5]] }
  0xc0   : > { %v828_v25 = vadd.f32 %v825_v16, %v808_v8  ;;  %v829_v26 = vadd.f32 %v826_v17, %v809_v9  ;;  %v836_v27 = vmul.f32 %v2357_v14, %v835_v19  ;;  %v837_v28 = vmul.f32 %v2358_v15, %v835_v19 }
  0xc1   : > { %v838_v30 = vmul.f32 %v2359_v18, %v835_v19  ;;  %v844_v31 = vmul.f32 %v2357_v14, %v843_v20  ;;  %v845_v32 = vmul.f32 %v2358_v15, %v843_v20  ;;  %v846_v33 = vmul.f32 %v2359_v18, %v843_v20  ;;  %v2377_v18 = vld [vmem:[%s2944_s12 + $0x300] sm:$0xff]  ;;  %v2378_v19 = vld [vmem:[%s2944_s12 + $0x308] sm:$0xff] }
  0xc2   : > { %v839_v36 = vadd.f32 %v836_v27, %v819_v21  ;;  %v840_v37 = vadd.f32 %v837_v28, %v820_v22  ;;  %v855_v38 = vstv %s3200_s18  ;;  %v863_v39 = vstv %s3202_s6  ;;  %v2379_v22 = vld [vmem:[%s2944_s12 + $0x310] sm:$0xff]  ;;  %s3280_s18 = sld [smem:[#allocation3 + $0x26]] }
  0xc3   : > { %v841_v40 = vadd.f32 %v838_v30, %v821_v23  ;;  %v847_v41 = vadd.f32 %v844_v31, %v827_v24  ;;  %v848_v42 = vadd.f32 %v845_v32, %v828_v25  ;;  %v849_v43 = vadd.f32 %v846_v33, %v829_v26  ;;  %v2382_v33 = vld [vmem:[%s2944_s12 + $0x318] sm:$0xff]  ;;  %s3282_s6 = sld [smem:[#allocation3 + $0xa6]] }
  0xc4   : > { %v856_v44 = vmul.f32 %v2362_v29, %v855_v38  ;;  %v857_v45 = vmul.f32 %v2363_v34, %v855_v38  ;;  %v858_v46 = vmul.f32 %v2364_v35, %v855_v38  ;;  %v864_v47 = vmul.f32 %v2362_v29, %v863_v39  ;;  %v2383_v38 = vld [vmem:[%s2944_s12 + $0x320] sm:$0xff] }
  0xc5   : > { %v865_v50 = vmul.f32 %v2363_v34, %v863_v39  ;;  %v866_v51 = vmul.f32 %v2364_v35, %v863_v39  ;;  %v875_v53 = vstv %s3208_s19  ;;  %v883_v54 = vstv %s3210_s29  ;;  %v2384_v39 = vld [vmem:[%s2944_s12 + $0x328] sm:$0xff]  ;;  %s3290_s19 = sld [smem:[#allocation3 + $0x27]] }
  0xc6   : > { %v859_v55 = vadd.f32 %v856_v44, %v839_v36  ;;  %v860_v56 = vadd.f32 %v857_v45, %v840_v37  ;;  %v861_v57 = vadd.f32 %v858_v46, %v841_v40  ;;  %v867_v58 = vadd.f32 %v864_v47, %v847_v41  ;;  %s3292_s29 = sld [smem:[#allocation3 + $0xa7]] }
  0xc7   : > { %v868_v59 = vadd.f32 %v865_v50, %v848_v42  ;;  %v869_v60 = vadd.f32 %v866_v51, %v849_v43  ;;  %v876_v61 = vmul.f32 %v2367_v48, %v875_v53  ;;  %v877_v62 = vmul.f32 %v2368_v49, %v875_v53 }
  0xc8   : > { %v878_v0 = vmul.f32 %v2369_v52, %v875_v53  ;;  %v884_v1 = vmul.f32 %v2367_v48, %v883_v54  ;;  %v885_v2 = vmul.f32 %v2368_v49, %v883_v54  ;;  %v886_v3 = vmul.f32 %v2369_v52, %v883_v54  ;;  %v2387_v52 = vld [vmem:[%s2944_s12 + $0x330] sm:$0xff]  ;;  %v2388_v53 = vld [vmem:[%s2944_s12 + $0x338] sm:$0xff] }
  0xc9   : > { %v879_v6 = vadd.f32 %v876_v61, %v859_v55  ;;  %v880_v7 = vadd.f32 %v877_v62, %v860_v56  ;;  %v895_v8 = vstv %s3218_s20  ;;  %v903_v9 = vstv %s3220_s25  ;;  %v2389_v56 = vld [vmem:[%s2944_s12 + $0x340] sm:$0xff]  ;;  %s3298_s20 = sld [smem:[#allocation3 + $0x28]] }
  0xca   : > { %v881_v10 = vadd.f32 %v878_v0, %v861_v57  ;;  %v887_v11 = vadd.f32 %v884_v1, %v867_v58  ;;  %v888_v12 = vadd.f32 %v885_v2, %v868_v59  ;;  %v889_v13 = vadd.f32 %v886_v3, %v869_v60  ;;  %v2392_v3 = vld [vmem:[%s2944_s12 + $0x348] sm:$0xff]  ;;  %s3300_s25 = sld [smem:[#allocation3 + $0xa8]] }
  0xcb   : > { %v896_v14 = vmul.f32 %v2372_v63, %v895_v8  ;;  %v897_v15 = vmul.f32 %v2373_v4, %v895_v8  ;;  %v898_v16 = vmul.f32 %v2374_v5, %v895_v8  ;;  %v904_v17 = vmul.f32 %v2372_v63, %v903_v9  ;;  %v2393_v8 = vld [vmem:[%s2944_s12 + $0x350] sm:$0xff] }
  0xcc   : > { %v905_v20 = vmul.f32 %v2373_v4, %v903_v9  ;;  %v906_v21 = vmul.f32 %v2374_v5, %v903_v9  ;;  %v915_v23 = vstv %s3226_s26  ;;  %v923_v24 = vstv %s3228_s7  ;;  %v2394_v9 = vld [vmem:[%s2944_s12 + $0x358] sm:$0xff]  ;;  %s3308_s26 = sld [smem:[#allocation3 + $0x29]] }
  0xcd   : > { %v899_v25 = vadd.f32 %v896_v14, %v879_v6  ;;  %v900_v26 = vadd.f32 %v897_v15, %v880_v7  ;;  %v901_v27 = vadd.f32 %v898_v16, %v881_v10  ;;  %v907_v28 = vadd.f32 %v904_v17, %v887_v11  ;;  %s3310_s7 = sld [smem:[#allocation3 + $0xa9]] }
  0xce   : > { %v908_v29 = vadd.f32 %v905_v20, %v888_v12  ;;  %v909_v30 = vadd.f32 %v906_v21, %v889_v13  ;;  %v916_v31 = vmul.f32 %v2377_v18, %v915_v23  ;;  %v917_v32 = vmul.f32 %v2378_v19, %v915_v23 }
  0xcf   : > { %v918_v34 = vmul.f32 %v2379_v22, %v915_v23  ;;  %v924_v35 = vmul.f32 %v2377_v18, %v923_v24  ;;  %v925_v36 = vmul.f32 %v2378_v19, %v923_v24  ;;  %v926_v37 = vmul.f32 %v2379_v22, %v923_v24  ;;  %v2397_v22 = vld [vmem:[%s2944_s12 + $0x360] sm:$0xff]  ;;  %v2398_v23 = vld [vmem:[%s2944_s12 + $0x368] sm:$0xff] }
  0xd0   : > { %v919_v40 = vadd.f32 %v916_v31, %v899_v25  ;;  %v920_v41 = vadd.f32 %v917_v32, %v900_v26  ;;  %v935_v42 = vstv %s3236_s8  ;;  %v943_v43 = vstv %s3238_s9  ;;  %v2399_v26 = vld [vmem:[%s2944_s12 + $0x370] sm:$0xff]  ;;  %s3316_s8 = sld [smem:[#allocation3 + $0x2a]] }
  0xd1   : > { %v921_v44 = vadd.f32 %v918_v34, %v901_v27  ;;  %v927_v45 = vadd.f32 %v924_v35, %v907_v28  ;;  %v928_v46 = vadd.f32 %v925_v36, %v908_v29  ;;  %v929_v47 = vadd.f32 %v926_v37, %v909_v30  ;;  %v2402_v37 = vld [vmem:[%s2944_s12 + $0x378] sm:$0xff]  ;;  %s3318_s9 = sld [smem:[#allocation3 + $0xaa]] }
  0xd2   : > { %v936_v48 = vmul.f32 %v2382_v33, %v935_v42  ;;  %v937_v49 = vmul.f32 %v2383_v38, %v935_v42  ;;  %v938_v50 = vmul.f32 %v2384_v39, %v935_v42  ;;  %v944_v51 = vmul.f32 %v2382_v33, %v943_v43  ;;  %v2403_v42 = vld [vmem:[%s2944_s12 + $0x380] sm:$0xff] }
  0xd3   : > { %v945_v54 = vmul.f32 %v2383_v38, %v943_v43  ;;  %v946_v55 = vmul.f32 %v2384_v39, %v943_v43  ;;  %v955_v57 = vstv %s3244_s14  ;;  %v963_v58 = vstv %s3246_s17  ;;  %v2404_v43 = vld [vmem:[%s2944_s12 + $0x388] sm:$0xff]  ;;  %s3326_s14 = sld [smem:[#allocation3 + $0x2b]] }
  0xd4   : > { %v939_v59 = vadd.f32 %v936_v48, %v919_v40  ;;  %v940_v60 = vadd.f32 %v937_v49, %v920_v41  ;;  %v941_v61 = vadd.f32 %v938_v50, %v921_v44  ;;  %v947_v62 = vadd.f32 %v944_v51, %v927_v45  ;;  %s3328_s17 = sld [smem:[#allocation3 + $0xab]] }
  0xd5   : > { %v948_v63 = vadd.f32 %v945_v54, %v928_v46  ;;  %v949_v0 = vadd.f32 %v946_v55, %v929_v47  ;;  %v956_v1 = vmul.f32 %v2387_v52, %v955_v57  ;;  %v957_v2 = vmul.f32 %v2388_v53, %v955_v57 }
  0xd6   : > { %v958_v4 = vmul.f32 %v2389_v56, %v955_v57  ;;  %v964_v5 = vmul.f32 %v2387_v52, %v963_v58  ;;  %v965_v6 = vmul.f32 %v2388_v53, %v963_v58  ;;  %v966_v7 = vmul.f32 %v2389_v56, %v963_v58  ;;  %v2407_v56 = vld [vmem:[%s2944_s12 + $0x390] sm:$0xff]  ;;  %v2408_v57 = vld [vmem:[%s2944_s12 + $0x398] sm:$0xff] }
  0xd7   : > { %v959_v10 = vadd.f32 %v956_v1, %v939_v59  ;;  %v960_v11 = vadd.f32 %v957_v2, %v940_v60  ;;  %v975_v12 = vstv %s3254_s22  ;;  %v983_v13 = vstv %s3256_s28  ;;  %v2409_v60 = vld [vmem:[%s2944_s12 + $0x3a0] sm:$0xff]  ;;  %s3334_s22 = sld [smem:[#allocation3 + $0x2c]] }
  0xd8   : > { %v961_v14 = vadd.f32 %v958_v4, %v941_v61  ;;  %v967_v15 = vadd.f32 %v964_v5, %v947_v62  ;;  %v968_v16 = vadd.f32 %v965_v6, %v948_v63  ;;  %v969_v17 = vadd.f32 %v966_v7, %v949_v0  ;;  %v2412_v7 = vld [vmem:[%s2944_s12 + $0x3a8] sm:$0xff]  ;;  %s3336_s28 = sld [smem:[#allocation3 + $0xac]] }
  0xd9   : > { %v976_v18 = vmul.f32 %v2392_v3, %v975_v12  ;;  %v977_v19 = vmul.f32 %v2393_v8, %v975_v12  ;;  %v978_v20 = vmul.f32 %v2394_v9, %v975_v12  ;;  %v984_v21 = vmul.f32 %v2392_v3, %v983_v13  ;;  %v2413_v12 = vld [vmem:[%s2944_s12 + $0x3b0] sm:$0xff] }
  0xda   : > { %v985_v24 = vmul.f32 %v2393_v8, %v983_v13  ;;  %v986_v25 = vmul.f32 %v2394_v9, %v983_v13  ;;  %v995_v27 = vstv %s3262_s11  ;;  %v1003_v28 = vstv %s3264_s13  ;;  %v2414_v13 = vld [vmem:[%s2944_s12 + $0x3b8] sm:$0xff]  ;;  %s3344_s11 = sld [smem:[#allocation3 + $0x2d]] }
  0xdb   : > { %v979_v29 = vadd.f32 %v976_v18, %v959_v10  ;;  %v980_v30 = vadd.f32 %v977_v19, %v960_v11  ;;  %v981_v31 = vadd.f32 %v978_v20, %v961_v14  ;;  %v987_v32 = vadd.f32 %v984_v21, %v967_v15  ;;  %s3346_s13 = sld [smem:[#allocation3 + $0xad]] }
  0xdc   : > { %v988_v33 = vadd.f32 %v985_v24, %v968_v16  ;;  %v989_v34 = vadd.f32 %v986_v25, %v969_v17  ;;  %v996_v35 = vmul.f32 %v2397_v22, %v995_v27  ;;  %v997_v36 = vmul.f32 %v2398_v23, %v995_v27 }
  0xdd   : > { %v998_v38 = vmul.f32 %v2399_v26, %v995_v27  ;;  %v1004_v39 = vmul.f32 %v2397_v22, %v1003_v28  ;;  %v1005_v40 = vmul.f32 %v2398_v23, %v1003_v28  ;;  %v1006_v41 = vmul.f32 %v2399_v26, %v1003_v28  ;;  %v2417_v26 = vld [vmem:[%s2944_s12 + $0x3c0] sm:$0xff]  ;;  %v2418_v27 = vld [vmem:[%s2944_s12 + $0x3c8] sm:$0xff] }
  0xde   : > { %v999_v44 = vadd.f32 %v996_v35, %v979_v29  ;;  %v1000_v45 = vadd.f32 %v997_v36, %v980_v30  ;;  %v1015_v46 = vstv %s3272_s16  ;;  %v1023_v47 = vstv %s3274_s15  ;;  %v2419_v30 = vld [vmem:[%s2944_s12 + $0x3d0] sm:$0xff]  ;;  %s3352_s16 = sld [smem:[#allocation3 + $0x2e]] }
  0xdf   : > { %v1001_v48 = vadd.f32 %v998_v38, %v981_v31  ;;  %v1007_v49 = vadd.f32 %v1004_v39, %v987_v32  ;;  %v1008_v50 = vadd.f32 %v1005_v40, %v988_v33  ;;  %v1009_v51 = vadd.f32 %v1006_v41, %v989_v34  ;;  %v2422_v41 = vld [vmem:[%s2944_s12 + $0x3d8] sm:$0xff]  ;;  %s3354_s15 = sld [smem:[#allocation3 + $0xae]] }
  0xe0   : > { %v1016_v52 = vmul.f32 %v2402_v37, %v1015_v46  ;;  %v1017_v53 = vmul.f32 %v2403_v42, %v1015_v46  ;;  %v1018_v54 = vmul.f32 %v2404_v43, %v1015_v46  ;;  %v1024_v55 = vmul.f32 %v2402_v37, %v1023_v47  ;;  %v2423_v46 = vld [vmem:[%s2944_s12 + $0x3e0] sm:$0xff] }
  0xe1   : > { %v1025_v58 = vmul.f32 %v2403_v42, %v1023_v47  ;;  %v1026_v59 = vmul.f32 %v2404_v43, %v1023_v47  ;;  %v1035_v61 = vstv %s3280_s18  ;;  %v1043_v62 = vstv %s3282_s6  ;;  %v2424_v47 = vld [vmem:[%s2944_s12 + $0x3e8] sm:$0xff]  ;;  %s3362_s18 = sld [smem:[#allocation3 + $0x2f]] }
  0xe2   : > { %v1019_v63 = vadd.f32 %v1016_v52, %v999_v44  ;;  %v1020_v0 = vadd.f32 %v1017_v53, %v1000_v45  ;;  %v1021_v1 = vadd.f32 %v1018_v54, %v1001_v48  ;;  %v1027_v2 = vadd.f32 %v1024_v55, %v1007_v49  ;;  %s3364_s6 = sld [smem:[#allocation3 + $0xaf]] }
  0xe3   : > { %v1028_v3 = vadd.f32 %v1025_v58, %v1008_v50  ;;  %v1029_v4 = vadd.f32 %v1026_v59, %v1009_v51  ;;  %v1036_v5 = vmul.f32 %v2407_v56, %v1035_v61  ;;  %v1037_v6 = vmul.f32 %v2408_v57, %v1035_v61 }
  0xe4   : > { %v1038_v8 = vmul.f32 %v2409_v60, %v1035_v61  ;;  %v1044_v9 = vmul.f32 %v2407_v56, %v1043_v62  ;;  %v1045_v10 = vmul.f32 %v2408_v57, %v1043_v62  ;;  %v1046_v11 = vmul.f32 %v2409_v60, %v1043_v62  ;;  %v2427_v60 = vld [vmem:[%s2944_s12 + $0x3f0] sm:$0xff]  ;;  %v2428_v61 = vld [vmem:[%s2944_s12 + $0x3f8] sm:$0xff] }
  0xe5   : > { %v1039_v14 = vadd.f32 %v1036_v5, %v1019_v63  ;;  %v1040_v15 = vadd.f32 %v1037_v6, %v1020_v0  ;;  %v1055_v16 = vstv %s3290_s19  ;;  %v1063_v17 = vstv %s3292_s29  ;;  %v2429_v0 = vld [vmem:[%s2944_s12 + $0x400] sm:$0xff]  ;;  %s3370_s19 = sld [smem:[#allocation3 + $0x30]] }
  0xe6   : > { %v1041_v18 = vadd.f32 %v1038_v8, %v1021_v1  ;;  %v1047_v19 = vadd.f32 %v1044_v9, %v1027_v2  ;;  %v1048_v20 = vadd.f32 %v1045_v10, %v1028_v3  ;;  %v1049_v21 = vadd.f32 %v1046_v11, %v1029_v4  ;;  %v2432_v11 = vld [vmem:[%s2944_s12 + $0x408] sm:$0xff]  ;;  %s3372_s29 = sld [smem:[#allocation3 + $0xb0]] }
  0xe7   : > { %v1056_v22 = vmul.f32 %v2412_v7, %v1055_v16  ;;  %v1057_v23 = vmul.f32 %v2413_v12, %v1055_v16  ;;  %v1058_v24 = vmul.f32 %v2414_v13, %v1055_v16  ;;  %v1064_v25 = vmul.f32 %v2412_v7, %v1063_v17  ;;  %v2433_v16 = vld [vmem:[%s2944_s12 + $0x410] sm:$0xff] }
  0xe8   : > { %v1065_v28 = vmul.f32 %v2413_v12, %v1063_v17  ;;  %v1066_v29 = vmul.f32 %v2414_v13, %v1063_v17  ;;  %v1075_v31 = vstv %s3298_s20  ;;  %v1083_v32 = vstv %s3300_s25  ;;  %v2434_v17 = vld [vmem:[%s2944_s12 + $0x418] sm:$0xff]  ;;  %s2655_s20 = smul.u32 48, %s2940_s10  ;;  %s3383_s25 = sld [smem:[#allocation3 + $0x31]] }
  0xe9   : > { %v1059_v33 = vadd.f32 %v1056_v22, %v1039_v14  ;;  %v1060_v34 = vadd.f32 %v1057_v23, %v1040_v15  ;;  %v1061_v35 = vadd.f32 %v1058_v24, %v1041_v18  ;;  %v1067_v36 = vadd.f32 %v1064_v25, %v1047_v19  ;;  %s2649_s10 = smul.u32 (%p3774_p9), 24, %s2850_s23 }
  0xea   : > { %v1068_v37 = vadd.f32 %v1065_v28, %v1048_v20  ;;  %v1069_v38 = vadd.f32 %v1066_v29, %v1049_v21  ;;  %v1076_v39 = vmul.f32 %v2417_v26, %v1075_v31  ;;  %v1077_v40 = vmul.f32 %v2418_v27, %v1075_v31 }
  0xeb   : > { %v1078_v42 = vmul.f32 %v2419_v30, %v1075_v31  ;;  %v1084_v43 = vmul.f32 %v2417_v26, %v1083_v32  ;;  %v1085_v44 = vmul.f32 %v2418_v27, %v1083_v32  ;;  %v1086_v45 = vmul.f32 %v2419_v30, %v1083_v32  ;;  %v2437_v30 = vld [vmem:[%s2944_s12 + $0x420] sm:$0xff]  ;;  %v2438_v31 = vld [vmem:[%s2944_s12 + $0x428] sm:$0xff] }
  0xec   : > { %v1079_v48 = vadd.f32 %v1076_v39, %v1059_v33  ;;  %v1080_v49 = vadd.f32 %v1077_v40, %v1060_v34  ;;  %v1095_v50 = vstv %s3308_s26  ;;  %v1103_v51 = vstv %s3310_s7  ;;  %v2439_v34 = vld [vmem:[%s2944_s12 + $0x430] sm:$0xff]  ;;  %s3385_s26 = sld [smem:[#allocation3 + $0xb1]]  ;;  %s3387_s7 = sld [smem:[#allocation3 + $0x32]] }
  0xed   : > { %v1081_v52 = vadd.f32 %v1078_v42, %v1061_v35  ;;  %v1087_v53 = vadd.f32 %v1084_v43, %v1067_v36  ;;  %v1088_v54 = vadd.f32 %v1085_v44, %v1068_v37  ;;  %v1089_v55 = vadd.f32 %v1086_v45, %v1069_v38  ;;  %v2442_v45 = vld [vmem:[%s2944_s12 + $0x438] sm:$0xff] }
  0xee   : > { %v1096_v56 = vmul.f32 %v2422_v41, %v1095_v50  ;;  %v1097_v57 = vmul.f32 %v2423_v46, %v1095_v50  ;;  %v1098_v58 = vmul.f32 %v2424_v47, %v1095_v50  ;;  %v1104_v59 = vmul.f32 %v2422_v41, %v1103_v51  ;;  %v2443_v50 = vld [vmem:[%s2944_s12 + $0x440] sm:$0xff] }
  0xef   : > { %v1105_v62 = vmul.f32 %v2423_v46, %v1103_v51  ;;  %v1106_v63 = vmul.f32 %v2424_v47, %v1103_v51  ;;  %v1115_v1 = vstv %s3316_s8  ;;  %v1123_v2 = vstv %s3318_s9  ;;  %v2444_v51 = vld [vmem:[%s2944_s12 + $0x448] sm:$0xff]  ;;  %s3397_s8 = sld [smem:[#allocation3 + $0xb2]]  ;;  %s3401_s9 = sld [smem:[#allocation3 + $0x33]] }
  0xf0   : > { %v1099_v3 = vadd.f32 %v1096_v56, %v1079_v48  ;;  %v1100_v4 = vadd.f32 %v1097_v57, %v1080_v49  ;;  %v1101_v5 = vadd.f32 %v1098_v58, %v1081_v52  ;;  %v1107_v6 = vadd.f32 %v1104_v59, %v1087_v53 }
  0xf1   : > { %v1108_v7 = vadd.f32 %v1105_v62, %v1088_v54  ;;  %v1109_v8 = vadd.f32 %v1106_v63, %v1089_v55  ;;  %v1116_v9 = vmul.f32 %v2427_v60, %v1115_v1  ;;  %v1117_v10 = vmul.f32 %v2428_v61, %v1115_v1 }
  0xf2   : > { %v1118_v12 = vmul.f32 %v2429_v0, %v1115_v1  ;;  %v1124_v13 = vmul.f32 %v2427_v60, %v1123_v2  ;;  %v1125_v14 = vmul.f32 %v2428_v61, %v1123_v2  ;;  %v1126_v15 = vmul.f32 %v2429_v0, %v1123_v2  ;;  %v2447_v0 = vld [vmem:[%s2944_s12 + $0x450] sm:$0xff]  ;;  %v2448_v1 = vld [vmem:[%s2944_s12 + $0x458] sm:$0xff] }
  0xf3   : > { %v1119_v18 = vadd.f32 %v1116_v9, %v1099_v3  ;;  %v1120_v19 = vadd.f32 %v1117_v10, %v1100_v4  ;;  %v1135_v20 = vstv %s3326_s14  ;;  %v1143_v21 = vstv %s3328_s17  ;;  %v2449_v4 = vld [vmem:[%s2944_s12 + $0x460] sm:$0xff]  ;;  %s3405_s14 = scalar_lea.vmem [#allocation8], %s2655_s20  ;;  %s3413_s17 = sld [smem:[#allocation3 + $0xb3]] }
  0xf4   : > { %v1121_v22 = vadd.f32 %v1118_v12, %v1101_v5  ;;  %v1127_v23 = vadd.f32 %v1124_v13, %v1107_v6  ;;  %v1128_v24 = vadd.f32 %v1125_v14, %v1108_v7  ;;  %v1129_v25 = vadd.f32 %v1126_v15, %v1109_v8 }
  0xf5   : > { %v1136_v26 = vmul.f32 %v2432_v11, %v1135_v20  ;;  %v1137_v27 = vmul.f32 %v2433_v16, %v1135_v20  ;;  %v1138_v28 = vmul.f32 %v2434_v17, %v1135_v20  ;;  %v1144_v29 = vmul.f32 %v2432_v11, %v1143_v21  ;;  %v2453_v20 = vld [vmem:[%s2944_s12 + $0x470] sm:$0xff] }
  0xf6   : > { %v1145_v32 = vmul.f32 %v2433_v16, %v1143_v21  ;;  %v1146_v33 = vmul.f32 %v2434_v17, %v1143_v21  ;;  %v1155_v35 = vstv %s3334_s22  ;;  %v1163_v36 = vstv %s3336_s28  ;;  %v2454_v21 = vld [vmem:[%s2944_s12 + $0x478] sm:$0xff]  ;;  %s3415_s22 = sld [smem:[#allocation3 + $0x34]] }
  0xf7   : > { %v1139_v37 = vadd.f32 %v1136_v26, %v1119_v18  ;;  %v1140_v38 = vadd.f32 %v1137_v27, %v1120_v19  ;;  %v1141_v39 = vadd.f32 %v1138_v28, %v1121_v22  ;;  %v1147_v40 = vadd.f32 %v1144_v29, %v1127_v23  ;;  %v2452_v19 = vld [vmem:[%s2944_s12 + $0x468] sm:$0xff]  ;;  %s3424_s28 = sld [smem:[#allocation3 + $0xb4]] }
  0xf8   : > { %v1148_v41 = vadd.f32 %v1145_v32, %v1128_v24  ;;  %v1149_v42 = vadd.f32 %v1146_v33, %v1129_v25  ;;  %v1156_v43 = vmul.f32 %v2437_v30, %v1155_v35  ;;  %v1157_v44 = vmul.f32 %v2438_v31, %v1155_v35 }
  0xf9   : > { %v1158_v46 = vmul.f32 %v2439_v34, %v1155_v35  ;;  %v1164_v47 = vmul.f32 %v2437_v30, %v1163_v36  ;;  %v1165_v48 = vmul.f32 %v2438_v31, %v1163_v36  ;;  %v1166_v49 = vmul.f32 %v2439_v34, %v1163_v36  ;;  %v268_v30 = vld [vmem:[%s2952_s5] sm:$0xff]  ;;  %v2461_v36 = vld [vmem:[%s2944_s12 + $0x488] sm:$0xff] }
  0xfa   : > { %v1159_v52 = vadd.f32 %v1156_v43, %v1139_v37  ;;  %v1160_v53 = vadd.f32 %v1157_v44, %v1140_v38  ;;  %v1175_v54 = vstv %s3344_s11  ;;  %v1183_v55 = vstv %s3346_s13  ;;  %v2460_v35 = vld [vmem:[%s2944_s12 + $0x480] sm:$0xff]  ;;  %v270_v38 = vld [vmem:[%s2952_s5 + $0x10] sm:$0xff]  ;;  %s3429_s11 = sld [smem:[#allocation3 + $0x35]] }
  0xfb   : > { %v1161_v56 = vadd.f32 %v1158_v46, %v1141_v39  ;;  %v1167_v57 = vadd.f32 %v1164_v47, %v1147_v40  ;;  %v1168_v58 = vadd.f32 %v1165_v48, %v1148_v41  ;;  %v1169_v59 = vadd.f32 %v1166_v49, %v1149_v42  ;;  %v269_v37 = vld [vmem:[%s2952_s5 + $0x8] sm:$0xff]  ;;  %v2462_v47 = vld [vmem:[%s2944_s12 + $0x490] sm:$0xff]  ;;  %s3433_s13 = sld [smem:[#allocation3 + $0xb5]] }
  0xfc   : > { %v1176_v60 = vmul.f32 %v2442_v45, %v1175_v54  ;;  %v1177_v61 = vmul.f32 %v2443_v50, %v1175_v54  ;;  %v1178_v62 = vmul.f32 %v2444_v51, %v1175_v54  ;;  %v1184_v63 = vmul.f32 %v2442_v45, %v1183_v55 }
  0xfd   : > { %v1185_v2 = vmul.f32 %v2443_v50, %v1183_v55  ;;  %v1186_v3 = vmul.f32 %v2444_v51, %v1183_v55  ;;  %v1195_v5 = vstv %s3352_s16  ;;  %v1203_v6 = vstv %s3354_s15  ;;  %s3435_s16 = sld [smem:[#allocation3 + $0x36]] }
  0xfe   : > { %v1179_v7 = vadd.f32 %v1176_v60, %v1159_v52  ;;  %v1180_v8 = vadd.f32 %v1177_v61, %v1160_v53  ;;  %v1181_v9 = vadd.f32 %v1178_v62, %v1161_v56  ;;  %v1187_v10 = vadd.f32 %v1184_v63, %v1167_v57  ;;  %v2465_v60 = vld [vmem:[%s2944_s12 + $0x498] sm:$0xff]  ;;  %v2466_v61 = vld [vmem:[%s2944_s12 + $0x4a0] sm:$0xff]  ;;  %s3442_s15 = sld [smem:[#allocation3 + $0xb6]] }
  0xff   : > { %v1188_v11 = vadd.f32 %v1185_v2, %v1168_v58  ;;  %v1189_v12 = vadd.f32 %v1186_v3, %v1169_v59  ;;  %v1196_v13 = vmul.f32 %v2447_v0, %v1195_v5  ;;  %v1197_v14 = vmul.f32 %v2448_v1, %v1195_v5  ;;  %v2467_v2 = vld [vmem:[%s2944_s12 + $0x4a8] sm:$0xff]  ;;  %v2470_v3 = vld [vmem:[%s2944_s12 + $0x4b0] sm:$0xff] }
 0x100   : > { %v1198_v15 = vmul.f32 %v2449_v4, %v1195_v5  ;;  %v1204_v16 = vmul.f32 %v2447_v0, %v1203_v6  ;;  %v1205_v17 = vmul.f32 %v2448_v1, %v1203_v6  ;;  %v1206_v18 = vmul.f32 %v2449_v4, %v1203_v6 }
 0x101   : > { %v1199_v22 = vadd.f32 %v1196_v13, %v1179_v7  ;;  %v1200_v23 = vadd.f32 %v1197_v14, %v1180_v8  ;;  %v1215_v24 = vstv %s3362_s18  ;;  %v1223_v25 = vstv %s3364_s6  ;;  %v2471_v7 = vld [vmem:[%s2944_s12 + $0x4b8] sm:$0xff]  ;;  %s3447_s18 = sld [smem:[#allocation3 + $0x37]] }
 0x102   : > { %v1201_v26 = vadd.f32 %v1198_v15, %v1181_v9  ;;  %v1207_v27 = vadd.f32 %v1204_v16, %v1187_v10  ;;  %v1208_v28 = vadd.f32 %v1205_v17, %v1188_v11  ;;  %v1209_v29 = vadd.f32 %v1206_v18, %v1189_v12  ;;  %v2472_v17 = vld [vmem:[%s2944_s12 + $0x4c0] sm:$0xff]  ;;  %s3451_s6 = sld [smem:[#allocation3 + $0xb7]] }
 0x103   : > { %v1216_v31 = vmul.f32 %v2452_v19, %v1215_v24  ;;  %v1217_v32 = vmul.f32 %v2453_v20, %v1215_v24  ;;  %v1218_v33 = vmul.f32 %v2454_v21, %v1215_v24  ;;  %v1224_v34 = vmul.f32 %v2452_v19, %v1223_v25 }
 0x104   : > { %v1225_v39 = vmul.f32 %v2453_v20, %v1223_v25  ;;  %v1226_v40 = vmul.f32 %v2454_v21, %v1223_v25  ;;  %v1248_v41 = vstv %s3370_s19  ;;  %v1256_v42 = vstv %s3372_s29  ;;  %s3453_s19 = sld [smem:[#allocation3 + $0x38]] }
 0x105   : > { %v1219_v43 = vadd.f32 %v1216_v31, %v1199_v22  ;;  %v1220_v44 = vadd.f32 %v1217_v32, %v1200_v23  ;;  %v1221_v45 = vadd.f32 %v1218_v33, %v1201_v26  ;;  %v1227_v46 = vadd.f32 %v1224_v34, %v1207_v27  ;;  %v2476_v31 = vld [vmem:[%s2944_s12 + $0x4d0] sm:$0xff]  ;;  %s3460_s29 = sld [smem:[#allocation3 + $0xb8]] }
 0x106   : > { %v1228_v48 = vadd.f32 %v1225_v39, %v1208_v28  ;;  %v1229_v49 = vadd.f32 %v1226_v40, %v1209_v29  ;;  %v1249_v50 = vmul.f32 %v2460_v35, %v1248_v41  ;;  %v1250_v51 = vmul.f32 %v2461_v36, %v1248_v41 }
 0x107   : > { %v1230_v52 = vadd.f32 %v1219_v43, %v268_v30  ;;  %v1231_v53 = vadd.f32 %v1220_v44, %v269_v37  ;;  %v1232_v54 = vadd.f32 %v1221_v45, %v270_v38  ;;  %v1236_v55 = vadd.f32 %v1227_v46, %v268_v30  ;;  %v2475_v30 = vld [vmem:[%s2944_s12 + $0x4c8] sm:$0xff] }
 0x108   : > { %v1237_v56 = vadd.f32 %v1228_v48, %v269_v37  ;;  %v1238_v57 = vadd.f32 %v1229_v49, %v270_v38  ;;  %v1251_v58 = vmul.f32 %v2462_v47, %v1248_v41  ;;  %v1252_v59 = vadd.f32 %v1249_v50, %v1219_v43  ;;  %v2480_v37 = vld [vmem:[%s2944_s12 + $0x4e0] sm:$0xff]  ;;  %v2481_v41 = vld [vmem:[%s2944_s12 + $0x4e8] sm:$0xff] }
 0x109   : > { %1233 = vst [vmem:[%s3405_s14] sm:$0xff] %v1230_v52  ;;  %1234 = vst [vmem:[%s3405_s14 + $0x8] sm:$0xff] %v1231_v53  ;;  %v1253_v62 = vadd.f32 %v1250_v51, %v1220_v44  ;;  %v1257_v63 = vmul.f32 %v2460_v35, %v1256_v42  ;;  %v1258_v0 = vmul.f32 %v2461_v36, %v1256_v42  ;;  %v1268_v5 = vstv %s3383_s25  ;;  %v2477_v36 = vld [vmem:[%s2944_s12 + $0x4d8] sm:$0xff]  ;;  %s3465_s25 = sld [smem:[#allocation3 + $0x39]] }
 0x10a   : > { %1235 = vst [vmem:[%s3405_s14 + $0x10] sm:$0xff] %v1232_v54  ;;  %2457 = vst [vmem:[%s3405_s14 + $0x18] sm:$0xff] %v1236_v55  ;;  %v1259_v1 = vmul.f32 %v2462_v47, %v1256_v42  ;;  %v1254_v4 = vadd.f32 %v1251_v58, %v1221_v45  ;;  %v1276_v6 = vstv %s3385_s26  ;;  %v1288_v8 = vstv %s3387_s7  ;;  %s3469_s26 = sld [smem:[#allocation3 + $0xb9]]  ;;  %s3471_s7 = sld [smem:[#allocation3 + $0x3a]] }
 0x10b   : > { %2458 = vst [vmem:[%s3405_s14 + $0x20] sm:$0xff] %v1237_v56  ;;  %2459 = vst [vmem:[%s3405_s14 + $0x28] sm:$0xff] %v1238_v57  ;;  %v1260_v9 = vadd.f32 %v1257_v63, %v1227_v46  ;;  %v1261_v10 = vadd.f32 %v1258_v0, %v1228_v48  ;;  %v1269_v12 = vmul.f32 %v2465_v60, %v1268_v5  ;;  %v1296_v29 = vstv %s3397_s8  ;;  %v2482_v51 = vld [vmem:[%s2944_s12 + $0x4f0] sm:$0xff]  ;;  %s3478_s8 = sld [smem:[#allocation3 + $0xba]] }
 0x10c   : > { %v1262_v11 = vadd.f32 %v1259_v1, %v1229_v49  ;;  %v1270_v13 = vmul.f32 %v2466_v61, %v1268_v5  ;;  %v1271_v14 = vmul.f32 %v2467_v2, %v1268_v5  ;;  %v1277_v15 = vmul.f32 %v2465_v60, %v1276_v6  ;;  %v2485_v0 = vld [vmem:[%s2944_s12 + $0x4f8] sm:$0xff]  ;;  %v2486_v1 = vld [vmem:[%s2944_s12 + $0x500] sm:$0xff] }
 0x10d   : > { %v1278_v16 = vmul.f32 %v2466_v61, %v1276_v6  ;;  %v1272_v18 = vadd.f32 %v1269_v12, %v1252_v59  ;;  %v1279_v19 = vmul.f32 %v2467_v2, %v1276_v6  ;;  %v1289_v20 = vmul.f32 %v2470_v3, %v1288_v8  ;;  %v2487_v6 = vld [vmem:[%s2944_s12 + $0x508] sm:$0xff] }
 0x10e   : > { %v1290_v21 = vmul.f32 %v2471_v7, %v1288_v8  ;;  %v1273_v22 = vadd.f32 %v1270_v13, %v1253_v62  ;;  %v1274_v23 = vadd.f32 %v1271_v14, %v1254_v4  ;;  %v1280_v24 = vadd.f32 %v1277_v15, %v1260_v9 }
 0x10f   : > { %v1281_v25 = vadd.f32 %v1278_v16, %v1261_v10  ;;  %v1282_v26 = vadd.f32 %v1279_v19, %v1262_v11  ;;  %v1291_v27 = vmul.f32 %v2472_v17, %v1288_v8  ;;  %v1292_v28 = vadd.f32 %v1289_v20, %v1272_v18  ;;  %v2491_v11 = vld [vmem:[%s2944_s12 + $0x518] sm:$0xff] }
 0x110   : > { %v1293_v32 = vadd.f32 %v1290_v21, %v1273_v22  ;;  %v1297_v33 = vmul.f32 %v2470_v3, %v1296_v29  ;;  %v1298_v34 = vmul.f32 %v2471_v7, %v1296_v29  ;;  %v1299_v35 = vmul.f32 %v2472_v17, %v1296_v29  ;;  %v2490_v7 = vld [vmem:[%s2944_s12 + $0x510] sm:$0xff]  ;;  %v2492_v21 = vld [vmem:[%s2944_s12 + $0x520] sm:$0xff] }
 0x111   : > { %v1294_v38 = vadd.f32 %v1291_v27, %v1274_v23  ;;  %v1308_v39 = vstv %s3401_s9  ;;  %v1316_v40 = vstv %s3413_s17  ;;  %v1328_v42 = vstv %s3415_s22  ;;  %s3483_s9 = sld [smem:[#allocation3 + $0x3b]]  ;;  %s3489_s22 = sld [smem:[#allocation3 + $0x3c]] }
 0x112   : > { %v1300_v43 = vadd.f32 %v1297_v33, %v1280_v24  ;;  %v1301_v44 = vadd.f32 %v1298_v34, %v1281_v25  ;;  %v1302_v45 = vadd.f32 %v1299_v35, %v1282_v26  ;;  %v1309_v46 = vmul.f32 %v2475_v30, %v1308_v39  ;;  %v2495_v34 = vld [vmem:[%s2944_s12 + $0x528] sm:$0xff]  ;;  %v2496_v35 = vld [vmem:[%s2944_s12 + $0x530] sm:$0xff]  ;;  %s3487_s17 = sld [smem:[#allocation3 + $0xbb]] }
 0x113   : > { %v1310_v47 = vmul.f32 %v2476_v31, %v1308_v39  ;;  %v1311_v48 = vmul.f32 %v2477_v36, %v1308_v39  ;;  %v1317_v49 = vmul.f32 %v2475_v30, %v1316_v40  ;;  %v1318_v50 = vmul.f32 %v2476_v31, %v1316_v40 }
 0x114   : > { %v1312_v52 = vadd.f32 %v1309_v46, %v1292_v28  ;;  %v1319_v53 = vmul.f32 %v2477_v36, %v1316_v40  ;;  %v1329_v54 = vmul.f32 %v2480_v37, %v1328_v42  ;;  %v1330_v55 = vmul.f32 %v2481_v41, %v1328_v42  ;;  %v2497_v40 = vld [vmem:[%s2944_s12 + $0x538] sm:$0xff] }
 0x115   : > { %v1313_v56 = vadd.f32 %v1310_v47, %v1293_v32  ;;  %v1314_v57 = vadd.f32 %v1311_v48, %v1294_v38  ;;  %v1320_v58 = vadd.f32 %v1317_v49, %v1300_v43  ;;  %v1321_v59 = vadd.f32 %v1318_v50, %v1301_v44 }
 0x116   : > { %v1322_v60 = vadd.f32 %v1319_v53, %v1302_v45  ;;  %v1331_v61 = vmul.f32 %v2482_v51, %v1328_v42  ;;  %v1332_v62 = vadd.f32 %v1329_v54, %v1312_v52  ;;  %v1336_v63 = vstv %s3424_s28  ;;  %v2501_v45 = vld [vmem:[%s2944_s12 + $0x548] sm:$0xff]  ;;  %s3496_s28 = sld [smem:[#allocation3 + $0xbc]] }
 0x117   : > { %v1333_v2 = vadd.f32 %v1330_v55, %v1313_v56  ;;  %v1337_v3 = vmul.f32 %v2480_v37, %v1336_v63  ;;  %v1338_v4 = vmul.f32 %v2481_v41, %v1336_v63  ;;  %v1339_v5 = vmul.f32 %v2482_v51, %v1336_v63  ;;  %v2500_v41 = vld [vmem:[%s2944_s12 + $0x540] sm:$0xff]  ;;  %v2502_v55 = vld [vmem:[%s2944_s12 + $0x550] sm:$0xff] }
 0x118   : > { %v1334_v8 = vadd.f32 %v1331_v61, %v1314_v57  ;;  %v1348_v9 = vstv %s3429_s11  ;;  %v1356_v10 = vstv %s3433_s13  ;;  %v1368_v12 = vstv %s3435_s16  ;;  %s3501_s11 = sld [smem:[#allocation3 + $0x3d]]  ;;  %s3507_s16 = sld [smem:[#allocation3 + $0x3e]] }
 0x119   : > { %v1340_v13 = vadd.f32 %v1337_v3, %v1320_v58  ;;  %v1341_v14 = vadd.f32 %v1338_v4, %v1321_v59  ;;  %v1342_v15 = vadd.f32 %v1339_v5, %v1322_v60  ;;  %v1349_v16 = vmul.f32 %v2485_v0, %v1348_v9  ;;  %v2505_v4 = vld [vmem:[%s2944_s12 + $0x558] sm:$0xff]  ;;  %v2506_v5 = vld [vmem:[%s2944_s12 + $0x560] sm:$0xff]  ;;  %s3505_s13 = sld [smem:[#allocation3 + $0xbd]] }
 0x11a   : > { %v1350_v17 = vmul.f32 %v2486_v1, %v1348_v9  ;;  %v1351_v18 = vmul.f32 %v2487_v6, %v1348_v9  ;;  %v1357_v19 = vmul.f32 %v2485_v0, %v1356_v10  ;;  %v1358_v20 = vmul.f32 %v2486_v1, %v1356_v10 }
 0x11b   : > { %v1352_v22 = vadd.f32 %v1349_v16, %v1332_v62  ;;  %v1359_v23 = vmul.f32 %v2487_v6, %v1356_v10  ;;  %v1369_v24 = vmul.f32 %v2490_v7, %v1368_v12  ;;  %v1370_v25 = vmul.f32 %v2491_v11, %v1368_v12  ;;  %v2507_v10 = vld [vmem:[%s2944_s12 + $0x568] sm:$0xff] }
 0x11c   : > { %v1353_v26 = vadd.f32 %v1350_v17, %v1333_v2  ;;  %v1354_v27 = vadd.f32 %v1351_v18, %v1334_v8  ;;  %v1360_v28 = vadd.f32 %v1357_v19, %v1340_v13  ;;  %v1361_v29 = vadd.f32 %v1358_v20, %v1341_v14 }
 0x11d   : > { %v1362_v30 = vadd.f32 %v1359_v23, %v1342_v15  ;;  %v1371_v31 = vmul.f32 %v2492_v21, %v1368_v12  ;;  %v1372_v32 = vadd.f32 %v1369_v24, %v1352_v22  ;;  %v1376_v33 = vstv %s3442_s15  ;;  %v2511_v15 = vld [vmem:[%s2944_s12 + $0x578] sm:$0xff]  ;;  %s3514_s15 = sld [smem:[#allocation3 + $0xbe]] }
 0x11e   : > { %v1373_v36 = vadd.f32 %v1370_v25, %v1353_v26  ;;  %v1377_v37 = vmul.f32 %v2490_v7, %v1376_v33  ;;  %v1378_v38 = vmul.f32 %v2491_v11, %v1376_v33  ;;  %v1379_v39 = vmul.f32 %v2492_v21, %v1376_v33  ;;  %v2510_v11 = vld [vmem:[%s2944_s12 + $0x570] sm:$0xff]  ;;  %v2512_v25 = vld [vmem:[%s2944_s12 + $0x580] sm:$0xff] }
 0x11f   : > { %v1374_v42 = vadd.f32 %v1371_v31, %v1354_v27  ;;  %v1388_v43 = vstv %s3447_s18  ;;  %v1396_v44 = vstv %s3451_s6  ;;  %v1408_v46 = vstv %s3453_s19  ;;  %s3519_s18 = sld [smem:[#allocation3 + $0x3f]]  ;;  %s3525_s19 = sld [smem:[#allocation3 + $0x40]] }
 0x120   : > { %v1380_v47 = vadd.f32 %v1377_v37, %v1360_v28  ;;  %v1381_v48 = vadd.f32 %v1378_v38, %v1361_v29  ;;  %v1382_v49 = vadd.f32 %v1379_v39, %v1362_v30  ;;  %v1389_v50 = vmul.f32 %v2495_v34, %v1388_v43  ;;  %v2515_v38 = vld [vmem:[%s2944_s12 + $0x588] sm:$0xff]  ;;  %v2516_v39 = vld [vmem:[%s2944_s12 + $0x590] sm:$0xff]  ;;  %s3523_s6 = sld [smem:[#allocation3 + $0xbf]] }
 0x121   : > { %v1390_v51 = vmul.f32 %v2496_v35, %v1388_v43  ;;  %v1391_v52 = vmul.f32 %v2497_v40, %v1388_v43  ;;  %v1397_v53 = vmul.f32 %v2495_v34, %v1396_v44  ;;  %v1398_v54 = vmul.f32 %v2496_v35, %v1396_v44 }
 0x122   : > { %v1392_v56 = vadd.f32 %v1389_v50, %v1372_v32  ;;  %v1399_v57 = vmul.f32 %v2497_v40, %v1396_v44  ;;  %v1409_v58 = vmul.f32 %v2500_v41, %v1408_v46  ;;  %v1410_v59 = vmul.f32 %v2501_v45, %v1408_v46  ;;  %v2517_v44 = vld [vmem:[%s2944_s12 + $0x598] sm:$0xff] }
 0x123   : > { %v1393_v60 = vadd.f32 %v1390_v51, %v1373_v36  ;;  %v1394_v61 = vadd.f32 %v1391_v52, %v1374_v42  ;;  %v1400_v62 = vadd.f32 %v1397_v53, %v1380_v47  ;;  %v1401_v63 = vadd.f32 %v1398_v54, %v1381_v48 }
 0x124   : > { %v1402_v0 = vadd.f32 %v1399_v57, %v1382_v49  ;;  %v1411_v1 = vmul.f32 %v2502_v55, %v1408_v46  ;;  %v1412_v2 = vadd.f32 %v1409_v58, %v1392_v56  ;;  %v1416_v3 = vstv %s3460_s29  ;;  %v2521_v49 = vld [vmem:[%s2944_s12 + $0x5a8] sm:$0xff]  ;;  %s3532_s29 = sld [smem:[#allocation3 + $0xc0]] }
 0x125   : > { %v1413_v6 = vadd.f32 %v1410_v59, %v1393_v60  ;;  %v1417_v7 = vmul.f32 %v2500_v41, %v1416_v3  ;;  %v1418_v8 = vmul.f32 %v2501_v45, %v1416_v3  ;;  %v1419_v9 = vmul.f32 %v2502_v55, %v1416_v3  ;;  %v2520_v45 = vld [vmem:[%s2944_s12 + $0x5a0] sm:$0xff]  ;;  %v2522_v59 = vld [vmem:[%s2944_s12 + $0x5b0] sm:$0xff] }
 0x126   : > { %v1414_v12 = vadd.f32 %v1411_v1, %v1394_v61  ;;  %v1428_v13 = vstv %s3465_s25  ;;  %v1436_v14 = vstv %s3469_s26  ;;  %v1448_v16 = vstv %s3471_s7  ;;  %s3537_s25 = sld [smem:[#allocation3 + $0x41]]  ;;  %s3543_s7 = sld [smem:[#allocation3 + $0x42]] }
 0x127   : > { %v1420_v17 = vadd.f32 %v1417_v7, %v1400_v62  ;;  %v1421_v18 = vadd.f32 %v1418_v8, %v1401_v63  ;;  %v1422_v19 = vadd.f32 %v1419_v9, %v1402_v0  ;;  %v1429_v20 = vmul.f32 %v2505_v4, %v1428_v13  ;;  %v2525_v8 = vld [vmem:[%s2944_s12 + $0x5b8] sm:$0xff]  ;;  %v2526_v9 = vld [vmem:[%s2944_s12 + $0x5c0] sm:$0xff]  ;;  %s3541_s26 = sld [smem:[#allocation3 + $0xc1]] }
 0x128   : > { %v1430_v21 = vmul.f32 %v2506_v5, %v1428_v13  ;;  %v1431_v22 = vmul.f32 %v2507_v10, %v1428_v13  ;;  %v1437_v23 = vmul.f32 %v2505_v4, %v1436_v14  ;;  %v1438_v24 = vmul.f32 %v2506_v5, %v1436_v14 }
 0x129   : > { %v1432_v26 = vadd.f32 %v1429_v20, %v1412_v2  ;;  %v1439_v27 = vmul.f32 %v2507_v10, %v1436_v14  ;;  %v1449_v28 = vmul.f32 %v2510_v11, %v1448_v16  ;;  %v1450_v29 = vmul.f32 %v2511_v15, %v1448_v16  ;;  %v2527_v14 = vld [vmem:[%s2944_s12 + $0x5c8] sm:$0xff] }
 0x12a   : > { %v1433_v30 = vadd.f32 %v1430_v21, %v1413_v6  ;;  %v1434_v31 = vadd.f32 %v1431_v22, %v1414_v12  ;;  %v1440_v32 = vadd.f32 %v1437_v23, %v1420_v17  ;;  %v1441_v33 = vadd.f32 %v1438_v24, %v1421_v18 }
 0x12b   : > { %v1442_v34 = vadd.f32 %v1439_v27, %v1422_v19  ;;  %v1451_v35 = vmul.f32 %v2512_v25, %v1448_v16  ;;  %v1452_v36 = vadd.f32 %v1449_v28, %v1432_v26  ;;  %v1456_v37 = vstv %s3478_s8  ;;  %v2531_v19 = vld [vmem:[%s2944_s12 + $0x5d8] sm:$0xff]  ;;  %s3550_s8 = sld [smem:[#allocation3 + $0xc2]] }
 0x12c   : > { %v1453_v40 = vadd.f32 %v1450_v29, %v1433_v30  ;;  %v1457_v41 = vmul.f32 %v2510_v11, %v1456_v37  ;;  %v1458_v42 = vmul.f32 %v2511_v15, %v1456_v37  ;;  %v1459_v43 = vmul.f32 %v2512_v25, %v1456_v37  ;;  %v2530_v15 = vld [vmem:[%s2944_s12 + $0x5d0] sm:$0xff]  ;;  %v2532_v29 = vld [vmem:[%s2944_s12 + $0x5e0] sm:$0xff] }
 0x12d   : > { %v1454_v46 = vadd.f32 %v1451_v35, %v1434_v31  ;;  %v1468_v47 = vstv %s3483_s9  ;;  %v1476_v48 = vstv %s3487_s17  ;;  %v1488_v50 = vstv %s3489_s22  ;;  %s3555_s9 = sld [smem:[#allocation3 + $0x43]]  ;;  %s3561_s22 = sld [smem:[#allocation3 + $0x44]] }
 0x12e   : > { %v1460_v51 = vadd.f32 %v1457_v41, %v1440_v32  ;;  %v1461_v52 = vadd.f32 %v1458_v42, %v1441_v33  ;;  %v1462_v53 = vadd.f32 %v1459_v43, %v1442_v34  ;;  %v1469_v54 = vmul.f32 %v2515_v38, %v1468_v47  ;;  %v2535_v42 = vld [vmem:[%s2944_s12 + $0x5e8] sm:$0xff]  ;;  %v2536_v43 = vld [vmem:[%s2944_s12 + $0x5f0] sm:$0xff]  ;;  %s3559_s17 = sld [smem:[#allocation3 + $0xc3]] }
 0x12f   : > { %v1470_v55 = vmul.f32 %v2516_v39, %v1468_v47  ;;  %v1471_v56 = vmul.f32 %v2517_v44, %v1468_v47  ;;  %v1477_v57 = vmul.f32 %v2515_v38, %v1476_v48  ;;  %v1478_v58 = vmul.f32 %v2516_v39, %v1476_v48 }
 0x130   : > { %v1472_v60 = vadd.f32 %v1469_v54, %v1452_v36  ;;  %v1479_v61 = vmul.f32 %v2517_v44, %v1476_v48  ;;  %v1489_v62 = vmul.f32 %v2520_v45, %v1488_v50  ;;  %v1490_v63 = vmul.f32 %v2521_v49, %v1488_v50  ;;  %v2537_v48 = vld [vmem:[%s2944_s12 + $0x5f8] sm:$0xff] }
 0x131   : > { %v1473_v0 = vadd.f32 %v1470_v55, %v1453_v40  ;;  %v1474_v1 = vadd.f32 %v1471_v56, %v1454_v46  ;;  %v1480_v2 = vadd.f32 %v1477_v57, %v1460_v51  ;;  %v1481_v3 = vadd.f32 %v1478_v58, %v1461_v52 }
 0x132   : > { %v1482_v4 = vadd.f32 %v1479_v61, %v1462_v53  ;;  %v1491_v5 = vmul.f32 %v2522_v59, %v1488_v50  ;;  %v1492_v6 = vadd.f32 %v1489_v62, %v1472_v60  ;;  %v1496_v7 = vstv %s3496_s28  ;;  %v2541_v53 = vld [vmem:[%s2944_s12 + $0x608] sm:$0xff]  ;;  %s3568_s28 = sld [smem:[#allocation3 + $0xc4]] }
 0x133   : > { %v1493_v10 = vadd.f32 %v1490_v63, %v1473_v0  ;;  %v1497_v11 = vmul.f32 %v2520_v45, %v1496_v7  ;;  %v1498_v12 = vmul.f32 %v2521_v49, %v1496_v7  ;;  %v1499_v13 = vmul.f32 %v2522_v59, %v1496_v7  ;;  %v2540_v49 = vld [vmem:[%s2944_s12 + $0x600] sm:$0xff]  ;;  %v2542_v63 = vld [vmem:[%s2944_s12 + $0x610] sm:$0xff] }
 0x134   : > { %v1494_v16 = vadd.f32 %v1491_v5, %v1474_v1  ;;  %v1508_v17 = vstv %s3501_s11  ;;  %v1516_v18 = vstv %s3505_s13  ;;  %v1528_v20 = vstv %s3507_s16  ;;  %s3573_s11 = sld [smem:[#allocation3 + $0x45]]  ;;  %s3579_s16 = sld [smem:[#allocation3 + $0x46]] }
 0x135   : > { %v1500_v21 = vadd.f32 %v1497_v11, %v1480_v2  ;;  %v1501_v22 = vadd.f32 %v1498_v12, %v1481_v3  ;;  %v1502_v23 = vadd.f32 %v1499_v13, %v1482_v4  ;;  %v1509_v24 = vmul.f32 %v2525_v8, %v1508_v17  ;;  %v2545_v12 = vld [vmem:[%s2944_s12 + $0x618] sm:$0xff]  ;;  %v2546_v13 = vld [vmem:[%s2944_s12 + $0x620] sm:$0xff]  ;;  %s3577_s13 = sld [smem:[#allocation3 + $0xc5]] }
 0x136   : > { %v1510_v25 = vmul.f32 %v2526_v9, %v1508_v17  ;;  %v1511_v26 = vmul.f32 %v2527_v14, %v1508_v17  ;;  %v1517_v27 = vmul.f32 %v2525_v8, %v1516_v18  ;;  %v1518_v28 = vmul.f32 %v2526_v9, %v1516_v18 }
 0x137   : > { %v1512_v30 = vadd.f32 %v1509_v24, %v1492_v6  ;;  %v1519_v31 = vmul.f32 %v2527_v14, %v1516_v18  ;;  %v1529_v32 = vmul.f32 %v2530_v15, %v1528_v20  ;;  %v1530_v33 = vmul.f32 %v2531_v19, %v1528_v20  ;;  %v2547_v18 = vld [vmem:[%s2944_s12 + $0x628] sm:$0xff] }
 0x138   : > { %v1513_v34 = vadd.f32 %v1510_v25, %v1493_v10  ;;  %v1514_v35 = vadd.f32 %v1511_v26, %v1494_v16  ;;  %v1520_v36 = vadd.f32 %v1517_v27, %v1500_v21  ;;  %v1521_v37 = vadd.f32 %v1518_v28, %v1501_v22 }
 0x139   : > { %v1522_v38 = vadd.f32 %v1519_v31, %v1502_v23  ;;  %v1531_v39 = vmul.f32 %v2532_v29, %v1528_v20  ;;  %v1532_v40 = vadd.f32 %v1529_v32, %v1512_v30  ;;  %v1536_v41 = vstv %s3514_s15  ;;  %v2551_v23 = vld [vmem:[%s2944_s12 + $0x638] sm:$0xff]  ;;  %s3586_s15 = sld [smem:[#allocation3 + $0xc6]] }
 0x13a   : > { %v1533_v44 = vadd.f32 %v1530_v33, %v1513_v34  ;;  %v1537_v45 = vmul.f32 %v2530_v15, %v1536_v41  ;;  %v1538_v46 = vmul.f32 %v2531_v19, %v1536_v41  ;;  %v1539_v47 = vmul.f32 %v2532_v29, %v1536_v41  ;;  %v2550_v19 = vld [vmem:[%s2944_s12 + $0x630] sm:$0xff]  ;;  %v2552_v33 = vld [vmem:[%s2944_s12 + $0x640] sm:$0xff] }
 0x13b   : > { %v1534_v50 = vadd.f32 %v1531_v39, %v1514_v35  ;;  %v1548_v51 = vstv %s3519_s18  ;;  %v1556_v52 = vstv %s3523_s6  ;;  %v1568_v54 = vstv %s3525_s19  ;;  %s3591_s18 = sld [smem:[#allocation3 + $0x47]]  ;;  %s3597_s19 = sld [smem:[#allocation3 + $0x48]] }
 0x13c   : > { %v1540_v55 = vadd.f32 %v1537_v45, %v1520_v36  ;;  %v1541_v56 = vadd.f32 %v1538_v46, %v1521_v37  ;;  %v1542_v57 = vadd.f32 %v1539_v47, %v1522_v38  ;;  %v1549_v58 = vmul.f32 %v2535_v42, %v1548_v51  ;;  %v2555_v46 = vld [vmem:[%s2944_s12 + $0x648] sm:$0xff]  ;;  %v2556_v47 = vld [vmem:[%s2944_s12 + $0x650] sm:$0xff]  ;;  %s3595_s6 = sld [smem:[#allocation3 + $0xc7]] }
 0x13d   : > { %v1550_v59 = vmul.f32 %v2536_v43, %v1548_v51  ;;  %v1551_v60 = vmul.f32 %v2537_v48, %v1548_v51  ;;  %v1557_v61 = vmul.f32 %v2535_v42, %v1556_v52  ;;  %v1558_v62 = vmul.f32 %v2536_v43, %v1556_v52 }
 0x13e   : > { %v1552_v0 = vadd.f32 %v1549_v58, %v1532_v40  ;;  %v1559_v1 = vmul.f32 %v2537_v48, %v1556_v52  ;;  %v1569_v2 = vmul.f32 %v2540_v49, %v1568_v54  ;;  %v1570_v3 = vmul.f32 %v2541_v53, %v1568_v54  ;;  %v2557_v52 = vld [vmem:[%s2944_s12 + $0x658] sm:$0xff] }
 0x13f   : > { %v1553_v4 = vadd.f32 %v1550_v59, %v1533_v44  ;;  %v1554_v5 = vadd.f32 %v1551_v60, %v1534_v50  ;;  %v1560_v6 = vadd.f32 %v1557_v61, %v1540_v55  ;;  %v1561_v7 = vadd.f32 %v1558_v62, %v1541_v56 }
 0x140   : > { %v1562_v8 = vadd.f32 %v1559_v1, %v1542_v57  ;;  %v1571_v9 = vmul.f32 %v2542_v63, %v1568_v54  ;;  %v1572_v10 = vadd.f32 %v1569_v2, %v1552_v0  ;;  %v1576_v11 = vstv %s3532_s29  ;;  %v2561_v57 = vld [vmem:[%s2944_s12 + $0x668] sm:$0xff]  ;;  %s3604_s29 = sld [smem:[#allocation3 + $0xc8]] }
 0x141   : > { %v1573_v14 = vadd.f32 %v1570_v3, %v1553_v4  ;;  %v1577_v15 = vmul.f32 %v2540_v49, %v1576_v11  ;;  %v1578_v16 = vmul.f32 %v2541_v53, %v1576_v11  ;;  %v1579_v17 = vmul.f32 %v2542_v63, %v1576_v11  ;;  %v2560_v53 = vld [vmem:[%s2944_s12 + $0x660] sm:$0xff]  ;;  %v2562_v3 = vld [vmem:[%s2944_s12 + $0x670] sm:$0xff] }
 0x142   : > { %v1574_v20 = vadd.f32 %v1571_v9, %v1554_v5  ;;  %v1588_v21 = vstv %s3537_s25  ;;  %v1596_v22 = vstv %s3541_s26  ;;  %v1608_v24 = vstv %s3543_s7  ;;  %s3609_s25 = sld [smem:[#allocation3 + $0x49]]  ;;  %s3615_s7 = sld [smem:[#allocation3 + $0x4a]] }
 0x143   : > { %v1580_v25 = vadd.f32 %v1577_v15, %v1560_v6  ;;  %v1581_v26 = vadd.f32 %v1578_v16, %v1561_v7  ;;  %v1582_v27 = vadd.f32 %v1579_v17, %v1562_v8  ;;  %v1589_v28 = vmul.f32 %v2545_v12, %v1588_v21  ;;  %v2565_v16 = vld [vmem:[%s2944_s12 + $0x678] sm:$0xff]  ;;  %v2566_v17 = vld [vmem:[%s2944_s12 + $0x680] sm:$0xff]  ;;  %s3613_s26 = sld [smem:[#allocation3 + $0xc9]] }
 0x144   : > { %v1590_v29 = vmul.f32 %v2546_v13, %v1588_v21  ;;  %v1591_v30 = vmul.f32 %v2547_v18, %v1588_v21  ;;  %v1597_v31 = vmul.f32 %v2545_v12, %v1596_v22  ;;  %v1598_v32 = vmul.f32 %v2546_v13, %v1596_v22 }
 0x145   : > { %v1592_v34 = vadd.f32 %v1589_v28, %v1572_v10  ;;  %v1599_v35 = vmul.f32 %v2547_v18, %v1596_v22  ;;  %v1609_v36 = vmul.f32 %v2550_v19, %v1608_v24  ;;  %v1610_v37 = vmul.f32 %v2551_v23, %v1608_v24  ;;  %v2567_v22 = vld [vmem:[%s2944_s12 + $0x688] sm:$0xff] }
 0x146   : > { %v1593_v38 = vadd.f32 %v1590_v29, %v1573_v14  ;;  %v1594_v39 = vadd.f32 %v1591_v30, %v1574_v20  ;;  %v1600_v40 = vadd.f32 %v1597_v31, %v1580_v25  ;;  %v1601_v41 = vadd.f32 %v1598_v32, %v1581_v26 }
 0x147   : > { %v1602_v42 = vadd.f32 %v1599_v35, %v1582_v27  ;;  %v1611_v43 = vmul.f32 %v2552_v33, %v1608_v24  ;;  %v1612_v44 = vadd.f32 %v1609_v36, %v1592_v34  ;;  %v1616_v45 = vstv %s3550_s8  ;;  %v2571_v27 = vld [vmem:[%s2944_s12 + $0x698] sm:$0xff]  ;;  %s3622_s8 = sld [smem:[#allocation3 + $0xca]] }
 0x148   : > { %v1613_v48 = vadd.f32 %v1610_v37, %v1593_v38  ;;  %v1617_v49 = vmul.f32 %v2550_v19, %v1616_v45  ;;  %v1618_v50 = vmul.f32 %v2551_v23, %v1616_v45  ;;  %v1619_v51 = vmul.f32 %v2552_v33, %v1616_v45  ;;  %v2570_v23 = vld [vmem:[%s2944_s12 + $0x690] sm:$0xff]  ;;  %v2572_v37 = vld [vmem:[%s2944_s12 + $0x6a0] sm:$0xff] }
 0x149   : > { %v1614_v54 = vadd.f32 %v1611_v43, %v1594_v39  ;;  %v1628_v55 = vstv %s3555_s9  ;;  %v1636_v56 = vstv %s3559_s17  ;;  %v1648_v58 = vstv %s3561_s22  ;;  %s3627_s9 = sld [smem:[#allocation3 + $0x4b]]  ;;  %s3633_s22 = sld [smem:[#allocation3 + $0x4c]] }
 0x14a   : > { %v1620_v59 = vadd.f32 %v1617_v49, %v1600_v40  ;;  %v1621_v60 = vadd.f32 %v1618_v50, %v1601_v41  ;;  %v1622_v61 = vadd.f32 %v1619_v51, %v1602_v42  ;;  %v1629_v62 = vmul.f32 %v2555_v46, %v1628_v55  ;;  %v2575_v50 = vld [vmem:[%s2944_s12 + $0x6a8] sm:$0xff]  ;;  %v2576_v51 = vld [vmem:[%s2944_s12 + $0x6b0] sm:$0xff]  ;;  %s3631_s17 = sld [smem:[#allocation3 + $0xcb]] }
 0x14b   : > { %v1630_v63 = vmul.f32 %v2556_v47, %v1628_v55  ;;  %v1631_v0 = vmul.f32 %v2557_v52, %v1628_v55  ;;  %v1637_v1 = vmul.f32 %v2555_v46, %v1636_v56  ;;  %v1638_v2 = vmul.f32 %v2556_v47, %v1636_v56 }
 0x14c   : > { %v1632_v4 = vadd.f32 %v1629_v62, %v1612_v44  ;;  %v1639_v5 = vmul.f32 %v2557_v52, %v1636_v56  ;;  %v1649_v6 = vmul.f32 %v2560_v53, %v1648_v58  ;;  %v1650_v7 = vmul.f32 %v2561_v57, %v1648_v58  ;;  %v2577_v56 = vld [vmem:[%s2944_s12 + $0x6b8] sm:$0xff] }
 0x14d   : > { %v1633_v8 = vadd.f32 %v1630_v63, %v1613_v48  ;;  %v1634_v9 = vadd.f32 %v1631_v0, %v1614_v54  ;;  %v1640_v10 = vadd.f32 %v1637_v1, %v1620_v59  ;;  %v1641_v11 = vadd.f32 %v1638_v2, %v1621_v60 }
 0x14e   : > { %v1642_v12 = vadd.f32 %v1639_v5, %v1622_v61  ;;  %v1651_v13 = vmul.f32 %v2562_v3, %v1648_v58  ;;  %v1652_v14 = vadd.f32 %v1649_v6, %v1632_v4  ;;  %v1656_v15 = vstv %s3568_s28  ;;  %v2581_v61 = vld [vmem:[%s2944_s12 + $0x6c8] sm:$0xff]  ;;  %s3640_s28 = sld [smem:[#allocation3 + $0xcc]] }
 0x14f   : > { %v1653_v18 = vadd.f32 %v1650_v7, %v1633_v8  ;;  %v1657_v19 = vmul.f32 %v2560_v53, %v1656_v15  ;;  %v1658_v20 = vmul.f32 %v2561_v57, %v1656_v15  ;;  %v1659_v21 = vmul.f32 %v2562_v3, %v1656_v15  ;;  %v2580_v57 = vld [vmem:[%s2944_s12 + $0x6c0] sm:$0xff]  ;;  %v2582_v7 = vld [vmem:[%s2944_s12 + $0x6d0] sm:$0xff] }
 0x150   : > { %v1654_v24 = vadd.f32 %v1651_v13, %v1634_v9  ;;  %v1668_v25 = vstv %s3573_s11  ;;  %v1676_v26 = vstv %s3577_s13  ;;  %v1688_v28 = vstv %s3579_s16  ;;  %s3645_s11 = sld [smem:[#allocation3 + $0x4d]]  ;;  %s3651_s16 = sld [smem:[#allocation3 + $0x4e]] }
 0x151   : > { %v1660_v29 = vadd.f32 %v1657_v19, %v1640_v10  ;;  %v1661_v30 = vadd.f32 %v1658_v20, %v1641_v11  ;;  %v1662_v31 = vadd.f32 %v1659_v21, %v1642_v12  ;;  %v1669_v32 = vmul.f32 %v2565_v16, %v1668_v25  ;;  %v2585_v20 = vld [vmem:[%s2944_s12 + $0x6d8] sm:$0xff]  ;;  %v2586_v21 = vld [vmem:[%s2944_s12 + $0x6e0] sm:$0xff]  ;;  %s3649_s13 = sld [smem:[#allocation3 + $0xcd]] }
 0x152   : > { %v1670_v33 = vmul.f32 %v2566_v17, %v1668_v25  ;;  %v1671_v34 = vmul.f32 %v2567_v22, %v1668_v25  ;;  %v1677_v35 = vmul.f32 %v2565_v16, %v1676_v26  ;;  %v1678_v36 = vmul.f32 %v2566_v17, %v1676_v26 }
 0x153   : > { %v1672_v38 = vadd.f32 %v1669_v32, %v1652_v14  ;;  %v1679_v39 = vmul.f32 %v2567_v22, %v1676_v26  ;;  %v1689_v40 = vmul.f32 %v2570_v23, %v1688_v28  ;;  %v1690_v41 = vmul.f32 %v2571_v27, %v1688_v28  ;;  %v2587_v26 = vld [vmem:[%s2944_s12 + $0x6e8] sm:$0xff] }
 0x154   : > { %v1673_v42 = vadd.f32 %v1670_v33, %v1653_v18  ;;  %v1674_v43 = vadd.f32 %v1671_v34, %v1654_v24  ;;  %v1680_v44 = vadd.f32 %v1677_v35, %v1660_v29  ;;  %v1681_v45 = vadd.f32 %v1678_v36, %v1661_v30 }
 0x155   : > { %v1682_v46 = vadd.f32 %v1679_v39, %v1662_v31  ;;  %v1691_v47 = vmul.f32 %v2572_v37, %v1688_v28  ;;  %v1692_v48 = vadd.f32 %v1689_v40, %v1672_v38  ;;  %v1696_v49 = vstv %s3586_s15  ;;  %v2591_v31 = vld [vmem:[%s2944_s12 + $0x6f8] sm:$0xff]  ;;  %s3658_s15 = sld [smem:[#allocation3 + $0xce]] }
 0x156   : > { %v1693_v52 = vadd.f32 %v1690_v41, %v1673_v42  ;;  %v1697_v53 = vmul.f32 %v2570_v23, %v1696_v49  ;;  %v1698_v54 = vmul.f32 %v2571_v27, %v1696_v49  ;;  %v1699_v55 = vmul.f32 %v2572_v37, %v1696_v49  ;;  %v2590_v27 = vld [vmem:[%s2944_s12 + $0x6f0] sm:$0xff]  ;;  %v2592_v41 = vld [vmem:[%s2944_s12 + $0x700] sm:$0xff] }
 0x157   : > { %v1694_v58 = vadd.f32 %v1691_v47, %v1674_v43  ;;  %v1708_v59 = vstv %s3591_s18  ;;  %v1716_v60 = vstv %s3595_s6  ;;  %v1728_v62 = vstv %s3597_s19  ;;  %s3663_s18 = sld [smem:[#allocation3 + $0x4f]]  ;;  %s3669_s19 = sld [smem:[#allocation3 + $0x50]] }
 0x158   : > { %v1700_v63 = vadd.f32 %v1697_v53, %v1680_v44  ;;  %v1701_v0 = vadd.f32 %v1698_v54, %v1681_v45  ;;  %v1702_v1 = vadd.f32 %v1699_v55, %v1682_v46  ;;  %v1709_v2 = vmul.f32 %v2575_v50, %v1708_v59  ;;  %v2595_v54 = vld [vmem:[%s2944_s12 + $0x708] sm:$0xff]  ;;  %v2596_v55 = vld [vmem:[%s2944_s12 + $0x710] sm:$0xff]  ;;  %s3667_s6 = sld [smem:[#allocation3 + $0xcf]] }
 0x159   : > { %v1710_v3 = vmul.f32 %v2576_v51, %v1708_v59  ;;  %v1711_v4 = vmul.f32 %v2577_v56, %v1708_v59  ;;  %v1717_v5 = vmul.f32 %v2575_v50, %v1716_v60  ;;  %v1718_v6 = vmul.f32 %v2576_v51, %v1716_v60 }
 0x15a   : > { %v1712_v8 = vadd.f32 %v1709_v2, %v1692_v48  ;;  %v1719_v9 = vmul.f32 %v2577_v56, %v1716_v60  ;;  %v1729_v10 = vmul.f32 %v2580_v57, %v1728_v62  ;;  %v1730_v11 = vmul.f32 %v2581_v61, %v1728_v62  ;;  %v2597_v60 = vld [vmem:[%s2944_s12 + $0x718] sm:$0xff] }
 0x15b   : > { %v1713_v12 = vadd.f32 %v1710_v3, %v1693_v52  ;;  %v1714_v13 = vadd.f32 %v1711_v4, %v1694_v58  ;;  %v1720_v14 = vadd.f32 %v1717_v5, %v1700_v63  ;;  %v1721_v15 = vadd.f32 %v1718_v6, %v1701_v0 }
 0x15c   : > { %v1722_v16 = vadd.f32 %v1719_v9, %v1702_v1  ;;  %v1731_v17 = vmul.f32 %v2582_v7, %v1728_v62  ;;  %v1732_v18 = vadd.f32 %v1729_v10, %v1712_v8  ;;  %v1736_v19 = vstv %s3604_s29  ;;  %v2601_v1 = vld [vmem:[%s2944_s12 + $0x728] sm:$0xff]  ;;  %s3676_s29 = sld [smem:[#allocation3 + $0xd0]] }
 0x15d   : > { %v1733_v22 = vadd.f32 %v1730_v11, %v1713_v12  ;;  %v1737_v23 = vmul.f32 %v2580_v57, %v1736_v19  ;;  %v1738_v24 = vmul.f32 %v2581_v61, %v1736_v19  ;;  %v1739_v25 = vmul.f32 %v2582_v7, %v1736_v19  ;;  %v2600_v61 = vld [vmem:[%s2944_s12 + $0x720] sm:$0xff]  ;;  %v2602_v11 = vld [vmem:[%s2944_s12 + $0x730] sm:$0xff] }
 0x15e   : > { %v1734_v28 = vadd.f32 %v1731_v17, %v1714_v13  ;;  %v1748_v29 = vstv %s3609_s25  ;;  %v1756_v30 = vstv %s3613_s26  ;;  %v1768_v32 = vstv %s3615_s7  ;;  %s3681_s25 = sld [smem:[#allocation3 + $0x51]]  ;;  %s3687_s7 = sld [smem:[#allocation3 + $0x52]] }
 0x15f   : > { %v1740_v33 = vadd.f32 %v1737_v23, %v1720_v14  ;;  %v1741_v34 = vadd.f32 %v1738_v24, %v1721_v15  ;;  %v1742_v35 = vadd.f32 %v1739_v25, %v1722_v16  ;;  %v1749_v36 = vmul.f32 %v2585_v20, %v1748_v29  ;;  %v2605_v24 = vld [vmem:[%s2944_s12 + $0x738] sm:$0xff]  ;;  %v2606_v25 = vld [vmem:[%s2944_s12 + $0x740] sm:$0xff]  ;;  %s3685_s26 = sld [smem:[#allocation3 + $0xd1]] }
 0x160   : > { %v1750_v37 = vmul.f32 %v2586_v21, %v1748_v29  ;;  %v1751_v38 = vmul.f32 %v2587_v26, %v1748_v29  ;;  %v1757_v39 = vmul.f32 %v2585_v20, %v1756_v30  ;;  %v1758_v40 = vmul.f32 %v2586_v21, %v1756_v30 }
 0x161   : > { %v1752_v42 = vadd.f32 %v1749_v36, %v1732_v18  ;;  %v1759_v43 = vmul.f32 %v2587_v26, %v1756_v30  ;;  %v1769_v44 = vmul.f32 %v2590_v27, %v1768_v32  ;;  %v1770_v45 = vmul.f32 %v2591_v31, %v1768_v32  ;;  %v2607_v30 = vld [vmem:[%s2944_s12 + $0x748] sm:$0xff] }
 0x162   : > { %v1753_v46 = vadd.f32 %v1750_v37, %v1733_v22  ;;  %v1754_v47 = vadd.f32 %v1751_v38, %v1734_v28  ;;  %v1760_v48 = vadd.f32 %v1757_v39, %v1740_v33  ;;  %v1761_v49 = vadd.f32 %v1758_v40, %v1741_v34 }
 0x163   : > { %v1762_v50 = vadd.f32 %v1759_v43, %v1742_v35  ;;  %v1771_v51 = vmul.f32 %v2592_v41, %v1768_v32  ;;  %v1772_v52 = vadd.f32 %v1769_v44, %v1752_v42  ;;  %v1776_v53 = vstv %s3622_s8  ;;  %v2611_v35 = vld [vmem:[%s2944_s12 + $0x758] sm:$0xff]  ;;  %s3694_s8 = sld [smem:[#allocation3 + $0xd2]] }
 0x164   : > { %v1773_v56 = vadd.f32 %v1770_v45, %v1753_v46  ;;  %v1777_v57 = vmul.f32 %v2590_v27, %v1776_v53  ;;  %v1778_v58 = vmul.f32 %v2591_v31, %v1776_v53  ;;  %v1779_v59 = vmul.f32 %v2592_v41, %v1776_v53  ;;  %v2610_v31 = vld [vmem:[%s2944_s12 + $0x750] sm:$0xff]  ;;  %v2612_v45 = vld [vmem:[%s2944_s12 + $0x760] sm:$0xff] }
 0x165   : > { %v1774_v62 = vadd.f32 %v1771_v51, %v1754_v47  ;;  %v1788_v63 = vstv %s3627_s9  ;;  %v1796_v0 = vstv %s3631_s17  ;;  %v1808_v2 = vstv %s3633_s22  ;;  %s3701_s9 = sld [smem:[#allocation3 + $0x53]]  ;;  %s1989_s22 = scalar_lea.vmem (%p3774_p9), %s3769_s3, %s2649_s10 }
 0x166   : > { %v1780_v3 = vadd.f32 %v1777_v57, %v1760_v48  ;;  %v1781_v4 = vadd.f32 %v1778_v58, %v1761_v49  ;;  %v1782_v5 = vadd.f32 %v1779_v59, %v1762_v50  ;;  %v1789_v6 = vmul.f32 %v2595_v54, %v1788_v63  ;;  %v2615_v58 = vld [vmem:[%s2944_s12 + $0x768] sm:$0xff]  ;;  %v2616_v59 = vld [vmem:[%s2944_s12 + $0x770] sm:$0xff]  ;;  %s3703_s17 = sld [smem:[#allocation3 + $0xd3]] }
 0x167   : > { %v1790_v7 = vmul.f32 %v2596_v55, %v1788_v63  ;;  %v1791_v8 = vmul.f32 %v2597_v60, %v1788_v63  ;;  %v1797_v9 = vmul.f32 %v2595_v54, %v1796_v0  ;;  %v1798_v10 = vmul.f32 %v2596_v55, %v1796_v0 }
 0x168   : > { %v1792_v12 = vadd.f32 %v1789_v6, %v1772_v52  ;;  %v1799_v13 = vmul.f32 %v2597_v60, %v1796_v0  ;;  %v1809_v14 = vmul.f32 %v2600_v61, %v1808_v2  ;;  %v1810_v15 = vmul.f32 %v2601_v1, %v1808_v2  ;;  %v2617_v0 = vld [vmem:[%s2944_s12 + $0x778] sm:$0xff] }
 0x169   : > { %v1793_v16 = vadd.f32 %v1790_v7, %v1773_v56  ;;  %v1794_v17 = vadd.f32 %v1791_v8, %v1774_v62  ;;  %v1800_v18 = vadd.f32 %v1797_v9, %v1780_v3  ;;  %v1801_v19 = vadd.f32 %v1798_v10, %v1781_v4 }
 0x16a   : > { %v1802_v20 = vadd.f32 %v1799_v13, %v1782_v5  ;;  %v1811_v21 = vmul.f32 %v2602_v11, %v1808_v2  ;;  %v1812_v22 = vadd.f32 %v1809_v14, %v1792_v12  ;;  %v1816_v23 = vstv %s3640_s28  ;;  %v2621_v5 = vld [vmem:[%s2944_s12 + $0x788] sm:$0xff] }
 0x16b   : > { %v1813_v26 = vadd.f32 %v1810_v15, %v1793_v16  ;;  %v1817_v27 = vmul.f32 %v2600_v61, %v1816_v23  ;;  %v1818_v28 = vmul.f32 %v2601_v1, %v1816_v23  ;;  %v1819_v29 = vmul.f32 %v2602_v11, %v1816_v23  ;;  %v2620_v1 = vld [vmem:[%s2944_s12 + $0x780] sm:$0xff]  ;;  %v2622_v15 = vld [vmem:[%s2944_s12 + $0x790] sm:$0xff] }
 0x16c   : > { %v1814_v32 = vadd.f32 %v1811_v21, %v1794_v17  ;;  %v1828_v33 = vstv %s3645_s11  ;;  %v1836_v34 = vstv %s3649_s13  ;;  %v1848_v36 = vstv %s3651_s16 }
 0x16d   : > { %v1820_v37 = vadd.f32 %v1817_v27, %v1800_v18  ;;  %v1821_v38 = vadd.f32 %v1818_v28, %v1801_v19  ;;  %v1822_v39 = vadd.f32 %v1819_v29, %v1802_v20  ;;  %v1829_v40 = vmul.f32 %v2605_v24, %v1828_v33  ;;  %v2625_v28 = vld [vmem:[%s2944_s12 + $0x798] sm:$0xff]  ;;  %v2626_v29 = vld [vmem:[%s2944_s12 + $0x7a0] sm:$0xff] }
 0x16e   : > { %v1830_v41 = vmul.f32 %v2606_v25, %v1828_v33  ;;  %v1831_v42 = vmul.f32 %v2607_v30, %v1828_v33  ;;  %v1837_v43 = vmul.f32 %v2605_v24, %v1836_v34  ;;  %v1838_v44 = vmul.f32 %v2606_v25, %v1836_v34 }
 0x16f   : > { %v1832_v46 = vadd.f32 %v1829_v40, %v1812_v22  ;;  %v1839_v47 = vmul.f32 %v2607_v30, %v1836_v34  ;;  %v1849_v48 = vmul.f32 %v2610_v31, %v1848_v36  ;;  %v1850_v49 = vmul.f32 %v2611_v35, %v1848_v36  ;;  %v2627_v34 = vld [vmem:[%s2944_s12 + $0x7a8] sm:$0xff] }
 0x170   : > { %v1833_v50 = vadd.f32 %v1830_v41, %v1813_v26  ;;  %v1834_v51 = vadd.f32 %v1831_v42, %v1814_v32  ;;  %v1840_v52 = vadd.f32 %v1837_v43, %v1820_v37  ;;  %v1841_v53 = vadd.f32 %v1838_v44, %v1821_v38 }
 0x171   : > { %v1842_v54 = vadd.f32 %v1839_v47, %v1822_v39  ;;  %v1851_v55 = vmul.f32 %v2612_v45, %v1848_v36  ;;  %v1852_v56 = vadd.f32 %v1849_v48, %v1832_v46  ;;  %v1856_v57 = vstv %s3658_s15  ;;  %v2631_v39 = vld [vmem:[%s2944_s12 + $0x7b8] sm:$0xff] }
 0x172   : > { %v1853_v60 = vadd.f32 %v1850_v49, %v1833_v50  ;;  %v1857_v61 = vmul.f32 %v2610_v31, %v1856_v57  ;;  %v1858_v62 = vmul.f32 %v2611_v35, %v1856_v57  ;;  %v1859_v63 = vmul.f32 %v2612_v45, %v1856_v57  ;;  %v2630_v35 = vld [vmem:[%s2944_s12 + $0x7b0] sm:$0xff]  ;;  %v2632_v49 = vld [vmem:[%s2944_s12 + $0x7c0] sm:$0xff] }
 0x173   : > { %v1854_v2 = vadd.f32 %v1851_v55, %v1834_v51  ;;  %v1868_v3 = vstv %s3663_s18  ;;  %v1876_v4 = vstv %s3667_s6  ;;  %v1888_v6 = vstv %s3669_s19 }
 0x174   : > { %v1860_v7 = vadd.f32 %v1857_v61, %v1840_v52  ;;  %v1861_v8 = vadd.f32 %v1858_v62, %v1841_v53  ;;  %v1862_v9 = vadd.f32 %v1859_v63, %v1842_v54  ;;  %v1869_v10 = vmul.f32 %v2615_v58, %v1868_v3  ;;  %v2635_v61 = vld [vmem:[%s2944_s12 + $0x7c8] sm:$0xff] }
 0x175   : > { %v1870_v11 = vmul.f32 %v2616_v59, %v1868_v3  ;;  %v1871_v12 = vmul.f32 %v2617_v0, %v1868_v3  ;;  %v1877_v13 = vmul.f32 %v2615_v58, %v1876_v4  ;;  %v1878_v14 = vmul.f32 %v2616_v59, %v1876_v4  ;;  %v2637_v3 = vld [vmem:[%s2944_s12 + $0x7d8] sm:$0xff] }
 0x176   : > { %v1872_v16 = vadd.f32 %v1869_v10, %v1852_v56  ;;  %v1879_v17 = vmul.f32 %v2617_v0, %v1876_v4  ;;  %v1889_v18 = vmul.f32 %v2620_v1, %v1888_v6  ;;  %v1890_v19 = vmul.f32 %v2621_v5, %v1888_v6 }
 0x177   : > { %v1873_v20 = vadd.f32 %v1870_v11, %v1853_v60  ;;  %v1874_v21 = vadd.f32 %v1871_v12, %v1854_v2  ;;  %v1880_v22 = vadd.f32 %v1877_v13, %v1860_v7  ;;  %v1881_v23 = vadd.f32 %v1878_v14, %v1861_v8  ;;  %v2636_v2 = vld [vmem:[%s2944_s12 + $0x7d0] sm:$0xff]  ;;  %s3721_s12 = scalar_lea.vmem [#allocation9], %s2655_s20 }
 0x178   : > { %v1882_v24 = vadd.f32 %v1879_v17, %v1862_v9  ;;  %v1891_v25 = vmul.f32 %v2622_v15, %v1888_v6  ;;  %v1892_v26 = vadd.f32 %v1889_v18, %v1872_v16  ;;  %v1896_v27 = vstv %s3676_s29 }
 0x179   : > { %v1893_v30 = vadd.f32 %v1890_v19, %v1873_v20  ;;  %v1897_v31 = vmul.f32 %v2620_v1, %v1896_v27  ;;  %v1898_v32 = vmul.f32 %v2621_v5, %v1896_v27  ;;  %v1899_v33 = vmul.f32 %v2622_v15, %v1896_v27  ;;  %v2710_v27 = vld [vmem:[%s2952_s5 + $0x10] sm:$0xff] }
 0x17a   : > { %v1894_v36 = vadd.f32 %v1891_v25, %v1874_v21  ;;  %v1908_v37 = vstv %s3681_s25  ;;  %v1916_v38 = vstv %s3685_s26  ;;  %v1928_v40 = vstv %s3687_s7  ;;  %v2709_v25 = vld [vmem:[%s2952_s5 + $0x8] sm:$0xff] }
 0x17b   : > { %v1900_v41 = vadd.f32 %v1897_v31, %v1880_v22  ;;  %v1901_v42 = vadd.f32 %v1898_v32, %v1881_v23  ;;  %v1902_v43 = vadd.f32 %v1899_v33, %v1882_v24  ;;  %v1909_v44 = vmul.f32 %v2625_v28, %v1908_v37  ;;  %v2708_v23 = vld [vmem:[%s2952_s5] sm:$0xff]  ;;  %v2027_v32 = vld [vmem:[%s3405_s14] sm:$0xff] (%p3774_p9)  ;;  %v2029_v33 = vld [vmem:[%s3405_s14 + $0x8] sm:$0xff] (%p3774_p9) }
 0x17c   : > { %v1910_v45 = vmul.f32 %v2626_v29, %v1908_v37  ;;  %v1911_v46 = vmul.f32 %v2627_v34, %v1908_v37  ;;  %v1917_v47 = vmul.f32 %v2625_v28, %v1916_v38  ;;  %v1918_v48 = vmul.f32 %v2626_v29, %v1916_v38  ;;  %v2037_v37 = vld [vmem:[%s3405_s14 + $0x28] sm:$0xff] (%p3774_p9)  ;;  %2028 = vst [vmem:[%s1989_s22] sm:$0xff] (%p3774_p9), %v2027_v32 }
 0x17d   : > { %v1912_v50 = vadd.f32 %v1909_v44, %v1892_v26  ;;  %v1919_v51 = vmul.f32 %v2627_v34, %v1916_v38  ;;  %v1929_v52 = vmul.f32 %v2630_v35, %v1928_v40  ;;  %v1930_v53 = vmul.f32 %v2631_v39, %v1928_v40  ;;  %v2031_v34 = vld [vmem:[%s3405_s14 + $0x10] sm:$0xff] (%p3774_p9)  ;;  %2030 = vst [vmem:[%s1989_s22 + $0x8] sm:$0xff] (%p3774_p9), %v2029_v33 }
 0x17e   : > { %v1913_v54 = vadd.f32 %v1910_v45, %v1893_v30  ;;  %v1914_v55 = vadd.f32 %v1911_v46, %v1894_v36  ;;  %v1920_v56 = vadd.f32 %v1917_v47, %v1900_v41  ;;  %v1921_v57 = vadd.f32 %v1918_v48, %v1901_v42  ;;  %v2035_v36 = vld [vmem:[%s3405_s14 + $0x20] sm:$0xff] (%p3774_p9)  ;;  %2032 = vst [vmem:[%s1989_s22 + $0x10] sm:$0xff] (%p3774_p9), %v2031_v34 }
 0x17f   : > { %v1922_v58 = vadd.f32 %v1919_v51, %v1902_v43  ;;  %v1931_v59 = vmul.f32 %v2632_v49, %v1928_v40  ;;  %v1936_v60 = vstv %s3694_s8  ;;  %v1932_v62 = vadd.f32 %v1929_v52, %v1912_v50  ;;  %2036 = vst [vmem:[%s1989_s22 + $0x38] sm:$0xff] (%p3774_p9), %v2035_v36  ;;  %2038 = vst [vmem:[%s1989_s22 + $0x40] sm:$0xff] (%p3774_p9), %v2037_v37 }
 0x180   : > { %v1937_v63 = vmul.f32 %v2630_v35, %v1936_v60  ;;  %v1938_v0 = vmul.f32 %v2631_v39, %v1936_v60  ;;  %v1939_v1 = vmul.f32 %v2632_v49, %v1936_v60  ;;  %v1933_v4 = vadd.f32 %v1930_v53, %v1913_v54  ;;  %v2033_v35 = vld [vmem:[%s3405_s14 + $0x18] sm:$0xff] (%p3774_p9) }
 0x181   : > { %v1934_v5 = vadd.f32 %v1931_v59, %v1914_v55  ;;  %v1948_v6 = vstv %s3701_s9  ;;  %v1956_v7 = vstv %s3703_s17  ;;  %2034 = vst [vmem:[%s1989_s22 + $0x30] sm:$0xff] (%p3774_p9), %v2033_v35 }
 0x182   : > { %v1940_v8 = vadd.f32 %v1937_v63, %v1920_v56  ;;  %v1941_v9 = vadd.f32 %v1938_v0, %v1921_v57  ;;  %v1942_v10 = vadd.f32 %v1939_v1, %v1922_v58  ;;  %v1949_v11 = vmul.f32 %v2635_v61, %v1948_v6 }
 0x183   : > { %v1950_v12 = vmul.f32 %v2636_v2, %v1948_v6  ;;  %v1951_v13 = vmul.f32 %v2637_v3, %v1948_v6  ;;  %v1957_v14 = vmul.f32 %v2635_v61, %v1956_v7  ;;  %v1958_v15 = vmul.f32 %v2636_v2, %v1956_v7 }
 0x184   : > { %v1952_v16 = vadd.f32 %v1949_v11, %v1932_v62  ;;  %v1959_v17 = vmul.f32 %v2637_v3, %v1956_v7 }
 0x185   : > { %v1953_v18 = vadd.f32 %v1950_v12, %v1933_v4  ;;  %v1954_v19 = vadd.f32 %v1951_v13, %v1934_v5  ;;  %v1960_v20 = vadd.f32 %v1957_v14, %v1940_v8  ;;  %v1961_v21 = vadd.f32 %v1958_v15, %v1941_v9  ;;  %1986 = sbr.rel (!%p3774_p9) target bundleno = 396 (0x18c), region = 40 }
 0x186   : > { %v1962_v22 = vadd.f32 %v1959_v17, %v1942_v10  ;;  %v1963_v24 = vadd.f32 %v2708_v23, %v1952_v16 }
 0x187   : > { %v1964_v26 = vadd.f32 %v2709_v25, %v1953_v18  ;;  %v1965_v28 = vadd.f32 %v2710_v27, %v1954_v19  ;;  %v1969_v29 = vadd.f32 %v2708_v23, %v1960_v20  ;;  %v1970_v30 = vadd.f32 %v2709_v25, %v1961_v21 }
 0x188   : > { %1966 = vst [vmem:[%s3721_s12] sm:$0xff] %v1963_v24  ;;  %v1971_v31 = vadd.f32 %v2710_v27, %v1962_v22 }
 0x189   : > { %1967 = vst [vmem:[%s3721_s12 + $0x8] sm:$0xff] %v1964_v26  ;;  %1968 = vst [vmem:[%s3721_s12 + $0x10] sm:$0xff] %v1965_v28 }
 0x18a   : > { %2640 = vst [vmem:[%s3721_s12 + $0x18] sm:$0xff] %v1969_v29  ;;  %2641 = vst [vmem:[%s3721_s12 + $0x20] sm:$0xff] %v1970_v30 }
 0x18b   : > { %2642 = vst [vmem:[%s3721_s12 + $0x28] sm:$0xff] %v1971_v31 }
 0x18c PF: > { %p3775_p12 = scmp.ne.s32.totalorder %s3773_s30, 0 }
 0x18d   : > { %s2650_s14 = smul.u32 (%p3775_p12), 24, %s2850_s23 }
 0x18e   : > { %2044 = sbr.rel (!%p3775_p12) target bundleno = 405 (0x195), region = 78 }
 0x18f   : > { %v2085_v38 = vld [vmem:[%s3721_s12] sm:$0xff] (%p3775_p12)  ;;  %s2047_s13 = scalar_lea.vmem (%p3775_p12), %s3770_s4, %s2650_s14 }
 0x190   : > { %v2087_v39 = vld [vmem:[%s3721_s12 + $0x8] sm:$0xff] (%p3775_p12)  ;;  %v2089_v40 = vld [vmem:[%s3721_s12 + $0x10] sm:$0xff] (%p3775_p12)  ;;  %2086 = vst [vmem:[%s2047_s13] sm:$0xff] (%p3775_p12), %v2085_v38 }
 0x191   : > { %v2091_v41 = vld [vmem:[%s3721_s12 + $0x18] sm:$0xff] (%p3775_p12)  ;;  %v2093_v42 = vld [vmem:[%s3721_s12 + $0x20] sm:$0xff] (%p3775_p12)  ;;  %2088 = vst [vmem:[%s2047_s13 + $0x8] sm:$0xff] (%p3775_p12), %v2087_v39  ;;  %2090 = vst [vmem:[%s2047_s13 + $0x10] sm:$0xff] (%p3775_p12), %v2089_v40 }
 0x192   : > { %v2095_v43 = vld [vmem:[%s3721_s12 + $0x28] sm:$0xff] (%p3775_p12)  ;;  %2092 = vst [vmem:[%s2047_s13 + $0x30] sm:$0xff] (%p3775_p12), %v2091_v41  ;;  %2094 = vst [vmem:[%s2047_s13 + $0x38] sm:$0xff] (%p3775_p12), %v2093_v42 }
 0x193   : > { %2096 = vst [vmem:[%s2047_s13 + $0x40] sm:$0xff] (%p3775_p12), %v2095_v43 }
 0x195 PF: > { %p24_p13 = scmp.ge.s32.totalorder %s2853_s24, 4   ;;  %s3776_s20 = smov %s2783_s0 }
 0x196   : > { %s3777_s0 = smov %s2787_s21  ;;  %s3778_s21 = smov %s2863_s27 }
 0x197   : > { %s3779_s22 = smov %s2853_s24  ;;  %26 = sbr.rel (!%p24_p13) target bundleno = 20 (0x14), region = 259 }
 0x19e   :  { %2119 = vsyncpa [#allocation5], 1 }
 0x19f   :  { %2121 = vsyncpa [#allocation5 + $0x1], 1 }
 0x1a0   :  { %2122 = vsyncpa [#allocation7], 1 }
 0x1a1   :  { %2124 = vsyncpa [#allocation7 + $0x1], 1 }

// kernel: _lambda_.3
= control target key start
LH: loop header
LB: loop body
LE: loop exit
PB: predicated region body
PF: predicated region fallthrough
CT: control target
= control target key end

     0   :  { %s1760_s0 = inlined_call_operand.vmem [shape: f32[120], index: 0, kind: input, shape index: {}]   ;;  %s1761_s1 = inlined_call_operand.vmem [shape: f32[5,16,128], index: 1, kind: input, shape index: {}]   ;;  %s1762_s2 = inlined_call_operand.vmem [shape: f32[2,3,16,128], index: 2, kind: input, shape index: {}]   ;;  %s1763_s3 = inlined_call_operand.vmem [shape: f32[2,3,16,128], index: 3, kind: output, shape index: {}]  }
   0x1   :  { %s8_s14 = sshll.u32 %s1760_s0, 4  ;;  %s9_s14 = int_to_ptr.vmem [resolvable:$true] %s8_s14 }
   0x2   :  { %s1096_s15 = scalar_lea.vmem %s9_s14, 16  ;;  %p1101_p1 = scmp.lt.s32.totalorder %s9_s14, %s9_s14 }
   0x3   :  { %p1097_p0 = scmp.ne.s32.totalorder %s9_s14, %s1096_s15  ;;  %p1102_p2 = scmp.lt.s32.totalorder %s1096_s15, %s1096_s15 }
   0x5   :  { %p1103_p3 = por %p1102_p2, %p1101_p1 }
   0x7   :  { %p1104_p4 = pnand %p1103_p3, %p1097_p0 }
   0x9   :  { %1107 = shalt.err (!%p1104_p4)  }
   0xa   :  { %s1134_s16 = smov [#allocation3]  }
   0xb   :  { %11 = dma.vmem_to_smem %s9_s14, 16, %s1134_s16, [#allocation2] }
   0xc   :  { %1120 = dma.done.wait [#allocation2], 16 }
   0xd   :  { %1121 = vsyncadd [#allocation2], 4294967280 }
   0xe   :  { %13 = sfence }
   0xf   :  { %s1158_s17 = smov 0   ;;  %s1160_s18 = smov 0  }
  0x10   :  { %s1162_s19 = smov 0  }
  0x11 LB: > { %s920_s0 = sadd.s32 4294967295, %s1132_s19   ;;  %s1175_s20 = sadd.s32 1, %s1132_s19   ;;  %s1132_s19 = sphi %s1162_s19, %s1768_s19   ;;  %s1128_s18 = sphi %s1160_s18, %s1767_s18   ;;  %s1124_s17 = sphi %s1158_s17, %s1766_s17  }
  0x12   : > { %s23_s21 = ssub.s32 %s1132_s19, %s1175_s20  ;;  %s26_s22 = sadd.s32 1, %s1128_s18 }
  0x13   : > { %p24_p5 = scmp.eq.s32.totalorder %s23_s21, 0  ;;  %p33_p6 = scmp.ne.s32.totalorder %s1128_s18, %s1124_s17 }
  0x14   : > { %p34_p7 = scmp.eq.s32.totalorder %s1132_s19, 0  ;;  %p89_p8 = scmp.eq.s32.totalorder %s920_s0, 1 }
  0x15   : > { %s1186_s23 = scalar_select %p24_p5, %s1128_s18, %s26_s22  }
  0x16   : > { %p1188_p9 = por %p34_p7, %p33_p6  ;;  %p1192_p10 = por %p89_p8, %p33_p6 }
  0x17   : > { %p923_p11 = scmp.ge.s32.totalorder %s1132_s19, 2 }
  0x19   : > { %111 = sbr.rel (%p923_p11) target bundleno = 46 (0x2e), region = 16 }
  0x20   : > { %114 = sbr.rel (!%p1188_p9) target bundleno = 39 (0x27), region = 20  ;;  %s116_s26 = sand.u32 (%p1188_p9), 1, %s1128_s18  }
  0x21   : > { %s924_s27 = sshll.u32 (%p1188_p9), %s1132_s19, 3  ;;  %s1067_s28 = smul.u32 (%p1188_p9), 40, %s116_s26 }
  0x22   : > { %s120_s4 = scalar_lea.vmem (%p1188_p9), %s1761_s1, %s924_s27 }
  0x23   : > { %v156_v0 = vld [vmem:[%s120_s4] sm:$0xff] (%p1188_p9)  ;;  %v158_v1 = vld [vmem:[%s120_s4 + $0x10] sm:$0xff] (%p1188_p9)  ;;  %s118_s5 = scalar_lea.vmem (%p1188_p9), [#allocation4], %s1067_s28 }
  0x24   : > { %v160_v2 = vld [vmem:[%s120_s4 + $0x20] sm:$0xff] (%p1188_p9)  ;;  %v162_v3 = vld [vmem:[%s120_s4 + $0x30] sm:$0xff] (%p1188_p9)  ;;  %157 = vst [vmem:[%s118_s5] sm:$0xff] (%p1188_p9), %v156_v0  ;;  %159 = vst [vmem:[%s118_s5 + $0x8] sm:$0xff] (%p1188_p9), %v158_v1 }
  0x25   : > { %v164_v4 = vld [vmem:[%s120_s4 + $0x40] sm:$0xff] (%p1188_p9)  ;;  %161 = vst [vmem:[%s118_s5 + $0x10] sm:$0xff] (%p1188_p9), %v160_v2  ;;  %163 = vst [vmem:[%s118_s5 + $0x18] sm:$0xff] (%p1188_p9), %v162_v3 }
  0x26   : > { %165 = vst [vmem:[%s118_s5 + $0x20] sm:$0xff] (%p1188_p9), %v164_v4 }
  0x27 PF: > { %171 = sbr.rel (!%p1188_p9) target bundleno = 46 (0x2e), region = 58  ;;  %s173_s6 = sand.u32 (%p1188_p9), 1, %s1128_s18  }
  0x28   : > { %s925_s7 = sshll.u32 (%p1188_p9), %s1132_s19, 3  ;;  %s1068_s8 = smul.u32 (%p1188_p9), 48, %s173_s6 }
  0x29   : > { %s177_s11 = scalar_lea.vmem (%p1188_p9), %s1762_s2, %s925_s7 }
  0x2a   : > { %v215_v5 = vld [vmem:[%s177_s11] sm:$0xff] (%p1188_p9)  ;;  %v217_v6 = vld [vmem:[%s177_s11 + $0x10] sm:$0xff] (%p1188_p9)  ;;  %s175_s12 = scalar_lea.vmem (%p1188_p9), [#allocation5], %s1068_s8 }
  0x2b   : > { %v219_v7 = vld [vmem:[%s177_s11 + $0x20] sm:$0xff] (%p1188_p9)  ;;  %v221_v8 = vld [vmem:[%s177_s11 + $0x30] sm:$0xff] (%p1188_p9)  ;;  %216 = vst [vmem:[%s175_s12] sm:$0xff] (%p1188_p9), %v215_v5  ;;  %218 = vst [vmem:[%s175_s12 + $0x8] sm:$0xff] (%p1188_p9), %v217_v6 }
  0x2c   : > { %v223_v9 = vld [vmem:[%s177_s11 + $0x40] sm:$0xff] (%p1188_p9)  ;;  %v225_v10 = vld [vmem:[%s177_s11 + $0x50] sm:$0xff] (%p1188_p9)  ;;  %220 = vst [vmem:[%s175_s12 + $0x10] sm:$0xff] (%p1188_p9), %v219_v7  ;;  %222 = vst [vmem:[%s175_s12 + $0x18] sm:$0xff] (%p1188_p9), %v221_v8 }
  0x2d   : > { %224 = vst [vmem:[%s175_s12 + $0x20] sm:$0xff] (%p1188_p9), %v223_v9  ;;  %226 = vst [vmem:[%s175_s12 + $0x28] sm:$0xff] (%p1188_p9), %v225_v10 }
  0x2e PF: > { %p926_p12 = scmp.ge.s32.totalorder %s1132_s19, 1  ;;  %p231_p13 = scmp.lt.s32.totalorder %s1132_s19, 3 }
  0x30   : > { %p232_p0 = pnand %p926_p12, %p231_p13 }
  0x31   : > { %s238_s13 = sand.u32 (!%p232_p0), 1, %s1124_s17   ;;  %s275_s14 = sld [smem:[#allocation3]] (!%p232_p0) }
  0x32   : > { %235 = sbr.rel (%p232_p0) target bundleno = 162 (0xa2), region = 96  ;;  %s929_s16 = sld [smem:[#allocation3 + $0x1]] (!%p232_p0) }
  0x33   : > { %s1214_s15 = smul.u32 (!%p232_p0), 40, %s238_s13  ;;  %s930_s22 = sld [smem:[#allocation3 + $0x2]] (!%p232_p0) }
  0x34   : > { %s1216_s21 = smul.u32 (!%p232_p0), 48, %s238_s13  ;;  %s1218_s24 = sld [smem:[#allocation3 + $0x3]] (!%p232_p0) }
  0x35   : > { %s932_s17 = sld [smem:[#allocation3 + $0x4]] (!%p232_p0)  ;;  %s933_s27 = sld [smem:[#allocation3 + $0x5]] (!%p232_p0) }
  0x36   : > { %s1221_s26 = scalar_lea.vmem (!%p232_p0), [#allocation5], %s1216_s21  ;;  %s934_s28 = sld [smem:[#allocation3 + $0x6]] (!%p232_p0) }
  0x37   : > { %v1224_v11 = vld [vmem:[%s1221_s26] sm:$0xff] (!%p232_p0)  ;;  %v1227_v12 = vld [vmem:[%s1221_s26 + $0x8] sm:$0xff] (!%p232_p0)  ;;  %v1230_v13 = vld [vmem:[%s1221_s26 + $0x10] sm:$0xff] (!%p232_p0)  ;;  %v287_v14 = vstv (!%p232_p0), %s275_s14  ;;  %s1232_s29 = sld [smem:[#allocation3 + $0x7]] (!%p232_p0)  ;;  %s936_s30 = sld [smem:[#allocation3 + $0x8]] (!%p232_p0) }
  0x38   : > { %v288_v15 = vmul.f32 (!%p232_p0), %v287_v14, %v1224_v11  ;;  %v289_v16 = vstv (!%p232_p0), %s929_s16  ;;  %s1235_s4 = sld [smem:[#allocation3 + $0x9]] (!%p232_p0)  ;;  %s1237_s5 = sld [smem:[#allocation3 + $0xa]] (!%p232_p0) }
  0x39   : > { %v290_v17 = vmul.f32 %v1227_v12, %v289_v16  ;;  %v292_v18 = vstv %s930_s22  ;;  %s1240_s6 = sld [smem:[#allocation3 + $0xb]]  ;;  %s1243_s7 = sld [smem:[#allocation3 + $0xc]] }
  0x3a   : > { %v293_v19 = vmul.f32 %v1230_v13, %v292_v18  ;;  %s1245_s8 = sld [smem:[#allocation3 + $0xd]]  ;;  %s1247_s9 = sld [smem:[#allocation3 + $0xe]]  ;;  %v295_v21 = vstv %s1218_s24 }
  0x3b   : > { %v291_v20 = vadd.f32 %v290_v17, %v288_v15  ;;  %v299_v22 = vstv %s932_s17  ;;  %s1250_s10 = sld [smem:[#allocation3 + $0xf]]  ;;  %s1252_s11 = sld [smem:[#allocation3 + $0x10]]  ;;  %v301_v25 = vstv %s933_s27 }
  0x3c   : > { %v300_v24 = vmul.f32 %v299_v22, %v1224_v11  ;;  %v304_v26 = vstv %s934_s28  ;;  %s1255_s12 = sld [smem:[#allocation3 + $0x11]]  ;;  %s1257_s13 = sld [smem:[#allocation3 + $0x12]]  ;;  %v302_v27 = vmul.f32 %v1227_v12, %v301_v25 }
  0x3d   : > { %v294_v23 = vadd.f32 %v293_v19, %v291_v20  ;;  %v305_v28 = vmul.f32 %v1230_v13, %v304_v26  ;;  %v311_v29 = vstv %s936_s30  ;;  %s1261_s14 = sld [smem:[#allocation3 + $0x13]]  ;;  %s1263_s16 = sld [smem:[#allocation3 + $0x14]]  ;;  %v307_v36 = vstv %s1232_s29 }
  0x3e   : > { %v312_v31 = vmul.f32 %v311_v29, %v1224_v11  ;;  %v313_v32 = vstv %s1235_s4  ;;  %v316_v33 = vstv %s1237_s5  ;;  %s1268_s22 = sld [smem:[#allocation3 + $0x15]]  ;;  %s1270_s24 = sld [smem:[#allocation3 + $0x16]]  ;;  %v303_v35 = vadd.f32 %v302_v27, %v300_v24 }
  0x3f   : > { %v296_v30 = vadd.f32 %v295_v21, %v294_v23  ;;  %s1273_s17 = scalar_lea.vmem [#allocation4], %s1214_s15  ;;  %v314_v37 = vmul.f32 %v1227_v12, %v313_v32  ;;  %v317_v38 = vmul.f32 %v1230_v13, %v316_v33  ;;  %v319_v39 = vstv %s1240_s6  ;;  %s1285_s27 = sld [smem:[#allocation3 + $0x18]] }
  0x40   : > { %v1276_v34 = vld [vmem:[%s1273_s17] sm:$0xff]  ;;  %v337_v40 = vstv %s1243_s7  ;;  %v339_v41 = vstv %s1245_s8  ;;  %v342_v42 = vstv %s1247_s9  ;;  %s1287_s28 = sld [smem:[#allocation3 + $0x19]]  ;;  %v306_v43 = vadd.f32 %v305_v28, %v303_v35  ;;  %s1289_s15 = sld [smem:[#allocation3 + $0x17]] }
  0x41   : > { %v315_v44 = vadd.f32 %v314_v37, %v312_v31  ;;  %v338_v45 = vmul.f32 %v337_v40, %v1224_v11  ;;  %v340_v46 = vmul.f32 %v1227_v12, %v339_v41  ;;  %v1294_v47 = vmul.f32 %v296_v30, %v1276_v34  ;;  %s1299_s29 = sld [smem:[#allocation3 + $0x1a]]  ;;  %s1301_s30 = sld [smem:[#allocation3 + $0x1c]]  ;;  %v1325_v4 = vld [vmem:[%s1273_s17 + $0x8] sm:$0xff] }
  0x42   : > { %v343_v48 = vmul.f32 %v1230_v13, %v342_v42  ;;  %v349_v49 = vstv %s1252_s11  ;;  %v351_v50 = vstv %s1255_s12  ;;  %v308_v51 = vadd.f32 %v307_v36, %v306_v43  ;;  %s1304_s4 = sld [smem:[#allocation3 + $0x1b]]  ;;  %s1310_s5 = sld [smem:[#allocation3 + $0x1d]] }
  0x43   : > { %v318_v52 = vadd.f32 %v317_v38, %v315_v44  ;;  %v341_v53 = vadd.f32 %v340_v46, %v338_v45  ;;  %v350_v54 = vmul.f32 %v349_v49, %v1224_v11  ;;  %v345_v55 = vstv %s1250_s10  ;;  %s1312_s6 = sld [smem:[#allocation3 + $0x1e]]  ;;  %s1319_s7 = sld [smem:[#allocation3 + $0x20]]  ;;  %v1368_v38 = vld [vmem:[%s1273_s17 + $0x10] sm:$0xff] }
  0x44   : > { %v352_v56 = vmul.f32 %v1227_v12, %v351_v50  ;;  %v354_v57 = vstv %s1257_s13  ;;  %v361_v58 = vstv %s1263_s16  ;;  %v357_v62 = vstv %s1261_s14  ;;  %s1321_s8 = sld [smem:[#allocation3 + $0x21]]  ;;  %s1329_s9 = sld [smem:[#allocation3 + $0x1f]] }
  0x45   : > { %v320_v59 = vadd.f32 %v319_v39, %v318_v52  ;;  %v344_v60 = vadd.f32 %v343_v48, %v341_v53  ;;  %v355_v61 = vmul.f32 %v1230_v13, %v354_v57  ;;  %v362_v0 = vmul.f32 %v361_v58, %v1224_v11  ;;  %s1332_s10 = sld [smem:[#allocation3 + $0x22]]  ;;  %s1336_s11 = sld [smem:[#allocation3 + $0x24]] }
  0x46   : > { %v353_v63 = vadd.f32 %v352_v56, %v350_v54  ;;  %v363_v1 = vstv %s1268_s22  ;;  %v366_v2 = vstv %s1270_s24  ;;  %v309_v3 = vmul.f32 %v308_v51, %v1276_v34  ;;  %s1339_s12 = sld [smem:[#allocation3 + $0x23]]  ;;  %s1346_s13 = sld [smem:[#allocation3 + $0x25]] }
  0x47   : > { %v346_v5 = vadd.f32 %v345_v55, %v344_v60  ;;  %v364_v6 = vmul.f32 %v1227_v12, %v363_v1  ;;  %v367_v7 = vmul.f32 %v1230_v13, %v366_v2  ;;  %v321_v8 = vmul.f32 %v320_v59, %v1276_v34  ;;  %s1348_s14 = sld [smem:[#allocation3 + $0x26]]  ;;  %s1356_s16 = sld [smem:[#allocation3 + $0x28]] }
  0x48   : > { %v356_v9 = vadd.f32 %v355_v61, %v353_v63  ;;  %v387_v10 = vstv %s1285_s27  ;;  %v389_v14 = vstv %s1287_s28  ;;  %v369_v16 = vstv %s1289_s15  ;;  %s1358_s22 = sld [smem:[#allocation3 + $0x29]]  ;;  %s1362_s24 = sld [smem:[#allocation3 + $0x27]] }
  0x49   : > { %v365_v15 = vadd.f32 %v364_v6, %v362_v0  ;;  %v388_v17 = vmul.f32 %v387_v10, %v1224_v11  ;;  %v390_v18 = vmul.f32 %v1227_v12, %v389_v14  ;;  %v347_v19 = vmul.f32 %v1325_v4, %v346_v5  ;;  %s1372_s27 = sld [smem:[#allocation3 + $0x2a]]  ;;  %s1374_s28 = sld [smem:[#allocation3 + $0x2c]] }
  0x4a   : > { %v358_v20 = vadd.f32 %v357_v62, %v356_v9  ;;  %v392_v21 = vstv %s1299_s29  ;;  %v399_v22 = vstv %s1301_s30  ;;  %v395_v26 = vstv %s1304_s4  ;;  %s1378_s15 = sld [smem:[#allocation3 + $0x2b]]  ;;  %s1383_s29 = sld [smem:[#allocation3 + $0x2d]] }
  0x4b   : > { %v368_v23 = vadd.f32 %v367_v7, %v365_v15  ;;  %v391_v24 = vadd.f32 %v390_v18, %v388_v17  ;;  %v393_v25 = vmul.f32 %v1230_v13, %v392_v21  ;;  %v400_v28 = vmul.f32 %v399_v22, %v1224_v11  ;;  %s1385_s30 = sld [smem:[#allocation3 + $0x2e]]  ;;  %s1394_s4 = sld [smem:[#allocation3 + $0x30]]  ;;  %v1424_v18 = vld [vmem:[%s1273_s17 + $0x18] sm:$0xff] }
  0x4c   : > { %v359_v27 = vmul.f32 %v1325_v4, %v358_v20  ;;  %v401_v29 = vstv %s1310_s5  ;;  %v404_v30 = vstv %s1312_s6  ;;  %v348_v36 = vadd.f32 %v347_v19, %v1294_v47  ;;  %s1396_s5 = sld [smem:[#allocation3 + $0x31]]  ;;  %s1398_s6 = sld [smem:[#allocation3 + $0x2f]] }
  0x4d   : > { %v370_v31 = vadd.f32 %v369_v16, %v368_v23  ;;  %v394_v32 = vadd.f32 %v393_v25, %v391_v24  ;;  %v402_v33 = vmul.f32 %v1227_v12, %v401_v29  ;;  %v405_v35 = vmul.f32 %v1230_v13, %v404_v30 }
  0x4e   : > { %v1365_v37 = vadd.f32 %v359_v27, %v309_v3  ;;  %v411_v39 = vstv %s1319_s7  ;;  %v413_v40 = vstv %s1321_s8  ;;  %v407_v45 = vstv %s1329_s9  ;;  %s1404_s7 = sld [smem:[#allocation3 + $0x32]]  ;;  %s1406_s8 = sld [smem:[#allocation3 + $0x34]] }
  0x4f   : > { %v371_v41 = vmul.f32 %v1325_v4, %v370_v31  ;;  %v396_v42 = vadd.f32 %v395_v26, %v394_v32  ;;  %v403_v43 = vadd.f32 %v402_v33, %v400_v28  ;;  %v412_v44 = vmul.f32 %v411_v39, %v1224_v11  ;;  %s1411_s9 = sld [smem:[#allocation3 + $0x33]] }
  0x50   : > { %v414_v46 = vmul.f32 %v1227_v12, %v413_v40  ;;  %v416_v47 = vstv %s1332_s10  ;;  %v437_v48 = vstv %s1336_s11  ;;  %v419_v52 = vstv %s1339_s12  ;;  %s1416_s10 = sld [smem:[#allocation3 + $0x35]]  ;;  %s1418_s11 = sld [smem:[#allocation3 + $0x36]] }
  0x51   : > { %v397_v49 = vmul.f32 %v1368_v38, %v396_v42  ;;  %v406_v50 = vadd.f32 %v405_v35, %v403_v43  ;;  %v417_v51 = vmul.f32 %v1230_v13, %v416_v47  ;;  %v438_v54 = vmul.f32 %v437_v48, %v1224_v11  ;;  %s1429_s12 = sld [smem:[#allocation3 + $0x38]] }
  0x52   : > { %v415_v53 = vadd.f32 %v414_v46, %v412_v44  ;;  %v439_v55 = vstv %s1346_s13  ;;  %v442_v56 = vstv %s1348_s14  ;;  %v372_v57 = vadd.f32 %v371_v41, %v321_v8  ;;  %s1431_s13 = sld [smem:[#allocation3 + $0x39]]  ;;  %s1435_s14 = sld [smem:[#allocation3 + $0x37]] }
  0x53   : > { %v408_v58 = vadd.f32 %v407_v45, %v406_v50  ;;  %v440_v59 = vmul.f32 %v1227_v12, %v439_v55  ;;  %v443_v60 = vmul.f32 %v1230_v13, %v442_v56  ;;  %v398_v61 = vadd.f32 %v397_v49, %v348_v36  ;;  %v1479_v56 = vld [vmem:[%s1273_s17 + $0x20] sm:$0xff]  ;;  %s1495_s17 = sld [smem:[#allocation3 + $0x45]] }
  0x54   : > { %v418_v62 = vadd.f32 %v417_v51, %v415_v53  ;;  %v449_v63 = vstv %s1356_s16  ;;  %v451_v0 = vstv %s1358_s22  ;;  %v445_v2 = vstv %s1362_s24  ;;  %s1440_s16 = sld [smem:[#allocation3 + $0x3a]]  ;;  %s1444_s22 = sld [smem:[#allocation3 + $0x3c]] }
  0x55   : > { %v441_v1 = vadd.f32 %v440_v59, %v438_v54  ;;  %v450_v3 = vmul.f32 %v449_v63, %v1224_v11  ;;  %v452_v5 = vmul.f32 %v1227_v12, %v451_v0  ;;  %v409_v6 = vmul.f32 %v1368_v38, %v408_v58  ;;  %s1447_s24 = sld [smem:[#allocation3 + $0x3b]] }
  0x56   : > { %v420_v7 = vadd.f32 %v419_v52, %v418_v62  ;;  %v454_v8 = vstv %s1372_s27  ;;  %v461_v9 = vstv %s1374_s28  ;;  %v457_v16 = vstv %s1378_s15  ;;  %s1454_s27 = sld [smem:[#allocation3 + $0x3d]]  ;;  %s1456_s28 = sld [smem:[#allocation3 + $0x3e]] }
  0x57   : > { %v444_v10 = vadd.f32 %v443_v60, %v441_v1  ;;  %v453_v14 = vadd.f32 %v452_v5, %v450_v3  ;;  %v455_v15 = vmul.f32 %v1230_v13, %v454_v8  ;;  %v462_v19 = vmul.f32 %v461_v9, %v1224_v11  ;;  %s1464_s15 = sld [smem:[#allocation3 + $0x40]]  ;;  %v1490_v1 = vld [vmem:[%s1221_s26 + $0x20] sm:$0xff] }
  0x58   : > { %v421_v17 = vmul.f32 %v1368_v38, %v420_v7  ;;  %v463_v20 = vstv %s1383_s29  ;;  %v466_v21 = vstv %s1385_s30  ;;  %v410_v26 = vadd.f32 %v409_v6, %v1365_v37  ;;  %s1466_s29 = sld [smem:[#allocation3 + $0x41]]  ;;  %s1470_s30 = sld [smem:[#allocation3 + $0x3f]] }
  0x59   : > { %v446_v22 = vadd.f32 %v445_v2, %v444_v10  ;;  %v456_v23 = vadd.f32 %v455_v15, %v453_v14  ;;  %v464_v24 = vmul.f32 %v1227_v12, %v463_v20  ;;  %v467_v25 = vmul.f32 %v1230_v13, %v466_v21  ;;  %v1493_v2 = vld [vmem:[%s1221_s26 + $0x28] sm:$0xff] }
  0x5a   : > { %v1438_v27 = vadd.f32 %v421_v17, %v372_v57  ;;  %v487_v28 = vstv %s1394_s4  ;;  %v489_v29 = vstv %s1396_s5  ;;  %v469_v35 = vstv %s1398_s6  ;;  %s1474_s4 = sld [smem:[#allocation3 + $0x42]]  ;;  %s1476_s5 = sld [smem:[#allocation3 + $0x44]] }
  0x5b   : > { %v447_v30 = vmul.f32 %v1424_v18, %v446_v22  ;;  %v458_v31 = vadd.f32 %v457_v16, %v456_v23  ;;  %v465_v32 = vadd.f32 %v464_v24, %v462_v19  ;;  %v488_v33 = vmul.f32 %v487_v28, %v1224_v11  ;;  %s1497_s6 = sld [smem:[#allocation3 + $0x46]] }
  0x5c   : > { %v490_v36 = vmul.f32 %v1227_v12, %v489_v29  ;;  %v492_v37 = vstv %s1404_s7  ;;  %v499_v39 = vstv %s1406_s8  ;;  %v495_v43 = vstv %s1411_s9  ;;  %s1508_s7 = sld [smem:[#allocation3 + $0x49]]  ;;  %s1510_s8 = sld [smem:[#allocation3 + $0x43]] }
  0x5d   : > { %v459_v40 = vmul.f32 %v1424_v18, %v458_v31  ;;  %v468_v41 = vadd.f32 %v467_v25, %v465_v32  ;;  %v493_v42 = vmul.f32 %v1230_v13, %v492_v37  ;;  %v500_v45 = vmul.f32 %v499_v39, %v1224_v11  ;;  %s1512_s9 = sld [smem:[#allocation3 + $0x47]] }
  0x5e   : > { %v491_v44 = vadd.f32 %v490_v36, %v488_v33  ;;  %v501_v46 = vstv %s1416_s10  ;;  %v504_v47 = vstv %s1418_s11  ;;  %v448_v48 = vadd.f32 %v447_v30, %v398_v61  ;;  %v1485_v61 = vld [vmem:[%s1221_s26 + $0x18] sm:$0xff]  ;;  %s1506_s26 = sld [smem:[#allocation3 + $0x48]]  ;;  %s1519_s10 = sld [smem:[#allocation3 + $0x4a]] }
  0x5f   : > { %v470_v49 = vadd.f32 %v469_v35, %v468_v41  ;;  %v502_v50 = vmul.f32 %v1227_v12, %v501_v46  ;;  %v505_v51 = vmul.f32 %v1230_v13, %v504_v47  ;;  %v460_v52 = vadd.f32 %v459_v40, %v410_v26  ;;  %s1521_s11 = sld [smem:[#allocation3 + $0x4c]] }
  0x60   : > { %v494_v53 = vadd.f32 %v493_v42, %v491_v44  ;;  %v511_v54 = vstv %s1429_s12  ;;  %v513_v55 = vstv %s1431_s13  ;;  %v507_v58 = vstv %s1435_s14  ;;  %s1525_s12 = sld [smem:[#allocation3 + $0x4b]]  ;;  %s1528_s13 = scalar_lea.vmem [#allocation6], %s1216_s21 }
  0x61   : > { %v503_v57 = vadd.f32 %v502_v50, %v500_v45  ;;  %v512_v59 = vmul.f32 %v511_v54, %v1224_v11  ;;  %v514_v60 = vmul.f32 %v1227_v12, %v513_v55  ;;  %v471_v62 = vmul.f32 %v1424_v18, %v470_v49  ;;  %s1535_s14 = sld [smem:[#allocation3 + $0x4d]]  ;;  %s1541_s21 = sld [smem:[#allocation3 + $0x4f]] }
  0x62   : > { %v496_v63 = vadd.f32 %v495_v43, %v494_v53  ;;  %v516_v0 = vstv %s1440_s16  ;;  %v547_v3 = vstv %s1444_s22  ;;  %v519_v6 = vstv %s1447_s24  ;;  %s1537_s16 = sld [smem:[#allocation3 + $0x4e]]  ;;  %s1543_s22 = sld [smem:[#allocation3 + $0x50]] }
  0x63   : > { %v506_v11 = vadd.f32 %v505_v51, %v503_v57  ;;  %v515_v5 = vadd.f32 %v514_v60, %v512_v59  ;;  %v517_v12 = vmul.f32 %v1230_v13, %v516_v0  ;;  %v548_v8 = vmul.f32 %v1485_v61, %v547_v3  ;;  %s1548_s24 = sld [smem:[#allocation3 + $0x51]] }
  0x64   : > { %v497_v7 = vmul.f32 %v1479_v56, %v496_v63  ;;  %v549_v9 = vstv %s1454_s27  ;;  %v552_v10 = vstv %s1456_s28  ;;  %v472_v17 = vadd.f32 %v471_v62, %v1438_v27  ;;  %s1550_s27 = sld [smem:[#allocation3 + $0x52]]  ;;  %s1557_s28 = sld [smem:[#allocation3 + $0x54]] }
  0x65   : > { %v508_v14 = vadd.f32 %v507_v58, %v506_v11  ;;  %v518_v15 = vadd.f32 %v517_v12, %v515_v5  ;;  %v550_v13 = vmul.f32 %v1490_v1, %v549_v9  ;;  %v553_v16 = vmul.f32 %v1493_v2, %v552_v10 }
  0x66   : > { %v498_v19 = vadd.f32 %v497_v7, %v448_v48  ;;  %v559_v20 = vstv %s1464_s15  ;;  %v561_v21 = vstv %s1466_s29  ;;  %v555_v26 = vstv %s1470_s30  ;;  %s1559_s15 = sld [smem:[#allocation3 + $0x55]]  ;;  %s1562_s29 = sld [smem:[#allocation3 + $0x53]] }
  0x67   : > { %v509_v22 = vmul.f32 %v1479_v56, %v508_v14  ;;  %v520_v23 = vadd.f32 %v519_v6, %v518_v15  ;;  %v551_v24 = vadd.f32 %v550_v13, %v548_v8  ;;  %v560_v25 = vmul.f32 %v1485_v61, %v559_v20  ;;  %s1570_s30 = sld [smem:[#allocation3 + $0x56]] }
  0x68   : > { %523 = vst [vmem:[%s1528_s13] sm:$0xff] %v498_v19  ;;  %v562_v27 = vmul.f32 %v1490_v1, %v561_v21  ;;  %v564_v28 = vstv %s1474_s4  ;;  %v571_v29 = vstv %s1476_s5  ;;  %v573_v37 = vstv %s1495_s17  ;;  %s1572_s4 = sld [smem:[#allocation3 + $0x58]]  ;;  %s1576_s5 = sld [smem:[#allocation3 + $0x57]] }
  0x69   : > { %v510_v30 = vadd.f32 %v509_v22, %v460_v52  ;;  %v521_v31 = vmul.f32 %v1479_v56, %v520_v23  ;;  %v554_v32 = vadd.f32 %v553_v16, %v551_v24  ;;  %v565_v33 = vmul.f32 %v1493_v2, %v564_v28  ;;  %s1584_s17 = sld [smem:[#allocation3 + $0x59]] }
  0x6a   : > { %v563_v35 = vadd.f32 %v562_v27, %v560_v25  ;;  %v572_v36 = vmul.f32 %v1485_v61, %v571_v29  ;;  %v576_v39 = vstv %s1497_s6  ;;  %v574_v41 = vmul.f32 %v1490_v1, %v573_v37  ;;  %s1586_s6 = sld [smem:[#allocation3 + $0x5a]] }
  0x6b   : > { %v522_v40 = vadd.f32 %v521_v31, %v472_v17  ;;  %992 = vst [vmem:[%s1528_s13 + $0x8] sm:$0xff] %v510_v30  ;;  %v577_v42 = vmul.f32 %v1493_v2, %v576_v39  ;;  %v556_v43 = vadd.f32 %v555_v26, %v554_v32  ;;  %v596_v44 = vstv %s1506_s26  ;;  %s1594_s26 = sld [smem:[#allocation3 + $0x5c]] }
  0x6c   : > { %v598_v45 = vstv %s1508_s7  ;;  %v566_v46 = vadd.f32 %v565_v33, %v563_v35  ;;  %v575_v47 = vadd.f32 %v574_v41, %v572_v36  ;;  %v597_v48 = vmul.f32 %v1485_v61, %v596_v44  ;;  %s1596_s7 = sld [smem:[#allocation3 + $0x5d]] }
  0x6d   : > { %993 = vst [vmem:[%s1528_s13 + $0x10] sm:$0xff] %v522_v40  ;;  %v599_v49 = vmul.f32 %v1490_v1, %v598_v45  ;;  %v567_v50 = vstv %s1510_s8  ;;  %v579_v51 = vstv %s1512_s9  ;;  %v601_v52 = vstv %s1519_s10  ;;  %s1601_s8 = sld [smem:[#allocation3 + $0x5e]]  ;;  %s1606_s9 = sld [smem:[#allocation3 + $0x5b]] }
  0x6e   : > { %v608_v53 = vstv %s1521_s11  ;;  %v578_v54 = vadd.f32 %v577_v42, %v575_v47  ;;  %v602_v57 = vmul.f32 %v1493_v2, %v601_v52  ;;  %v1579_v59 = vmul.f32 %v556_v43, %v1276_v34  ;;  %s1610_s10 = sld [smem:[#allocation3 + $0x60]]  ;;  %s1615_s11 = sld [smem:[#allocation3 + $0x61]] }
  0x6f   : > { %v600_v55 = vadd.f32 %v599_v49, %v597_v48  ;;  %v609_v58 = vmul.f32 %v1485_v61, %v608_v53  ;;  %v604_v60 = vstv %s1525_s12  ;;  %v610_v62 = vstv %s1535_s14  ;;  %s1619_s12 = sld [smem:[#allocation3 + $0x62]]  ;;  %s1621_s14 = sld [smem:[#allocation3 + $0x5f]] }
  0x70   : > { %v613_v63 = vstv %s1537_s16  ;;  %v568_v0 = vadd.f32 %v567_v50, %v566_v46  ;;  %v611_v11 = vmul.f32 %v1490_v1, %v610_v62  ;;  %v616_v12 = vstv %s1541_s21  ;;  %s1626_s16 = sld [smem:[#allocation3 + $0x64]]  ;;  %s1630_s21 = sld [smem:[#allocation3 + $0x65]] }
  0x71   : > { %v603_v3 = vadd.f32 %v602_v57, %v600_v55  ;;  %v614_v5 = vmul.f32 %v1493_v2, %v613_v63  ;;  %v620_v6 = vstv %s1543_s22  ;;  %v622_v7 = vstv %s1548_s24  ;;  %s1635_s22 = sld [smem:[#allocation3 + $0x63]]  ;;  %s1637_s24 = sld [smem:[#allocation3 + $0x66]] }
  0x72   : > { %v625_v8 = vstv %s1550_s27  ;;  %v580_v9 = vadd.f32 %v579_v51, %v578_v54  ;;  %v612_v14 = vadd.f32 %v611_v11, %v609_v58  ;;  %v621_v15 = vmul.f32 %v1485_v61, %v620_v6  ;;  %s1641_s27 = sld [smem:[#allocation3 + $0x68]] }
  0x73   : > { %v605_v10 = vadd.f32 %v604_v60, %v603_v3  ;;  %v623_v13 = vmul.f32 %v1490_v1, %v622_v7  ;;  %v626_v16 = vmul.f32 %v1493_v2, %v625_v8  ;;  %v645_v17 = vstv %s1557_s28  ;;  %s1647_s28 = sld [smem:[#allocation3 + $0x69]] }
  0x74   : > { %v647_v19 = vstv %s1559_s15  ;;  %v615_v20 = vadd.f32 %v614_v5, %v612_v14  ;;  %v628_v21 = vstv %s1562_s29  ;;  %v646_v22 = vmul.f32 %v1485_v61, %v645_v17  ;;  %s1651_s15 = sld [smem:[#allocation3 + $0x6a]]  ;;  %s1655_s29 = sld [smem:[#allocation3 + $0x67]] }
  0x75   : > { %v648_v23 = vmul.f32 %v1490_v1, %v647_v19  ;;  %v606_v24 = vmul.f32 %v1325_v4, %v605_v10  ;;  %v624_v25 = vadd.f32 %v623_v13, %v621_v15  ;;  %v650_v26 = vstv %s1570_s30  ;;  %s1659_s30 = sld [smem:[#allocation3 + $0x6c]] }
  0x76   : > { %v657_v27 = vstv %s1572_s4  ;;  %v617_v28 = vadd.f32 %v616_v12, %v615_v20  ;;  %v651_v30 = vmul.f32 %v1493_v2, %v650_v26  ;;  %v653_v31 = vstv %s1576_s5  ;;  %s1664_s4 = sld [smem:[#allocation3 + $0x6d]]  ;;  %s1667_s5 = sld [smem:[#allocation3 + $0x6b]] }
  0x77   : > { %v649_v29 = vadd.f32 %v648_v23, %v646_v22  ;;  %v627_v32 = vadd.f32 %v626_v16, %v624_v25  ;;  %v658_v33 = vmul.f32 %v1485_v61, %v657_v27  ;;  %v659_v35 = vstv %s1584_s17  ;;  %s1671_s17 = sld [smem:[#allocation3 + $0x6e]] }
  0x78   : > { %v662_v36 = vstv %s1586_s6  ;;  %v660_v39 = vmul.f32 %v1490_v1, %v659_v35  ;;  %v569_v41 = vmul.f32 %v568_v0, %v1276_v34  ;;  %v669_v43 = vstv %s1594_s26  ;;  %s1675_s6 = sld [smem:[#allocation3 + $0x70]]  ;;  %s1680_s26 = sld [smem:[#allocation3 + $0x71]] }
  0x79   : > { %v652_v37 = vadd.f32 %v651_v30, %v649_v29  ;;  %v663_v40 = vmul.f32 %v1493_v2, %v662_v36  ;;  %v629_v42 = vadd.f32 %v628_v21, %v627_v32  ;;  %v671_v44 = vstv %s1596_s7  ;;  %s1684_s7 = sld [smem:[#allocation3 + $0x6f]] }
  0x7a   : > { %v618_v45 = vmul.f32 %v1325_v4, %v617_v28  ;;  %v661_v47 = vadd.f32 %v660_v39, %v658_v33  ;;  %v670_v48 = vmul.f32 %v1485_v61, %v669_v43  ;;  %v581_v49 = vmul.f32 %v580_v9, %v1276_v34 }
  0x7b   : > { %v654_v46 = vadd.f32 %v653_v31, %v652_v37  ;;  %v607_v50 = vadd.f32 %v606_v24, %v1579_v59  ;;  %v672_v51 = vmul.f32 %v1490_v1, %v671_v44  ;;  %v674_v52 = vstv %s1601_s8  ;;  %s1686_s8 = sld [smem:[#allocation3 + $0x72]] }
  0x7c   : > { %v664_v53 = vadd.f32 %v663_v40, %v661_v47  ;;  %v665_v54 = vstv %s1606_s9  ;;  %v675_v55 = vmul.f32 %v1493_v2, %v674_v52  ;;  %v694_v57 = vstv %s1610_s10  ;;  %s1691_s9 = sld [smem:[#allocation3 + $0x74]]  ;;  %s1695_s10 = sld [smem:[#allocation3 + $0x75]] }
  0x7d   : > { %v630_v58 = vmul.f32 %v1325_v4, %v629_v42  ;;  %v673_v34 = vadd.f32 %v672_v51, %v670_v48  ;;  %v695_v59 = vmul.f32 %v1485_v61, %v694_v57  ;;  %v696_v60 = vstv %s1615_s11  ;;  %s1699_s11 = sld [smem:[#allocation3 + $0x73]] }
  0x7e   : > { %v619_v62 = vadd.f32 %v618_v45, %v569_v41  ;;  %v655_v63 = vmul.f32 %v1368_v38, %v654_v46  ;;  %v697_v0 = vmul.f32 %v1490_v1, %v696_v60  ;;  %v699_v3 = vstv %s1619_s12  ;;  %s1701_s12 = sld [smem:[#allocation3 + $0x76]] }
  0x7f   : > { %v666_v4 = vadd.f32 %v665_v54, %v664_v53  ;;  %v677_v11 = vstv %s1621_s14  ;;  %v700_v5 = vmul.f32 %v1493_v2, %v699_v3  ;;  %v706_v12 = vstv %s1626_s16  ;;  %s1710_s14 = sld [smem:[#allocation3 + $0x77]]  ;;  %s1064_s16 = sshll.u32 (%p1192_p10), %s920_s0, 3 }
  0x80   : > { %v676_v6 = vadd.f32 %v675_v55, %v673_v34  ;;  %v698_v7 = vadd.f32 %v697_v0, %v695_v59  ;;  %v707_v8 = vmul.f32 %v1485_v61, %v706_v12  ;;  %v708_v9 = vstv %s1630_s21 }
  0x81   : > { %v631_v10 = vadd.f32 %v630_v58, %v581_v49  ;;  %v702_v14 = vstv %s1635_s22  ;;  %v709_v15 = vmul.f32 %v1490_v1, %v708_v9  ;;  %v711_v13 = vstv %s1637_s24  ;;  %s793_s24 = scalar_lea.vmem (%p1192_p10), %s1763_s3, %s1064_s16 }
  0x82   : > { %v656_v16 = vadd.f32 %v655_v63, %v607_v50  ;;  %v701_v17 = vadd.f32 %v700_v5, %v698_v7  ;;  %v712_v19 = vmul.f32 %v1493_v2, %v711_v13  ;;  %v718_v20 = vstv %s1641_s27 }
  0x83   : > { %v667_v21 = vmul.f32 %v1368_v38, %v666_v4  ;;  %v710_v22 = vadd.f32 %v709_v15, %v707_v8  ;;  %v719_v23 = vmul.f32 %v1485_v61, %v718_v20  ;;  %v720_v24 = vstv %s1647_s28  ;;  %v833_v20 = vld [vmem:[%s1528_s13 + $0x8] sm:$0xff] (%p1192_p10) }
  0x84   : > { %v678_v25 = vadd.f32 %v677_v11, %v676_v6  ;;  %v703_v26 = vadd.f32 %v702_v14, %v701_v17  ;;  %v721_v27 = vmul.f32 %v1490_v1, %v720_v24  ;;  %v723_v28 = vstv %s1651_s15  ;;  %834 = vst [vmem:[%s793_s24 + $0x10] sm:$0xff] (%p1192_p10), %v833_v20 }
  0x85   : > { %v713_v29 = vadd.f32 %v712_v19, %v710_v22  ;;  %v714_v30 = vstv %s1655_s29  ;;  %v724_v31 = vmul.f32 %v1493_v2, %v723_v28  ;;  %v743_v32 = vstv %s1659_s30 }
  0x86   : > { %v704_v33 = vmul.f32 %v1424_v18, %v703_v26  ;;  %v722_v35 = vadd.f32 %v721_v27, %v719_v23  ;;  %v744_v36 = vmul.f32 %v1485_v61, %v743_v32  ;;  %v745_v37 = vstv %s1664_s4 }
  0x87   : > { %v668_v39 = vadd.f32 %v667_v21, %v619_v62  ;;  %v726_v40 = vstv %s1667_s5  ;;  %v746_v41 = vmul.f32 %v1490_v1, %v745_v37  ;;  %v748_v42 = vstv %s1671_s17  ;;  %v835_v21 = vld [vmem:[%s1528_s13 + $0x10] sm:$0xff] (%p1192_p10) }
  0x88   : > { %v715_v43 = vadd.f32 %v714_v30, %v713_v29  ;;  %v725_v44 = vadd.f32 %v724_v31, %v722_v35  ;;  %v749_v45 = vmul.f32 %v1493_v2, %v748_v42  ;;  %v755_v46 = vstv %s1675_s6  ;;  %836 = vst [vmem:[%s793_s24 + $0x20] sm:$0xff] (%p1192_p10), %v835_v21 }
  0x89   : > { %v679_v47 = vmul.f32 %v1368_v38, %v678_v25  ;;  %v747_v48 = vadd.f32 %v746_v41, %v744_v36  ;;  %v756_v49 = vmul.f32 %v1485_v61, %v755_v46  ;;  %v757_v50 = vstv %s1680_s26 }
  0x8a   : > { %v705_v51 = vadd.f32 %v704_v33, %v656_v16  ;;  %v751_v52 = vstv %s1684_s7  ;;  %v758_v53 = vmul.f32 %v1490_v1, %v757_v50  ;;  %v760_v54 = vstv %s1686_s8 }
  0x8b   : > { %v727_v55 = vadd.f32 %v726_v40, %v725_v44  ;;  %v750_v57 = vadd.f32 %v749_v45, %v747_v48  ;;  %v761_v58 = vmul.f32 %v1493_v2, %v760_v54  ;;  %v767_v34 = vstv %s1691_s9 }
  0x8c   : > { %v716_v59 = vmul.f32 %v1424_v18, %v715_v43  ;;  %v759_v38 = vadd.f32 %v758_v53, %v756_v49  ;;  %v768_v60 = vmul.f32 %v1485_v61, %v767_v34  ;;  %v769_v62 = vstv %s1695_s10 }
  0x8d   : > { %v752_v63 = vadd.f32 %v751_v52, %v750_v57  ;;  %v763_v0 = vstv %s1699_s11  ;;  %v770_v3 = vmul.f32 %v1490_v1, %v769_v62  ;;  %v772_v4 = vstv %s1701_s12 }
  0x8e   : > { %v762_v11 = vadd.f32 %v761_v58, %v759_v38  ;;  %v773_v5 = vmul.f32 %v1493_v2, %v772_v4  ;;  %v680_v12 = vadd.f32 %v679_v47, %v631_v10  ;;  %v728_v6 = vmul.f32 %v1424_v18, %v727_v55  ;;  %v831_v18 = vld [vmem:[%s1528_s13] sm:$0xff] (%p1192_p10) }
  0x8f   : > { %v753_v7 = vmul.f32 %v1479_v56, %v752_v63  ;;  %v771_v8 = vadd.f32 %v770_v3, %v768_v60  ;;  %v717_v9 = vadd.f32 %v716_v59, %v668_v39  ;;  %v775_v14 = vstv %s1710_s14  ;;  %832 = vst [vmem:[%s793_s24] sm:$0xff] (%p1192_p10), %v831_v18 }
  0x90   : > { %v764_v61 = vadd.f32 %v763_v0, %v762_v11  ;;  %v729_v16 = vadd.f32 %v728_v6, %v680_v12 }
  0x91   : > { %v754_v15 = vadd.f32 %v753_v7, %v705_v51  ;;  %v774_v13 = vadd.f32 %v773_v5, %v771_v8 }
  0x92   : > { %v765_v1 = vmul.f32 %v1479_v56, %v764_v61 }
  0x93   : > { %v776_v17 = vadd.f32 %v775_v14, %v774_v13  ;;  %1061 = vst [vmem:[%s1528_s13 + $0x18] sm:$0xff] %v754_v15  ;;  %791 = sbr.rel (!%p1192_p10) target bundleno = 162 (0xa2), region = 108 }
  0x94   : > { %v766_v19 = vadd.f32 %v765_v1, %v717_v9 }
  0x95   : > { %v777_v2 = vmul.f32 %v1479_v56, %v776_v17 }
  0x96   : > { %1062 = vst [vmem:[%s1528_s13 + $0x20] sm:$0xff] %v766_v19 }
  0x97   : > { %v778_v10 = vadd.f32 %v777_v2, %v729_v16 }
  0x99   : > { %1063 = vst [vmem:[%s1528_s13 + $0x28] sm:$0xff] %v778_v10 }
  0x9a   : > { %v837_v56 = vld [vmem:[%s1528_s13 + $0x18] sm:$0xff] }
  0x9b   : > { %838 = vst [vmem:[%s793_s24 + $0x30] sm:$0xff] %v837_v56 }
  0x9d   : > { %v839_v22 = vld [vmem:[%s1528_s13 + $0x20] sm:$0xff] }
  0x9e   : > { %840 = vst [vmem:[%s793_s24 + $0x40] sm:$0xff] %v839_v22 }
  0xa0   : > { %v841_v23 = vld [vmem:[%s1528_s13 + $0x28] sm:$0xff] }
  0xa1   : > { %842 = vst [vmem:[%s793_s24 + $0x50] sm:$0xff] %v841_v23 }
  0xa2 PF: > { %p16_p1 = scmp.ge.s32.totalorder %s1175_s20, 4   ;;  %s1766_s17 = smov %s1128_s18 }
  0xa3   : > { %s1767_s18 = smov %s1186_s23  ;;  %s1768_s19 = smov %s1175_s20 }
  0xa4   :  { %18 = sbr.rel (!%p16_p1) target bundleno = 17 (0x11), region = 199 }

</bundles_post_ra>
